<compile_context>
chip_gen: v7x
topology: tpu7x:2x2x1
jax: 0.10.0
libtpu: 0.0.40
codegen_flags: <defaults>
</compile_context>

<pallas_src>
import jax
import jax.numpy as jnp
from jax.experimental import pallas as pl
from jax.experimental.pallas import tpu as pltpu

N_ACTIONS = 6
N_PAD = 128          # lane-dense padded width for the final linear / softmax
NEG_BIG = -1e30      # bias for padded softmax columns -> exp() underflows to 0


# ----------------------------------------------------------------------------
# Fused Pallas kernel: whole p_Net forward for one image per grid step
# ----------------------------------------------------------------------------
def _fused_forward_kernel(cols_ref, w1_ref, b1_ref, w2_ref, b2_ref,
                          w3_ref, b3_ref, l1w_ref, l1b_ref, l2w_ref, l2b_ref,
                          l3w_ref, l3b_ref, out_ref, ph_ref, a2p_ref):
    """cols_ref : (1, 256, 64)  conv1 patches; rows ordered (ph_r, ph_c, i, j)
                  with output pixel (p, q) = (2i + ph_r, 2j + ph_c).
       ph_ref   : (4, 10, 10, 16) scratch - conv1 output per (row,col) phase,
                  zero-padded by 1 on each spatial side (conv2's padding).
       a2p_ref  : (10, 10, 32)    scratch - conv2 output, zero-padded by 1
                  (conv3's padding)."""
    f32 = jnp.float32

    # -------- conv1: (256,64) @ (64,16) + b, ReLU (MXU) -----------------------
    y1 = jnp.dot(cols_ref[0], w1_ref[...], preferred_element_type=f32)
    y1 = jnp.maximum(y1 + b1_ref[...], 0.0)                       # (256, 16)

    # Scatter into padded polyphase scratch.  Zero every step: scratch is not
    # guaranteed initialized and the batch axis may be split across cores.
    ph_ref[...] = jnp.zeros_like(ph_ref)
    for phase in range(4):
        block = y1[phase * 64:(phase + 1) * 64, :]                # (64, 16)
        ph_ref[phase, 1:9, 1:9, :] = block.reshape(8, 8, 16)

    # -------- conv2: k=4, s=2, pad=1 -> (8,8,32) ------------------------------
    # y2[pp,qq,:] = sum_{kh,kw} y1[2pp+kh-1, 2qq+kw-1, :] @ W2[kh,kw]
    acc2 = jnp.zeros((64, 32), f32)
    for kh in range(4):
        rh, sh = (kh + 1) % 2, (kh + 1) // 2
        for kw in range(4):
            rw, sw = (kw + 1) % 2, (kw + 1) // 2
            slab = ph_ref[2 * rh + rw, sh:sh + 8, sw:sw + 8, :]   # (8, 8, 16)
            acc2 = acc2 + jnp.dot(slab.reshape(64, 16),
                                  w2_ref[kh * 4 + kw],
                                  preferred_element_type=f32)
    y2 = jnp.maximum(acc2 + b2_ref[...], 0.0)                     # (64,32) rows p*8+q

    # -------- conv3: k=3, s=1, pad=1 -> (8,8,64) ------------------------------
    a2p_ref[...] = jnp.zeros_like(a2p_ref)
    a2p_ref[1:9, 1:9, :] = y2.reshape(8, 8, 32)
    acc3 = jnp.zeros((64, 64), f32)
    for kh in range(3):
        for kw in range(3):
            slab = a2p_ref[kh:kh + 8, kw:kw + 8, :]               # (8, 8, 32)
            acc3 = acc3 + jnp.dot(slab.reshape(64, 32),
                                  w3_ref[kh * 3 + kw],
                                  preferred_element_type=f32)
    y3 = jnp.maximum(acc3 + b3_ref[...], 0.0)                     # (64,64) rows p*8+q

    # -------- 2x2 maxpool fused into the linear1 contraction ------------------
    # pooled(h,w,:) = max over y3 rows {2h,2h+1} x {2w,2w+1}; the NCHW-flatten
    # permutation is folded into l1w so chunk hw*64:(hw+1)*64 matches (h,w,c).
    acc1 = l1b_ref[...]                                           # (1, 256)
    for h in range(4):
        for w in range(4):
            r0 = (2 * h) * 8 + 2 * w
            pooled = jnp.maximum(
                jnp.maximum(y3[r0:r0 + 1, :], y3[r0 + 1:r0 + 2, :]),
                jnp.maximum(y3[r0 + 8:r0 + 9, :], y3[r0 + 9:r0 + 10, :]))
            hw = h * 4 + w
            acc1 = acc1 + jnp.dot(pooled, l1w_ref[hw * 64:(hw + 1) * 64, :],
                                  preferred_element_type=f32)
    h1 = jnp.maximum(acc1, 0.0)                                   # (1, 256)

    # -------- linear2 + ReLU, linear3 (128-lane padded) + softmax -------------
    h2 = jnp.maximum(
        jnp.dot(h1, l2w_ref[...], preferred_element_type=f32) + l2b_ref[...], 0.0)
    logits = jnp.dot(h2, l3w_ref[...], preferred_element_type=f32) + l3b_ref[...]
    m = jnp.max(logits, axis=-1, keepdims=True)
    e = jnp.exp(logits - m)                    # padded lanes: exp(-1e30 - m) == 0
    probs = e / jnp.sum(e, axis=-1, keepdims=True)   # exact divide (keeps sum==1)
    out_ref[0] = probs.astype(out_ref.dtype)


# ----------------------------------------------------------------------------
# Host-side glue
# ----------------------------------------------------------------------------
def _conv1_patches(x_nchw):
    """Conv1 8x8/stride-4/pad-1 patch extraction; rows emitted directly in the
    polyphase order the fused kernel expects."""
    B = x_nchw.shape[0]
    xpad = jnp.pad(x_nchw[:, 0, :, :], ((0, 0), (1, 1), (1, 1)))   # (B, 68, 68)
    pats = []
    for kh in range(8):
        for kw in range(8):
            pats.append(jax.lax.slice(xpad, (0, kh, kw),
                                      (B, kh + 61, kw + 61), (1, 4, 4)))
    cols = jnp.stack(pats, axis=-1)                                # (B,16,16,64)
    # reorder output pixels (p,q) -> (ph_r, ph_c, i, j), p = 2i+ph_r, q = 2j+ph_c
    cols = cols.reshape(B, 8, 2, 8, 2, 64).transpose(0, 2, 4, 1, 3, 5)
    return cols.reshape(B, 256, 64)


def prepare_params(params):
    """One-time (outside the hot path) conversion of PyTorch-layout weights to
    the kernel's matmul layouts.  Also folds the NCHW flatten permutation into
    linear1 and pads linear3 to 128 lanes."""
    f32 = jnp.float32
    w1 = jnp.transpose(params["conv1_w"], (2, 3, 1, 0)).reshape(64, 16)
    w2 = jnp.transpose(params["conv2_w"], (2, 3, 1, 0)).reshape(16, 16, 32)
    w3 = jnp.transpose(params["conv3_w"], (2, 3, 1, 0)).reshape(9, 32, 64)
    # l1: rows ordered (h, w, c) to match the in-kernel pooled (spatial, channel)
    # order; PyTorch flatten order is (c, h, w).
    l1w = (params["l1_w"].T.reshape(64, 4, 4, 256)
           .transpose(1, 2, 0, 3).reshape(1024, 256))
    l3w = jnp.zeros((64, N_PAD), f32).at[:, :N_ACTIONS].set(params["l3_w"].T)
    l3b = jnp.full((1, N_PAD), NEG_BIG, f32).at[0, :N_ACTIONS].set(params["l3_b"])
    return {
        "w1": w1.astype(f32), "b1": params["conv1_b"].reshape(1, 16),
        "w2": w2.astype(f32), "b2": params["conv2_b"].reshape(1, 32),
        "w3": w3.astype(f32), "b3": params["conv3_b"].reshape(1, 64),
        "l1w": l1w.astype(f32), "l1b": params["l1_b"].reshape(1, 256),
        "l2w": params["l2_w"].T.astype(f32), "l2b": params["l2_b"].reshape(1, 64),
        "l3w": l3w, "l3b": l3b,
    }


def p_net_forward(prepared, x_nchw):
    """Matches p_Net.forward.  x_nchw: (B, 1, 66, 66) float32 -> (B, 6)."""
    B = x_nchw.shape[0]
    cols = _conv1_patches(x_nchw)

    grid_spec = pltpu.PrefetchScalarGridSpec(
        num_scalar_prefetch=0,
        grid=(B,),
        in_specs=[
            pl.BlockSpec((1, 256, 64), lambda b: (b, 0, 0)),       # conv1 patches
            pl.BlockSpec((64, 16), lambda b: (0, 0)),              # weights keep a
            pl.BlockSpec((1, 16), lambda b: (0, 0)),               # constant block
            pl.BlockSpec((16, 16, 32), lambda b: (0, 0, 0)),       # index -> stay
            pl.BlockSpec((1, 32), lambda b: (0, 0)),               # VMEM-resident
            pl.BlockSpec((9, 32, 64), lambda b: (0, 0, 0)),
            pl.BlockSpec((1, 64), lambda b: (0, 0)),
            pl.BlockSpec((1024, 256), lambda b: (0, 0)),
            pl.BlockSpec((1, 256), lambda b: (0, 0)),
            pl.BlockSpec((256, 64), lambda b: (0, 0)),
            pl.BlockSpec((1, 64), lambda b: (0, 0)),
            pl.BlockSpec((64, N_PAD), lambda b: (0, 0)),
            pl.BlockSpec((1, N_PAD), lambda b: (0, 0)),
        ],
        out_specs=pl.BlockSpec((1, 1, N_PAD), lambda b: (b, 0, 0)),
        scratch_shapes=[
            pltpu.VMEM((4, 10, 10, 16), jnp.float32),   # conv1 out, padded phases
            pltpu.VMEM((10, 10, 32), jnp.float32),      # conv2 out, padded
        ],
    )
    out = pl.pallas_call(
        _fused_forward_kernel,
        out_shape=jax.ShapeDtypeStruct((B, 1, N_PAD), jnp.float32),
        grid_spec=grid_spec,
        compiler_params=pltpu.CompilerParams(
            dimension_semantics=("parallel",),          # batch -> both TCs on v7x
            vmem_limit_bytes=32 * 1024 * 1024,
        ),
    )(cols, prepared["w1"], prepared["b1"], prepared["w2"], prepared["b2"],
      prepared["w3"], prepared["b3"], prepared["l1w"], prepared["l1b"],
      prepared["l2w"], prepared["l2b"], prepared["l3w"], prepared["l3b"])
    return out[:, 0, :N_ACTIONS]


# ----------------------------------------------------------------------------
# Parameter init (PyTorch-style) and a pure-XLA reference for validation
# ----------------------------------------------------------------------------
def init_params(key, n_actions=N_ACTIONS):
    ks = jax.random.split(key, 12)

    def u(k, shape, fan_in):
        s = 1.0 / float(fan_in) ** 0.5
        return jax.random.uniform(k, shape, jnp.float32, -s, s)

    return {
        "conv1_w": u(ks[0], (16, 1, 8, 8), 1 * 8 * 8),
        "conv1_b": u(ks[1], (16,), 1 * 8 * 8),
        "conv2_w": u(ks[2], (32, 16, 4, 4), 16 * 4 * 4),
        "conv2_b": u(ks[3], (32,), 16 * 4 * 4),
        "conv3_w": u(ks[4], (64, 32, 3, 3), 32 * 3 * 3),
        "conv3_b": u(ks[5], (64,), 32 * 3 * 3),
        "l1_w": u(ks[6], (256, 1024), 1024),
        "l1_b": u(ks[7], (256,), 1024),
        "l2_w": u(ks[8], (64, 256), 256),
        "l2_b": u(ks[9], (64,), 256),
        "l3_w": u(ks[10], (n_actions, 64), 64),
        "l3_b": u(ks[11], (n_actions,), 64),
    }


def _reference_forward(params, x):
    hp = jax.lax.Precision.HIGHEST

    def conv(h, w, b, stride, pad):
        y = jax.lax.conv_general_dilated(
            h, w, window_strides=(stride, stride),
            padding=((pad, pad), (pad, pad)),
            dimension_numbers=("NCHW", "OIHW", "NCHW"), precision=hp)
        return y + b.reshape(1, -1, 1, 1)

    h = jax.nn.relu(conv(x, params["conv1_w"], params["conv1_b"], 4, 1))
    h = jax.nn.relu(conv(h, params["conv2_w"], params["conv2_b"], 2, 1))
    h = jax.nn.relu(conv(h, params["conv3_w"], params["conv3_b"], 1, 1))
    h = jax.lax.reduce_window(h, -jnp.inf, jax.lax.max,
                              (1, 1, 2, 2), (1, 1, 2, 2), "VALID")
    h = h.reshape(h.shape[0], -1)
    h = jax.nn.relu(jnp.dot(h, params["l1_w"].T, precision=hp) + params["l1_b"])
    h = jax.nn.relu(jnp.dot(h, params["l2_w"].T, precision=hp) + params["l2_b"])
    logits = jnp.dot(h, params["l3_w"].T, precision=hp) + params["l3_b"]
    return jax.nn.softmax(logits, axis=-1)


if __name__ == "__main__":
    key = jax.random.PRNGKey(0)
    pkey, xkey = jax.random.split(key)
    params = init_params(pkey)
    prepared = prepare_params(params)        # once, outside the hot path

    # Smallest input consistent with linear1's 1024 features: (B, 1, 66, 66).
    x = jax.random.normal(xkey, (2, 1, 66, 66), dtype=jnp.float32)

    out = jax.block_until_ready(jax.jit(p_net_forward)(prepared, x))
    ref = jax.block_until_ready(jax.jit(_reference_forward)(params, x))

    assert out.shape == (2, N_ACTIONS)
    assert bool(jnp.all(jnp.isfinite(out)))
    assert bool(jnp.allclose(jnp.sum(out, axis=-1), 1.0, atol=1e-5))
    # loose atol allows for MXU f32-pass / accumulation-order rounding differences
    assert bool(jnp.allclose(out, ref, atol=2e-3)), \
        f"max|diff|={float(jnp.max(jnp.abs(out - ref)))}"
    print("KERNEL_OK")
</pallas_src>

<mosaic_0001>
module attributes {stable_mosaic.version = 11 : i64} {
  func.func @_fused_forward_kernel(%arg0: i32, %arg1: memref<1x256x64xf32, #tpu.memory_space<vmem>>, %arg2: memref<64x16xf32, #tpu.memory_space<vmem>>, %arg3: memref<1x16xf32, #tpu.memory_space<vmem>>, %arg4: memref<16x16x32xf32, #tpu.memory_space<vmem>>, %arg5: memref<1x32xf32, #tpu.memory_space<vmem>>, %arg6: memref<9x32x64xf32, #tpu.memory_space<vmem>>, %arg7: memref<1x64xf32, #tpu.memory_space<vmem>>, %arg8: memref<1024x256xf32, #tpu.memory_space<vmem>>, %arg9: memref<1x256xf32, #tpu.memory_space<vmem>>, %arg10: memref<256x64xf32, #tpu.memory_space<vmem>>, %arg11: memref<1x64xf32, #tpu.memory_space<vmem>>, %arg12: memref<64x128xf32, #tpu.memory_space<vmem>>, %arg13: memref<1x128xf32, #tpu.memory_space<vmem>>, %arg14: memref<1x1x128xf32, #tpu.memory_space<vmem>>, %arg15: memref<4x10x10x16xf32, #tpu.memory_space<vmem>>, %arg16: memref<10x10x32xf32, #tpu.memory_space<vmem>>) attributes {dimension_semantics = [#tpu.dimension_semantics<parallel>], iteration_bounds = array<i64: 2>, scalar_prefetch = 0 : i64, scratch_operands = 2 : i64, tpu.core_type = #tpu.core_type<tc>, window_params = [{transform_indices = @transform_0, window_bounds = array<i64: 1, 256, 64>}, {pipeline_mode = #tpu.pipeline_mode<synchronous>, transform_indices = @transform_1, window_bounds = array<i64: 64, 16>}, {pipeline_mode = #tpu.pipeline_mode<synchronous>, transform_indices = @transform_2, window_bounds = array<i64: 1, 16>}, {pipeline_mode = #tpu.pipeline_mode<synchronous>, transform_indices = @transform_3, window_bounds = array<i64: 16, 16, 32>}, {pipeline_mode = #tpu.pipeline_mode<synchronous>, transform_indices = @transform_4, window_bounds = array<i64: 1, 32>}, {pipeline_mode = #tpu.pipeline_mode<synchronous>, transform_indices = @transform_5, window_bounds = array<i64: 9, 32, 64>}, {pipeline_mode = #tpu.pipeline_mode<synchronous>, transform_indices = @transform_6, window_bounds = array<i64: 1, 64>}, {pipeline_mode = #tpu.pipeline_mode<synchronous>, transform_indices = @transform_7, window_bounds = array<i64: 1024, 256>}, {pipeline_mode = #tpu.pipeline_mode<synchronous>, transform_indices = @transform_8, window_bounds = array<i64: 1, 256>}, {pipeline_mode = #tpu.pipeline_mode<synchronous>, transform_indices = @transform_9, window_bounds = array<i64: 256, 64>}, {pipeline_mode = #tpu.pipeline_mode<synchronous>, transform_indices = @transform_10, window_bounds = array<i64: 1, 64>}, {pipeline_mode = #tpu.pipeline_mode<synchronous>, transform_indices = @transform_11, window_bounds = array<i64: 64, 128>}, {pipeline_mode = #tpu.pipeline_mode<synchronous>, transform_indices = @transform_12, window_bounds = array<i64: 1, 128>}, {transform_indices = @transform_13, window_bounds = array<i64: 1, 1, 128>}]} {
    %c0 = arith.constant 0 : index
    %c0_0 = arith.constant 0 : index
    %c0_1 = arith.constant 0 : index
    %0 = vector.load %arg1[%c0, %c0_0, %c0_1] : memref<1x256x64xf32, #tpu.memory_space<vmem>>, vector<1x256x64xf32>
    %1 = vector.shape_cast %0 : vector<1x256x64xf32> to vector<256x64xf32>
    %c0_2 = arith.constant 0 : index
    %c0_3 = arith.constant 0 : index
    %2 = vector.load %arg2[%c0_2, %c0_3] : memref<64x16xf32, #tpu.memory_space<vmem>>, vector<64x16xf32>
    %cst = arith.constant dense<0.000000e+00> : vector<256x16xf32>
    %3 = tpu.matmul %1, %2, %cst {dimension_numbers = #tpu.dot_dimension_numbers<[1], [0], [0], [1], [0, 0, 1, 1], [], []>} : vector<256x64xf32>, vector<64x16xf32>, vector<256x16xf32> -> vector<256x16xf32>
    %c0_4 = arith.constant 0 : index
    %c0_5 = arith.constant 0 : index
    %4 = vector.load %arg3[%c0_4, %c0_5] : memref<1x16xf32, #tpu.memory_space<vmem>>, vector<1x16xf32>
    %5 = vector.broadcast %4 : vector<1x16xf32> to vector<256x16xf32>
    %6 = arith.addf %3, %5 : vector<256x16xf32>
    %cst_6 = arith.constant 0.000000e+00 : f32
    %7 = vector.broadcast %cst_6 : f32 to vector<256x16xf32>
    %8 = arith.maximumf %6, %7 : vector<256x16xf32>
    %cst_7 = arith.constant 0.000000e+00 : f32
    %9 = vector.broadcast %cst_7 : f32 to vector<4x10x10x16xf32>
    %c0_8 = arith.constant 0 : index
    %c0_9 = arith.constant 0 : index
    %c0_10 = arith.constant 0 : index
    %c0_11 = arith.constant 0 : index
    %10 = vector.load %arg15[%c0_8, %c0_9, %c0_10, %c0_11] : memref<4x10x10x16xf32, #tpu.memory_space<vmem>>, vector<4x10x10x16xf32>
    tpu.vector_store %arg15[%c0_8, %c0_9, %c0_10, %c0_11], %9 {strides = array<i32>} : memref<4x10x10x16xf32, #tpu.memory_space<vmem>>, vector<4x10x10x16xf32>,
    %11 = vector.extract_strided_slice %8 {offsets = [0, 0], sizes = [64, 16], strides = [1, 1]} : vector<256x16xf32> to vector<64x16xf32>
    %12 = vector.shape_cast %11 : vector<64x16xf32> to vector<8x8x16xf32>
    %c0_12 = arith.constant 0 : index
    %c1 = arith.constant 1 : index
    %c1_13 = arith.constant 1 : index
    %c0_14 = arith.constant 0 : index
    %13 = vector.load %arg15[%c0_12, %c1, %c1_13, %c0_14] : memref<4x10x10x16xf32, #tpu.memory_space<vmem>>, vector<1x8x8x16xf32>
    %14 = vector.shape_cast %13 : vector<1x8x8x16xf32> to vector<8x8x16xf32>
    %15 = vector.shape_cast %12 : vector<8x8x16xf32> to vector<1x8x8x16xf32>
    tpu.vector_store %arg15[%c0_12, %c1, %c1_13, %c0_14], %15 {strides = array<i32>} : memref<4x10x10x16xf32, #tpu.memory_space<vmem>>, vector<1x8x8x16xf32>,
    %16 = vector.extract_strided_slice %8 {offsets = [64, 0], sizes = [64, 16], strides = [1, 1]} : vector<256x16xf32> to vector<64x16xf32>
    %17 = vector.shape_cast %16 : vector<64x16xf32> to vector<8x8x16xf32>
    %c1_15 = arith.constant 1 : index
    %c1_16 = arith.constant 1 : index
    %c1_17 = arith.constant 1 : index
    %c0_18 = arith.constant 0 : index
    %18 = vector.load %arg15[%c1_15, %c1_16, %c1_17, %c0_18] : memref<4x10x10x16xf32, #tpu.memory_space<vmem>>, vector<1x8x8x16xf32>
    %19 = vector.shape_cast %18 : vector<1x8x8x16xf32> to vector<8x8x16xf32>
    %20 = vector.shape_cast %17 : vector<8x8x16xf32> to vector<1x8x8x16xf32>
    tpu.vector_store %arg15[%c1_15, %c1_16, %c1_17, %c0_18], %20 {strides = array<i32>} : memref<4x10x10x16xf32, #tpu.memory_space<vmem>>, vector<1x8x8x16xf32>,
    %21 = vector.extract_strided_slice %8 {offsets = [128, 0], sizes = [64, 16], strides = [1, 1]} : vector<256x16xf32> to vector<64x16xf32>
    %22 = vector.shape_cast %21 : vector<64x16xf32> to vector<8x8x16xf32>
    %c2 = arith.constant 2 : index
    %c1_19 = arith.constant 1 : index
    %c1_20 = arith.constant 1 : index
    %c0_21 = arith.constant 0 : index
    %23 = vector.load %arg15[%c2, %c1_19, %c1_20, %c0_21] : memref<4x10x10x16xf32, #tpu.memory_space<vmem>>, vector<1x8x8x16xf32>
    %24 = vector.shape_cast %23 : vector<1x8x8x16xf32> to vector<8x8x16xf32>
    %25 = vector.shape_cast %22 : vector<8x8x16xf32> to vector<1x8x8x16xf32>
    tpu.vector_store %arg15[%c2, %c1_19, %c1_20, %c0_21], %25 {strides = array<i32>} : memref<4x10x10x16xf32, #tpu.memory_space<vmem>>, vector<1x8x8x16xf32>,
    %26 = vector.extract_strided_slice %8 {offsets = [192, 0], sizes = [64, 16], strides = [1, 1]} : vector<256x16xf32> to vector<64x16xf32>
    %27 = vector.shape_cast %26 : vector<64x16xf32> to vector<8x8x16xf32>
    %c3 = arith.constant 3 : index
    %c1_22 = arith.constant 1 : index
    %c1_23 = arith.constant 1 : index
    %c0_24 = arith.constant 0 : index
    %28 = vector.load %arg15[%c3, %c1_22, %c1_23, %c0_24] : memref<4x10x10x16xf32, #tpu.memory_space<vmem>>, vector<1x8x8x16xf32>
    %29 = vector.shape_cast %28 : vector<1x8x8x16xf32> to vector<8x8x16xf32>
    %30 = vector.shape_cast %27 : vector<8x8x16xf32> to vector<1x8x8x16xf32>
    tpu.vector_store %arg15[%c3, %c1_22, %c1_23, %c0_24], %30 {strides = array<i32>} : memref<4x10x10x16xf32, #tpu.memory_space<vmem>>, vector<1x8x8x16xf32>,
    %cst_25 = arith.constant 0.000000e+00 : f32
    %31 = vector.broadcast %cst_25 : f32 to vector<64x32xf32>
    %c3_26 = arith.constant 3 : index
    %c0_27 = arith.constant 0 : index
    %c0_28 = arith.constant 0 : index
    %c0_29 = arith.constant 0 : index
    %32 = vector.load %arg15[%c3_26, %c0_27, %c0_28, %c0_29] : memref<4x10x10x16xf32, #tpu.memory_space<vmem>>, vector<1x8x8x16xf32>
    %33 = vector.shape_cast %32 : vector<1x8x8x16xf32> to vector<8x8x16xf32>
    %34 = vector.shape_cast %33 : vector<8x8x16xf32> to vector<64x16xf32>
    %c0_30 = arith.constant 0 : index
    %c0_31 = arith.constant 0 : index
    %c0_32 = arith.constant 0 : index
    %35 = vector.load %arg4[%c0_30, %c0_31, %c0_32] : memref<16x16x32xf32, #tpu.memory_space<vmem>>, vector<1x16x32xf32>
    %36 = vector.shape_cast %35 : vector<1x16x32xf32> to vector<16x32xf32>
    %cst_33 = arith.constant dense<0.000000e+00> : vector<64x32xf32>
    %37 = tpu.matmul %34, %36, %cst_33 {dimension_numbers = #tpu.dot_dimension_numbers<[1], [0], [0], [1], [0, 0, 1, 1], [], []>} : vector<64x16xf32>, vector<16x32xf32>, vector<64x32xf32> -> vector<64x32xf32>
    %38 = arith.addf %31, %37 : vector<64x32xf32>
    %c2_34 = arith.constant 2 : index
    %c0_35 = arith.constant 0 : index
    %c1_36 = arith.constant 1 : index
    %c0_37 = arith.constant 0 : index
    %39 = vector.load %arg15[%c2_34, %c0_35, %c1_36, %c0_37] : memref<4x10x10x16xf32, #tpu.memory_space<vmem>>, vector<1x8x8x16xf32>
    %40 = vector.shape_cast %39 : vector<1x8x8x16xf32> to vector<8x8x16xf32>
    %41 = vector.shape_cast %40 : vector<8x8x16xf32> to vector<64x16xf32>
    %c1_38 = arith.constant 1 : index
    %c0_39 = arith.constant 0 : index
    %c0_40 = arith.constant 0 : index
    %42 = vector.load %arg4[%c1_38, %c0_39, %c0_40] : memref<16x16x32xf32, #tpu.memory_space<vmem>>, vector<1x16x32xf32>
    %43 = vector.shape_cast %42 : vector<1x16x32xf32> to vector<16x32xf32>
    %cst_41 = arith.constant dense<0.000000e+00> : vector<64x32xf32>
    %44 = tpu.matmul %41, %43, %cst_41 {dimension_numbers = #tpu.dot_dimension_numbers<[1], [0], [0], [1], [0, 0, 1, 1], [], []>} : vector<64x16xf32>, vector<16x32xf32>, vector<64x32xf32> -> vector<64x32xf32>
    %45 = arith.addf %38, %44 : vector<64x32xf32>
    %c3_42 = arith.constant 3 : index
    %c0_43 = arith.constant 0 : index
    %c1_44 = arith.constant 1 : index
    %c0_45 = arith.constant 0 : index
    %46 = vector.load %arg15[%c3_42, %c0_43, %c1_44, %c0_45] : memref<4x10x10x16xf32, #tpu.memory_space<vmem>>, vector<1x8x8x16xf32>
    %47 = vector.shape_cast %46 : vector<1x8x8x16xf32> to vector<8x8x16xf32>
    %48 = vector.shape_cast %47 : vector<8x8x16xf32> to vector<64x16xf32>
    %c2_46 = arith.constant 2 : index
    %c0_47 = arith.constant 0 : index
    %c0_48 = arith.constant 0 : index
    %49 = vector.load %arg4[%c2_46, %c0_47, %c0_48] : memref<16x16x32xf32, #tpu.memory_space<vmem>>, vector<1x16x32xf32>
    %50 = vector.shape_cast %49 : vector<1x16x32xf32> to vector<16x32xf32>
    %cst_49 = arith.constant dense<0.000000e+00> : vector<64x32xf32>
    %51 = tpu.matmul %48, %50, %cst_49 {dimension_numbers = #tpu.dot_dimension_numbers<[1], [0], [0], [1], [0, 0, 1, 1], [], []>} : vector<64x16xf32>, vector<16x32xf32>, vector<64x32xf32> -> vector<64x32xf32>
    %52 = arith.addf %45, %51 : vector<64x32xf32>
    %c2_50 = arith.constant 2 : index
    %c0_51 = arith.constant 0 : index
    %c2_52 = arith.constant 2 : index
    %c0_53 = arith.constant 0 : index
    %53 = vector.load %arg15[%c2_50, %c0_51, %c2_52, %c0_53] : memref<4x10x10x16xf32, #tpu.memory_space<vmem>>, vector<1x8x8x16xf32>
    %54 = vector.shape_cast %53 : vector<1x8x8x16xf32> to vector<8x8x16xf32>
    %55 = vector.shape_cast %54 : vector<8x8x16xf32> to vector<64x16xf32>
    %c3_54 = arith.constant 3 : index
    %c0_55 = arith.constant 0 : index
    %c0_56 = arith.constant 0 : index
    %56 = vector.load %arg4[%c3_54, %c0_55, %c0_56] : memref<16x16x32xf32, #tpu.memory_space<vmem>>, vector<1x16x32xf32>
    %57 = vector.shape_cast %56 : vector<1x16x32xf32> to vector<16x32xf32>
    %cst_57 = arith.constant dense<0.000000e+00> : vector<64x32xf32>
    %58 = tpu.matmul %55, %57, %cst_57 {dimension_numbers = #tpu.dot_dimension_numbers<[1], [0], [0], [1], [0, 0, 1, 1], [], []>} : vector<64x16xf32>, vector<16x32xf32>, vector<64x32xf32> -> vector<64x32xf32>
    %59 = arith.addf %52, %58 : vector<64x32xf32>
    %c1_58 = arith.constant 1 : index
    %c1_59 = arith.constant 1 : index
    %c0_60 = arith.constant 0 : index
    %c0_61 = arith.constant 0 : index
    %60 = vector.load %arg15[%c1_58, %c1_59, %c0_60, %c0_61] : memref<4x10x10x16xf32, #tpu.memory_space<vmem>>, vector<1x8x8x16xf32>
    %61 = vector.shape_cast %60 : vector<1x8x8x16xf32> to vector<8x8x16xf32>
    %62 = vector.shape_cast %61 : vector<8x8x16xf32> to vector<64x16xf32>
    %c4 = arith.constant 4 : index
    %c0_62 = arith.constant 0 : index
    %c0_63 = arith.constant 0 : index
    %63 = vector.load %arg4[%c4, %c0_62, %c0_63] : memref<16x16x32xf32, #tpu.memory_space<vmem>>, vector<1x16x32xf32>
    %64 = vector.shape_cast %63 : vector<1x16x32xf32> to vector<16x32xf32>
    %cst_64 = arith.constant dense<0.000000e+00> : vector<64x32xf32>
    %65 = tpu.matmul %62, %64, %cst_64 {dimension_numbers = #tpu.dot_dimension_numbers<[1], [0], [0], [1], [0, 0, 1, 1], [], []>} : vector<64x16xf32>, vector<16x32xf32>, vector<64x32xf32> -> vector<64x32xf32>
    %66 = arith.addf %59, %65 : vector<64x32xf32>
    %c0_65 = arith.constant 0 : index
    %c1_66 = arith.constant 1 : index
    %c1_67 = arith.constant 1 : index
    %c0_68 = arith.constant 0 : index
    %67 = vector.load %arg15[%c0_65, %c1_66, %c1_67, %c0_68] : memref<4x10x10x16xf32, #tpu.memory_space<vmem>>, vector<1x8x8x16xf32>
    %68 = vector.shape_cast %67 : vector<1x8x8x16xf32> to vector<8x8x16xf32>
    %69 = vector.shape_cast %68 : vector<8x8x16xf32> to vector<64x16xf32>
    %c5 = arith.constant 5 : index
    %c0_69 = arith.constant 0 : index
    %c0_70 = arith.constant 0 : index
    %70 = vector.load %arg4[%c5, %c0_69, %c0_70] : memref<16x16x32xf32, #tpu.memory_space<vmem>>, vector<1x16x32xf32>
    %71 = vector.shape_cast %70 : vector<1x16x32xf32> to vector<16x32xf32>
    %cst_71 = arith.constant dense<0.000000e+00> : vector<64x32xf32>
    %72 = tpu.matmul %69, %71, %cst_71 {dimension_numbers = #tpu.dot_dimension_numbers<[1], [0], [0], [1], [0, 0, 1, 1], [], []>} : vector<64x16xf32>, vector<16x32xf32>, vector<64x32xf32> -> vector<64x32xf32>
    %73 = arith.addf %66, %72 : vector<64x32xf32>
    %c1_72 = arith.constant 1 : index
    %c1_73 = arith.constant 1 : index
    %c1_74 = arith.constant 1 : index
    %c0_75 = arith.constant 0 : index
    %74 = vector.load %arg15[%c1_72, %c1_73, %c1_74, %c0_75] : memref<4x10x10x16xf32, #tpu.memory_space<vmem>>, vector<1x8x8x16xf32>
    %75 = vector.shape_cast %74 : vector<1x8x8x16xf32> to vector<8x8x16xf32>
    %76 = vector.shape_cast %75 : vector<8x8x16xf32> to vector<64x16xf32>
    %c6 = arith.constant 6 : index
    %c0_76 = arith.constant 0 : index
    %c0_77 = arith.constant 0 : index
    %77 = vector.load %arg4[%c6, %c0_76, %c0_77] : memref<16x16x32xf32, #tpu.memory_space<vmem>>, vector<1x16x32xf32>
    %78 = vector.shape_cast %77 : vector<1x16x32xf32> to vector<16x32xf32>
    %cst_78 = arith.constant dense<0.000000e+00> : vector<64x32xf32>
    %79 = tpu.matmul %76, %78, %cst_78 {dimension_numbers = #tpu.dot_dimension_numbers<[1], [0], [0], [1], [0, 0, 1, 1], [], []>} : vector<64x16xf32>, vector<16x32xf32>, vector<64x32xf32> -> vector<64x32xf32>
    %80 = arith.addf %73, %79 : vector<64x32xf32>
    %c0_79 = arith.constant 0 : index
    %c1_80 = arith.constant 1 : index
    %c2_81 = arith.constant 2 : index
    %c0_82 = arith.constant 0 : index
    %81 = vector.load %arg15[%c0_79, %c1_80, %c2_81, %c0_82] : memref<4x10x10x16xf32, #tpu.memory_space<vmem>>, vector<1x8x8x16xf32>
    %82 = vector.shape_cast %81 : vector<1x8x8x16xf32> to vector<8x8x16xf32>
    %83 = vector.shape_cast %82 : vector<8x8x16xf32> to vector<64x16xf32>
    %c7 = arith.constant 7 : index
    %c0_83 = arith.constant 0 : index
    %c0_84 = arith.constant 0 : index
    %84 = vector.load %arg4[%c7, %c0_83, %c0_84] : memref<16x16x32xf32, #tpu.memory_space<vmem>>, vector<1x16x32xf32>
    %85 = vector.shape_cast %84 : vector<1x16x32xf32> to vector<16x32xf32>
    %cst_85 = arith.constant dense<0.000000e+00> : vector<64x32xf32>
    %86 = tpu.matmul %83, %85, %cst_85 {dimension_numbers = #tpu.dot_dimension_numbers<[1], [0], [0], [1], [0, 0, 1, 1], [], []>} : vector<64x16xf32>, vector<16x32xf32>, vector<64x32xf32> -> vector<64x32xf32>
    %87 = arith.addf %80, %86 : vector<64x32xf32>
    %c3_86 = arith.constant 3 : index
    %c1_87 = arith.constant 1 : index
    %c0_88 = arith.constant 0 : index
    %c0_89 = arith.constant 0 : index
    %88 = vector.load %arg15[%c3_86, %c1_87, %c0_88, %c0_89] : memref<4x10x10x16xf32, #tpu.memory_space<vmem>>, vector<1x8x8x16xf32>
    %89 = vector.shape_cast %88 : vector<1x8x8x16xf32> to vector<8x8x16xf32>
    %90 = vector.shape_cast %89 : vector<8x8x16xf32> to vector<64x16xf32>
    %c8 = arith.constant 8 : index
    %c0_90 = arith.constant 0 : index
    %c0_91 = arith.constant 0 : index
    %91 = vector.load %arg4[%c8, %c0_90, %c0_91] : memref<16x16x32xf32, #tpu.memory_space<vmem>>, vector<1x16x32xf32>
    %92 = vector.shape_cast %91 : vector<1x16x32xf32> to vector<16x32xf32>
    %cst_92 = arith.constant dense<0.000000e+00> : vector<64x32xf32>
    %93 = tpu.matmul %90, %92, %cst_92 {dimension_numbers = #tpu.dot_dimension_numbers<[1], [0], [0], [1], [0, 0, 1, 1], [], []>} : vector<64x16xf32>, vector<16x32xf32>, vector<64x32xf32> -> vector<64x32xf32>
    %94 = arith.addf %87, %93 : vector<64x32xf32>
    %c2_93 = arith.constant 2 : index
    %c1_94 = arith.constant 1 : index
    %c1_95 = arith.constant 1 : index
    %c0_96 = arith.constant 0 : index
    %95 = vector.load %arg15[%c2_93, %c1_94, %c1_95, %c0_96] : memref<4x10x10x16xf32, #tpu.memory_space<vmem>>, vector<1x8x8x16xf32>
    %96 = vector.shape_cast %95 : vector<1x8x8x16xf32> to vector<8x8x16xf32>
    %97 = vector.shape_cast %96 : vector<8x8x16xf32> to vector<64x16xf32>
    %c9 = arith.constant 9 : index
    %c0_97 = arith.constant 0 : index
    %c0_98 = arith.constant 0 : index
    %98 = vector.load %arg4[%c9, %c0_97, %c0_98] : memref<16x16x32xf32, #tpu.memory_space<vmem>>, vector<1x16x32xf32>
    %99 = vector.shape_cast %98 : vector<1x16x32xf32> to vector<16x32xf32>
    %cst_99 = arith.constant dense<0.000000e+00> : vector<64x32xf32>
    %100 = tpu.matmul %97, %99, %cst_99 {dimension_numbers = #tpu.dot_dimension_numbers<[1], [0], [0], [1], [0, 0, 1, 1], [], []>} : vector<64x16xf32>, vector<16x32xf32>, vector<64x32xf32> -> vector<64x32xf32>
    %101 = arith.addf %94, %100 : vector<64x32xf32>
    %c3_100 = arith.constant 3 : index
    %c1_101 = arith.constant 1 : index
    %c1_102 = arith.constant 1 : index
    %c0_103 = arith.constant 0 : index
    %102 = vector.load %arg15[%c3_100, %c1_101, %c1_102, %c0_103] : memref<4x10x10x16xf32, #tpu.memory_space<vmem>>, vector<1x8x8x16xf32>
    %103 = vector.shape_cast %102 : vector<1x8x8x16xf32> to vector<8x8x16xf32>
    %104 = vector.shape_cast %103 : vector<8x8x16xf32> to vector<64x16xf32>
    %c10 = arith.constant 10 : index
    %c0_104 = arith.constant 0 : index
    %c0_105 = arith.constant 0 : index
    %105 = vector.load %arg4[%c10, %c0_104, %c0_105] : memref<16x16x32xf32, #tpu.memory_space<vmem>>, vector<1x16x32xf32>
    %106 = vector.shape_cast %105 : vector<1x16x32xf32> to vector<16x32xf32>
    %cst_106 = arith.constant dense<0.000000e+00> : vector<64x32xf32>
    %107 = tpu.matmul %104, %106, %cst_106 {dimension_numbers = #tpu.dot_dimension_numbers<[1], [0], [0], [1], [0, 0, 1, 1], [], []>} : vector<64x16xf32>, vector<16x32xf32>, vector<64x32xf32> -> vector<64x32xf32>
    %108 = arith.addf %101, %107 : vector<64x32xf32>
    %c2_107 = arith.constant 2 : index
    %c1_108 = arith.constant 1 : index
    %c2_109 = arith.constant 2 : index
    %c0_110 = arith.constant 0 : index
    %109 = vector.load %arg15[%c2_107, %c1_108, %c2_109, %c0_110] : memref<4x10x10x16xf32, #tpu.memory_space<vmem>>, vector<1x8x8x16xf32>
    %110 = vector.shape_cast %109 : vector<1x8x8x16xf32> to vector<8x8x16xf32>
    %111 = vector.shape_cast %110 : vector<8x8x16xf32> to vector<64x16xf32>
    %c11 = arith.constant 11 : index
    %c0_111 = arith.constant 0 : index
    %c0_112 = arith.constant 0 : index
    %112 = vector.load %arg4[%c11, %c0_111, %c0_112] : memref<16x16x32xf32, #tpu.memory_space<vmem>>, vector<1x16x32xf32>
    %113 = vector.shape_cast %112 : vector<1x16x32xf32> to vector<16x32xf32>
    %cst_113 = arith.constant dense<0.000000e+00> : vector<64x32xf32>
    %114 = tpu.matmul %111, %113, %cst_113 {dimension_numbers = #tpu.dot_dimension_numbers<[1], [0], [0], [1], [0, 0, 1, 1], [], []>} : vector<64x16xf32>, vector<16x32xf32>, vector<64x32xf32> -> vector<64x32xf32>
    %115 = arith.addf %108, %114 : vector<64x32xf32>
    %c1_114 = arith.constant 1 : index
    %c2_115 = arith.constant 2 : index
    %c0_116 = arith.constant 0 : index
    %c0_117 = arith.constant 0 : index
    %116 = vector.load %arg15[%c1_114, %c2_115, %c0_116, %c0_117] : memref<4x10x10x16xf32, #tpu.memory_space<vmem>>, vector<1x8x8x16xf32>
    %117 = vector.shape_cast %116 : vector<1x8x8x16xf32> to vector<8x8x16xf32>
    %118 = vector.shape_cast %117 : vector<8x8x16xf32> to vector<64x16xf32>
    %c12 = arith.constant 12 : index
    %c0_118 = arith.constant 0 : index
    %c0_119 = arith.constant 0 : index
    %119 = vector.load %arg4[%c12, %c0_118, %c0_119] : memref<16x16x32xf32, #tpu.memory_space<vmem>>, vector<1x16x32xf32>
    %120 = vector.shape_cast %119 : vector<1x16x32xf32> to vector<16x32xf32>
    %cst_120 = arith.constant dense<0.000000e+00> : vector<64x32xf32>
    %121 = tpu.matmul %118, %120, %cst_120 {dimension_numbers = #tpu.dot_dimension_numbers<[1], [0], [0], [1], [0, 0, 1, 1], [], []>} : vector<64x16xf32>, vector<16x32xf32>, vector<64x32xf32> -> vector<64x32xf32>
    %122 = arith.addf %115, %121 : vector<64x32xf32>
    %c0_121 = arith.constant 0 : index
    %c2_122 = arith.constant 2 : index
    %c1_123 = arith.constant 1 : index
    %c0_124 = arith.constant 0 : index
    %123 = vector.load %arg15[%c0_121, %c2_122, %c1_123, %c0_124] : memref<4x10x10x16xf32, #tpu.memory_space<vmem>>, vector<1x8x8x16xf32>
    %124 = vector.shape_cast %123 : vector<1x8x8x16xf32> to vector<8x8x16xf32>
    %125 = vector.shape_cast %124 : vector<8x8x16xf32> to vector<64x16xf32>
    %c13 = arith.constant 13 : index
    %c0_125 = arith.constant 0 : index
    %c0_126 = arith.constant 0 : index
    %126 = vector.load %arg4[%c13, %c0_125, %c0_126] : memref<16x16x32xf32, #tpu.memory_space<vmem>>, vector<1x16x32xf32>
    %127 = vector.shape_cast %126 : vector<1x16x32xf32> to vector<16x32xf32>
    %cst_127 = arith.constant dense<0.000000e+00> : vector<64x32xf32>
    %128 = tpu.matmul %125, %127, %cst_127 {dimension_numbers = #tpu.dot_dimension_numbers<[1], [0], [0], [1], [0, 0, 1, 1], [], []>} : vector<64x16xf32>, vector<16x32xf32>, vector<64x32xf32> -> vector<64x32xf32>
    %129 = arith.addf %122, %128 : vector<64x32xf32>
    %c1_128 = arith.constant 1 : index
    %c2_129 = arith.constant 2 : index
    %c1_130 = arith.constant 1 : index
    %c0_131 = arith.constant 0 : index
    %130 = vector.load %arg15[%c1_128, %c2_129, %c1_130, %c0_131] : memref<4x10x10x16xf32, #tpu.memory_space<vmem>>, vector<1x8x8x16xf32>
    %131 = vector.shape_cast %130 : vector<1x8x8x16xf32> to vector<8x8x16xf32>
    %132 = vector.shape_cast %131 : vector<8x8x16xf32> to vector<64x16xf32>
    %c14 = arith.constant 14 : index
    %c0_132 = arith.constant 0 : index
    %c0_133 = arith.constant 0 : index
    %133 = vector.load %arg4[%c14, %c0_132, %c0_133] : memref<16x16x32xf32, #tpu.memory_space<vmem>>, vector<1x16x32xf32>
    %134 = vector.shape_cast %133 : vector<1x16x32xf32> to vector<16x32xf32>
    %cst_134 = arith.constant dense<0.000000e+00> : vector<64x32xf32>
    %135 = tpu.matmul %132, %134, %cst_134 {dimension_numbers = #tpu.dot_dimension_numbers<[1], [0], [0], [1], [0, 0, 1, 1], [], []>} : vector<64x16xf32>, vector<16x32xf32>, vector<64x32xf32> -> vector<64x32xf32>
    %136 = arith.addf %129, %135 : vector<64x32xf32>
    %c0_135 = arith.constant 0 : index
    %c2_136 = arith.constant 2 : index
    %c2_137 = arith.constant 2 : index
    %c0_138 = arith.constant 0 : index
    %137 = vector.load %arg15[%c0_135, %c2_136, %c2_137, %c0_138] : memref<4x10x10x16xf32, #tpu.memory_space<vmem>>, vector<1x8x8x16xf32>
    %138 = vector.shape_cast %137 : vector<1x8x8x16xf32> to vector<8x8x16xf32>
    %139 = vector.shape_cast %138 : vector<8x8x16xf32> to vector<64x16xf32>
    %c15 = arith.constant 15 : index
    %c0_139 = arith.constant 0 : index
    %c0_140 = arith.constant 0 : index
    %140 = vector.load %arg4[%c15, %c0_139, %c0_140] : memref<16x16x32xf32, #tpu.memory_space<vmem>>, vector<1x16x32xf32>
    %141 = vector.shape_cast %140 : vector<1x16x32xf32> to vector<16x32xf32>
    %cst_141 = arith.constant dense<0.000000e+00> : vector<64x32xf32>
    %142 = tpu.matmul %139, %141, %cst_141 {dimension_numbers = #tpu.dot_dimension_numbers<[1], [0], [0], [1], [0, 0, 1, 1], [], []>} : vector<64x16xf32>, vector<16x32xf32>, vector<64x32xf32> -> vector<64x32xf32>
    %143 = arith.addf %136, %142 : vector<64x32xf32>
    %c0_142 = arith.constant 0 : index
    %c0_143 = arith.constant 0 : index
    %144 = vector.load %arg5[%c0_142, %c0_143] : memref<1x32xf32, #tpu.memory_space<vmem>>, vector<1x32xf32>
    %145 = vector.broadcast %144 : vector<1x32xf32> to vector<64x32xf32>
    %146 = arith.addf %143, %145 : vector<64x32xf32>
    %cst_144 = arith.constant 0.000000e+00 : f32
    %147 = vector.broadcast %cst_144 : f32 to vector<64x32xf32>
    %148 = arith.maximumf %146, %147 : vector<64x32xf32>
    %cst_145 = arith.constant 0.000000e+00 : f32
    %149 = vector.broadcast %cst_145 : f32 to vector<10x10x32xf32>
    %c0_146 = arith.constant 0 : index
    %c0_147 = arith.constant 0 : index
    %c0_148 = arith.constant 0 : index
    %150 = vector.load %arg16[%c0_146, %c0_147, %c0_148] : memref<10x10x32xf32, #tpu.memory_space<vmem>>, vector<10x10x32xf32>
    tpu.vector_store %arg16[%c0_146, %c0_147, %c0_148], %149 {strides = array<i32>} : memref<10x10x32xf32, #tpu.memory_space<vmem>>, vector<10x10x32xf32>,
    %151 = vector.shape_cast %148 : vector<64x32xf32> to vector<8x8x32xf32>
    %c1_149 = arith.constant 1 : index
    %c1_150 = arith.constant 1 : index
    %c0_151 = arith.constant 0 : index
    %152 = vector.load %arg16[%c1_149, %c1_150, %c0_151] : memref<10x10x32xf32, #tpu.memory_space<vmem>>, vector<8x8x32xf32>
    tpu.vector_store %arg16[%c1_149, %c1_150, %c0_151], %151 {strides = array<i32>} : memref<10x10x32xf32, #tpu.memory_space<vmem>>, vector<8x8x32xf32>,
    %cst_152 = arith.constant 0.000000e+00 : f32
    %153 = vector.broadcast %cst_152 : f32 to vector<64x64xf32>
    %c0_153 = arith.constant 0 : index
    %c0_154 = arith.constant 0 : index
    %c0_155 = arith.constant 0 : index
    %154 = vector.load %arg16[%c0_153, %c0_154, %c0_155] : memref<10x10x32xf32, #tpu.memory_space<vmem>>, vector<8x8x32xf32>
    %155 = vector.shape_cast %154 : vector<8x8x32xf32> to vector<64x32xf32>
    %c0_156 = arith.constant 0 : index
    %c0_157 = arith.constant 0 : index
    %c0_158 = arith.constant 0 : index
    %156 = vector.load %arg6[%c0_156, %c0_157, %c0_158] : memref<9x32x64xf32, #tpu.memory_space<vmem>>, vector<1x32x64xf32>
    %157 = vector.shape_cast %156 : vector<1x32x64xf32> to vector<32x64xf32>
    %cst_159 = arith.constant dense<0.000000e+00> : vector<64x64xf32>
    %158 = tpu.matmul %155, %157, %cst_159 {dimension_numbers = #tpu.dot_dimension_numbers<[1], [0], [0], [1], [0, 0, 1, 1], [], []>} : vector<64x32xf32>, vector<32x64xf32>, vector<64x64xf32> -> vector<64x64xf32>
    %159 = arith.addf %153, %158 : vector<64x64xf32>
    %c0_160 = arith.constant 0 : index
    %c1_161 = arith.constant 1 : index
    %c0_162 = arith.constant 0 : index
    %160 = vector.load %arg16[%c0_160, %c1_161, %c0_162] : memref<10x10x32xf32, #tpu.memory_space<vmem>>, vector<8x8x32xf32>
    %161 = vector.shape_cast %160 : vector<8x8x32xf32> to vector<64x32xf32>
    %c1_163 = arith.constant 1 : index
    %c0_164 = arith.constant 0 : index
    %c0_165 = arith.constant 0 : index
    %162 = vector.load %arg6[%c1_163, %c0_164, %c0_165] : memref<9x32x64xf32, #tpu.memory_space<vmem>>, vector<1x32x64xf32>
    %163 = vector.shape_cast %162 : vector<1x32x64xf32> to vector<32x64xf32>
    %cst_166 = arith.constant dense<0.000000e+00> : vector<64x64xf32>
    %164 = tpu.matmul %161, %163, %cst_166 {dimension_numbers = #tpu.dot_dimension_numbers<[1], [0], [0], [1], [0, 0, 1, 1], [], []>} : vector<64x32xf32>, vector<32x64xf32>, vector<64x64xf32> -> vector<64x64xf32>
    %165 = arith.addf %159, %164 : vector<64x64xf32>
    %c0_167 = arith.constant 0 : index
    %c2_168 = arith.constant 2 : index
    %c0_169 = arith.constant 0 : index
    %166 = vector.load %arg16[%c0_167, %c2_168, %c0_169] : memref<10x10x32xf32, #tpu.memory_space<vmem>>, vector<8x8x32xf32>
    %167 = vector.shape_cast %166 : vector<8x8x32xf32> to vector<64x32xf32>
    %c2_170 = arith.constant 2 : index
    %c0_171 = arith.constant 0 : index
    %c0_172 = arith.constant 0 : index
    %168 = vector.load %arg6[%c2_170, %c0_171, %c0_172] : memref<9x32x64xf32, #tpu.memory_space<vmem>>, vector<1x32x64xf32>
    %169 = vector.shape_cast %168 : vector<1x32x64xf32> to vector<32x64xf32>
    %cst_173 = arith.constant dense<0.000000e+00> : vector<64x64xf32>
    %170 = tpu.matmul %167, %169, %cst_173 {dimension_numbers = #tpu.dot_dimension_numbers<[1], [0], [0], [1], [0, 0, 1, 1], [], []>} : vector<64x32xf32>, vector<32x64xf32>, vector<64x64xf32> -> vector<64x64xf32>
    %171 = arith.addf %165, %170 : vector<64x64xf32>
    %c1_174 = arith.constant 1 : index
    %c0_175 = arith.constant 0 : index
    %c0_176 = arith.constant 0 : index
    %172 = vector.load %arg16[%c1_174, %c0_175, %c0_176] : memref<10x10x32xf32, #tpu.memory_space<vmem>>, vector<8x8x32xf32>
    %173 = vector.shape_cast %172 : vector<8x8x32xf32> to vector<64x32xf32>
    %c3_177 = arith.constant 3 : index
    %c0_178 = arith.constant 0 : index
    %c0_179 = arith.constant 0 : index
    %174 = vector.load %arg6[%c3_177, %c0_178, %c0_179] : memref<9x32x64xf32, #tpu.memory_space<vmem>>, vector<1x32x64xf32>
    %175 = vector.shape_cast %174 : vector<1x32x64xf32> to vector<32x64xf32>
    %cst_180 = arith.constant dense<0.000000e+00> : vector<64x64xf32>
    %176 = tpu.matmul %173, %175, %cst_180 {dimension_numbers = #tpu.dot_dimension_numbers<[1], [0], [0], [1], [0, 0, 1, 1], [], []>} : vector<64x32xf32>, vector<32x64xf32>, vector<64x64xf32> -> vector<64x64xf32>
    %177 = arith.addf %171, %176 : vector<64x64xf32>
    %c1_181 = arith.constant 1 : index
    %c1_182 = arith.constant 1 : index
    %c0_183 = arith.constant 0 : index
    %178 = vector.load %arg16[%c1_181, %c1_182, %c0_183] : memref<10x10x32xf32, #tpu.memory_space<vmem>>, vector<8x8x32xf32>
    %179 = vector.shape_cast %178 : vector<8x8x32xf32> to vector<64x32xf32>
    %c4_184 = arith.constant 4 : index
    %c0_185 = arith.constant 0 : index
    %c0_186 = arith.constant 0 : index
    %180 = vector.load %arg6[%c4_184, %c0_185, %c0_186] : memref<9x32x64xf32, #tpu.memory_space<vmem>>, vector<1x32x64xf32>
    %181 = vector.shape_cast %180 : vector<1x32x64xf32> to vector<32x64xf32>
    %cst_187 = arith.constant dense<0.000000e+00> : vector<64x64xf32>
    %182 = tpu.matmul %179, %181, %cst_187 {dimension_numbers = #tpu.dot_dimension_numbers<[1], [0], [0], [1], [0, 0, 1, 1], [], []>} : vector<64x32xf32>, vector<32x64xf32>, vector<64x64xf32> -> vector<64x64xf32>
    %183 = arith.addf %177, %182 : vector<64x64xf32>
    %c1_188 = arith.constant 1 : index
    %c2_189 = arith.constant 2 : index
    %c0_190 = arith.constant 0 : index
    %184 = vector.load %arg16[%c1_188, %c2_189, %c0_190] : memref<10x10x32xf32, #tpu.memory_space<vmem>>, vector<8x8x32xf32>
    %185 = vector.shape_cast %184 : vector<8x8x32xf32> to vector<64x32xf32>
    %c5_191 = arith.constant 5 : index
    %c0_192 = arith.constant 0 : index
    %c0_193 = arith.constant 0 : index
    %186 = vector.load %arg6[%c5_191, %c0_192, %c0_193] : memref<9x32x64xf32, #tpu.memory_space<vmem>>, vector<1x32x64xf32>
    %187 = vector.shape_cast %186 : vector<1x32x64xf32> to vector<32x64xf32>
    %cst_194 = arith.constant dense<0.000000e+00> : vector<64x64xf32>
    %188 = tpu.matmul %185, %187, %cst_194 {dimension_numbers = #tpu.dot_dimension_numbers<[1], [0], [0], [1], [0, 0, 1, 1], [], []>} : vector<64x32xf32>, vector<32x64xf32>, vector<64x64xf32> -> vector<64x64xf32>
    %189 = arith.addf %183, %188 : vector<64x64xf32>
    %c2_195 = arith.constant 2 : index
    %c0_196 = arith.constant 0 : index
    %c0_197 = arith.constant 0 : index
    %190 = vector.load %arg16[%c2_195, %c0_196, %c0_197] : memref<10x10x32xf32, #tpu.memory_space<vmem>>, vector<8x8x32xf32>
    %191 = vector.shape_cast %190 : vector<8x8x32xf32> to vector<64x32xf32>
    %c6_198 = arith.constant 6 : index
    %c0_199 = arith.constant 0 : index
    %c0_200 = arith.constant 0 : index
    %192 = vector.load %arg6[%c6_198, %c0_199, %c0_200] : memref<9x32x64xf32, #tpu.memory_space<vmem>>, vector<1x32x64xf32>
    %193 = vector.shape_cast %192 : vector<1x32x64xf32> to vector<32x64xf32>
    %cst_201 = arith.constant dense<0.000000e+00> : vector<64x64xf32>
    %194 = tpu.matmul %191, %193, %cst_201 {dimension_numbers = #tpu.dot_dimension_numbers<[1], [0], [0], [1], [0, 0, 1, 1], [], []>} : vector<64x32xf32>, vector<32x64xf32>, vector<64x64xf32> -> vector<64x64xf32>
    %195 = arith.addf %189, %194 : vector<64x64xf32>
    %c2_202 = arith.constant 2 : index
    %c1_203 = arith.constant 1 : index
    %c0_204 = arith.constant 0 : index
    %196 = vector.load %arg16[%c2_202, %c1_203, %c0_204] : memref<10x10x32xf32, #tpu.memory_space<vmem>>, vector<8x8x32xf32>
    %197 = vector.shape_cast %196 : vector<8x8x32xf32> to vector<64x32xf32>
    %c7_205 = arith.constant 7 : index
    %c0_206 = arith.constant 0 : index
    %c0_207 = arith.constant 0 : index
    %198 = vector.load %arg6[%c7_205, %c0_206, %c0_207] : memref<9x32x64xf32, #tpu.memory_space<vmem>>, vector<1x32x64xf32>
    %199 = vector.shape_cast %198 : vector<1x32x64xf32> to vector<32x64xf32>
    %cst_208 = arith.constant dense<0.000000e+00> : vector<64x64xf32>
    %200 = tpu.matmul %197, %199, %cst_208 {dimension_numbers = #tpu.dot_dimension_numbers<[1], [0], [0], [1], [0, 0, 1, 1], [], []>} : vector<64x32xf32>, vector<32x64xf32>, vector<64x64xf32> -> vector<64x64xf32>
    %201 = arith.addf %195, %200 : vector<64x64xf32>
    %c2_209 = arith.constant 2 : index
    %c2_210 = arith.constant 2 : index
    %c0_211 = arith.constant 0 : index
    %202 = vector.load %arg16[%c2_209, %c2_210, %c0_211] : memref<10x10x32xf32, #tpu.memory_space<vmem>>, vector<8x8x32xf32>
    %203 = vector.shape_cast %202 : vector<8x8x32xf32> to vector<64x32xf32>
    %c8_212 = arith.constant 8 : index
    %c0_213 = arith.constant 0 : index
    %c0_214 = arith.constant 0 : index
    %204 = vector.load %arg6[%c8_212, %c0_213, %c0_214] : memref<9x32x64xf32, #tpu.memory_space<vmem>>, vector<1x32x64xf32>
    %205 = vector.shape_cast %204 : vector<1x32x64xf32> to vector<32x64xf32>
    %cst_215 = arith.constant dense<0.000000e+00> : vector<64x64xf32>
    %206 = tpu.matmul %203, %205, %cst_215 {dimension_numbers = #tpu.dot_dimension_numbers<[1], [0], [0], [1], [0, 0, 1, 1], [], []>} : vector<64x32xf32>, vector<32x64xf32>, vector<64x64xf32> -> vector<64x64xf32>
    %207 = arith.addf %201, %206 : vector<64x64xf32>
    %c0_216 = arith.constant 0 : index
    %c0_217 = arith.constant 0 : index
    %208 = vector.load %arg7[%c0_216, %c0_217] : memref<1x64xf32, #tpu.memory_space<vmem>>, vector<1x64xf32>
    %209 = vector.broadcast %208 : vector<1x64xf32> to vector<64x64xf32>
    %210 = arith.addf %207, %209 : vector<64x64xf32>
    %cst_218 = arith.constant 0.000000e+00 : f32
    %211 = vector.broadcast %cst_218 : f32 to vector<64x64xf32>
    %212 = arith.maximumf %210, %211 : vector<64x64xf32>
    %c0_219 = arith.constant 0 : index
    %c0_220 = arith.constant 0 : index
    %213 = vector.load %arg9[%c0_219, %c0_220] : memref<1x256xf32, #tpu.memory_space<vmem>>, vector<1x256xf32>
    %214 = vector.extract_strided_slice %212 {offsets = [0, 0], sizes = [1, 64], strides = [1, 1]} : vector<64x64xf32> to vector<1x64xf32>
    %215 = vector.extract_strided_slice %212 {offsets = [1, 0], sizes = [1, 64], strides = [1, 1]} : vector<64x64xf32> to vector<1x64xf32>
    %216 = arith.maximumf %214, %215 : vector<1x64xf32>
    %217 = vector.extract_strided_slice %212 {offsets = [8, 0], sizes = [1, 64], strides = [1, 1]} : vector<64x64xf32> to vector<1x64xf32>
    %218 = vector.extract_strided_slice %212 {offsets = [9, 0], sizes = [1, 64], strides = [1, 1]} : vector<64x64xf32> to vector<1x64xf32>
    %219 = arith.maximumf %217, %218 : vector<1x64xf32>
    %220 = arith.maximumf %216, %219 : vector<1x64xf32>
    %c0_221 = arith.constant 0 : index
    %c0_222 = arith.constant 0 : index
    %221 = vector.load %arg8[%c0_221, %c0_222] : memref<1024x256xf32, #tpu.memory_space<vmem>>, vector<64x256xf32>
    %cst_223 = arith.constant dense<0.000000e+00> : vector<1x256xf32>
    %222 = tpu.matmul %220, %221, %cst_223 {dimension_numbers = #tpu.dot_dimension_numbers<[1], [0], [0], [1], [0, 0, 1, 1], [], []>} : vector<1x64xf32>, vector<64x256xf32>, vector<1x256xf32> -> vector<1x256xf32>
    %223 = arith.addf %213, %222 : vector<1x256xf32>
    %224 = vector.extract_strided_slice %212 {offsets = [2, 0], sizes = [1, 64], strides = [1, 1]} : vector<64x64xf32> to vector<1x64xf32>
    %225 = vector.extract_strided_slice %212 {offsets = [3, 0], sizes = [1, 64], strides = [1, 1]} : vector<64x64xf32> to vector<1x64xf32>
    %226 = arith.maximumf %224, %225 : vector<1x64xf32>
    %227 = vector.extract_strided_slice %212 {offsets = [10, 0], sizes = [1, 64], strides = [1, 1]} : vector<64x64xf32> to vector<1x64xf32>
    %228 = vector.extract_strided_slice %212 {offsets = [11, 0], sizes = [1, 64], strides = [1, 1]} : vector<64x64xf32> to vector<1x64xf32>
    %229 = arith.maximumf %227, %228 : vector<1x64xf32>
    %230 = arith.maximumf %226, %229 : vector<1x64xf32>
    %c64 = arith.constant 64 : index
    %c0_224 = arith.constant 0 : index
    %231 = vector.load %arg8[%c64, %c0_224] : memref<1024x256xf32, #tpu.memory_space<vmem>>, vector<64x256xf32>
    %cst_225 = arith.constant dense<0.000000e+00> : vector<1x256xf32>
    %232 = tpu.matmul %230, %231, %cst_225 {dimension_numbers = #tpu.dot_dimension_numbers<[1], [0], [0], [1], [0, 0, 1, 1], [], []>} : vector<1x64xf32>, vector<64x256xf32>, vector<1x256xf32> -> vector<1x256xf32>
    %233 = arith.addf %223, %232 : vector<1x256xf32>
    %234 = vector.extract_strided_slice %212 {offsets = [4, 0], sizes = [1, 64], strides = [1, 1]} : vector<64x64xf32> to vector<1x64xf32>
    %235 = vector.extract_strided_slice %212 {offsets = [5, 0], sizes = [1, 64], strides = [1, 1]} : vector<64x64xf32> to vector<1x64xf32>
    %236 = arith.maximumf %234, %235 : vector<1x64xf32>
    %237 = vector.extract_strided_slice %212 {offsets = [12, 0], sizes = [1, 64], strides = [1, 1]} : vector<64x64xf32> to vector<1x64xf32>
    %238 = vector.extract_strided_slice %212 {offsets = [13, 0], sizes = [1, 64], strides = [1, 1]} : vector<64x64xf32> to vector<1x64xf32>
    %239 = arith.maximumf %237, %238 : vector<1x64xf32>
    %240 = arith.maximumf %236, %239 : vector<1x64xf32>
    %c128 = arith.constant 128 : index
    %c0_226 = arith.constant 0 : index
    %241 = vector.load %arg8[%c128, %c0_226] : memref<1024x256xf32, #tpu.memory_space<vmem>>, vector<64x256xf32>
    %cst_227 = arith.constant dense<0.000000e+00> : vector<1x256xf32>
    %242 = tpu.matmul %240, %241, %cst_227 {dimension_numbers = #tpu.dot_dimension_numbers<[1], [0], [0], [1], [0, 0, 1, 1], [], []>} : vector<1x64xf32>, vector<64x256xf32>, vector<1x256xf32> -> vector<1x256xf32>
    %243 = arith.addf %233, %242 : vector<1x256xf32>
    %244 = vector.extract_strided_slice %212 {offsets = [6, 0], sizes = [1, 64], strides = [1, 1]} : vector<64x64xf32> to vector<1x64xf32>
    %245 = vector.extract_strided_slice %212 {offsets = [7, 0], sizes = [1, 64], strides = [1, 1]} : vector<64x64xf32> to vector<1x64xf32>
    %246 = arith.maximumf %244, %245 : vector<1x64xf32>
    %247 = vector.extract_strided_slice %212 {offsets = [14, 0], sizes = [1, 64], strides = [1, 1]} : vector<64x64xf32> to vector<1x64xf32>
    %248 = vector.extract_strided_slice %212 {offsets = [15, 0], sizes = [1, 64], strides = [1, 1]} : vector<64x64xf32> to vector<1x64xf32>
    %249 = arith.maximumf %247, %248 : vector<1x64xf32>
    %250 = arith.maximumf %246, %249 : vector<1x64xf32>
    %c192 = arith.constant 192 : index
    %c0_228 = arith.constant 0 : index
    %251 = vector.load %arg8[%c192, %c0_228] : memref<1024x256xf32, #tpu.memory_space<vmem>>, vector<64x256xf32>
    %cst_229 = arith.constant dense<0.000000e+00> : vector<1x256xf32>
    %252 = tpu.matmul %250, %251, %cst_229 {dimension_numbers = #tpu.dot_dimension_numbers<[1], [0], [0], [1], [0, 0, 1, 1], [], []>} : vector<1x64xf32>, vector<64x256xf32>, vector<1x256xf32> -> vector<1x256xf32>
    %253 = arith.addf %243, %252 : vector<1x256xf32>
    %254 = vector.extract_strided_slice %212 {offsets = [16, 0], sizes = [1, 64], strides = [1, 1]} : vector<64x64xf32> to vector<1x64xf32>
    %255 = vector.extract_strided_slice %212 {offsets = [17, 0], sizes = [1, 64], strides = [1, 1]} : vector<64x64xf32> to vector<1x64xf32>
    %256 = arith.maximumf %254, %255 : vector<1x64xf32>
    %257 = vector.extract_strided_slice %212 {offsets = [24, 0], sizes = [1, 64], strides = [1, 1]} : vector<64x64xf32> to vector<1x64xf32>
    %258 = vector.extract_strided_slice %212 {offsets = [25, 0], sizes = [1, 64], strides = [1, 1]} : vector<64x64xf32> to vector<1x64xf32>
    %259 = arith.maximumf %257, %258 : vector<1x64xf32>
    %260 = arith.maximumf %256, %259 : vector<1x64xf32>
    %c256 = arith.constant 256 : index
    %c0_230 = arith.constant 0 : index
    %261 = vector.load %arg8[%c256, %c0_230] : memref<1024x256xf32, #tpu.memory_space<vmem>>, vector<64x256xf32>
    %cst_231 = arith.constant dense<0.000000e+00> : vector<1x256xf32>
    %262 = tpu.matmul %260, %261, %cst_231 {dimension_numbers = #tpu.dot_dimension_numbers<[1], [0], [0], [1], [0, 0, 1, 1], [], []>} : vector<1x64xf32>, vector<64x256xf32>, vector<1x256xf32> -> vector<1x256xf32>
    %263 = arith.addf %253, %262 : vector<1x256xf32>
    %264 = vector.extract_strided_slice %212 {offsets = [18, 0], sizes = [1, 64], strides = [1, 1]} : vector<64x64xf32> to vector<1x64xf32>
    %265 = vector.extract_strided_slice %212 {offsets = [19, 0], sizes = [1, 64], strides = [1, 1]} : vector<64x64xf32> to vector<1x64xf32>
    %266 = arith.maximumf %264, %265 : vector<1x64xf32>
    %267 = vector.extract_strided_slice %212 {offsets = [26, 0], sizes = [1, 64], strides = [1, 1]} : vector<64x64xf32> to vector<1x64xf32>
    %268 = vector.extract_strided_slice %212 {offsets = [27, 0], sizes = [1, 64], strides = [1, 1]} : vector<64x64xf32> to vector<1x64xf32>
    %269 = arith.maximumf %267, %268 : vector<1x64xf32>
    %270 = arith.maximumf %266, %269 : vector<1x64xf32>
    %c320 = arith.constant 320 : index
    %c0_232 = arith.constant 0 : index
    %271 = vector.load %arg8[%c320, %c0_232] : memref<1024x256xf32, #tpu.memory_space<vmem>>, vector<64x256xf32>
    %cst_233 = arith.constant dense<0.000000e+00> : vector<1x256xf32>
    %272 = tpu.matmul %270, %271, %cst_233 {dimension_numbers = #tpu.dot_dimension_numbers<[1], [0], [0], [1], [0, 0, 1, 1], [], []>} : vector<1x64xf32>, vector<64x256xf32>, vector<1x256xf32> -> vector<1x256xf32>
    %273 = arith.addf %263, %272 : vector<1x256xf32>
    %274 = vector.extract_strided_slice %212 {offsets = [20, 0], sizes = [1, 64], strides = [1, 1]} : vector<64x64xf32> to vector<1x64xf32>
    %275 = vector.extract_strided_slice %212 {offsets = [21, 0], sizes = [1, 64], strides = [1, 1]} : vector<64x64xf32> to vector<1x64xf32>
    %276 = arith.maximumf %274, %275 : vector<1x64xf32>
    %277 = vector.extract_strided_slice %212 {offsets = [28, 0], sizes = [1, 64], strides = [1, 1]} : vector<64x64xf32> to vector<1x64xf32>
    %278 = vector.extract_strided_slice %212 {offsets = [29, 0], sizes = [1, 64], strides = [1, 1]} : vector<64x64xf32> to vector<1x64xf32>
    %279 = arith.maximumf %277, %278 : vector<1x64xf32>
    %280 = arith.maximumf %276, %279 : vector<1x64xf32>
    %c384 = arith.constant 384 : index
    %c0_234 = arith.constant 0 : index
    %281 = vector.load %arg8[%c384, %c0_234] : memref<1024x256xf32, #tpu.memory_space<vmem>>, vector<64x256xf32>
    %cst_235 = arith.constant dense<0.000000e+00> : vector<1x256xf32>
    %282 = tpu.matmul %280, %281, %cst_235 {dimension_numbers = #tpu.dot_dimension_numbers<[1], [0], [0], [1], [0, 0, 1, 1], [], []>} : vector<1x64xf32>, vector<64x256xf32>, vector<1x256xf32> -> vector<1x256xf32>
    %283 = arith.addf %273, %282 : vector<1x256xf32>
    %284 = vector.extract_strided_slice %212 {offsets = [22, 0], sizes = [1, 64], strides = [1, 1]} : vector<64x64xf32> to vector<1x64xf32>
    %285 = vector.extract_strided_slice %212 {offsets = [23, 0], sizes = [1, 64], strides = [1, 1]} : vector<64x64xf32> to vector<1x64xf32>
    %286 = arith.maximumf %284, %285 : vector<1x64xf32>
    %287 = vector.extract_strided_slice %212 {offsets = [30, 0], sizes = [1, 64], strides = [1, 1]} : vector<64x64xf32> to vector<1x64xf32>
    %288 = vector.extract_strided_slice %212 {offsets = [31, 0], sizes = [1, 64], strides = [1, 1]} : vector<64x64xf32> to vector<1x64xf32>
    %289 = arith.maximumf %287, %288 : vector<1x64xf32>
    %290 = arith.maximumf %286, %289 : vector<1x64xf32>
    %c448 = arith.constant 448 : index
    %c0_236 = arith.constant 0 : index
    %291 = vector.load %arg8[%c448, %c0_236] : memref<1024x256xf32, #tpu.memory_space<vmem>>, vector<64x256xf32>
    %cst_237 = arith.constant dense<0.000000e+00> : vector<1x256xf32>
    %292 = tpu.matmul %290, %291, %cst_237 {dimension_numbers = #tpu.dot_dimension_numbers<[1], [0], [0], [1], [0, 0, 1, 1], [], []>} : vector<1x64xf32>, vector<64x256xf32>, vector<1x256xf32> -> vector<1x256xf32>
    %293 = arith.addf %283, %292 : vector<1x256xf32>
    %294 = vector.extract_strided_slice %212 {offsets = [32, 0], sizes = [1, 64], strides = [1, 1]} : vector<64x64xf32> to vector<1x64xf32>
    %295 = vector.extract_strided_slice %212 {offsets = [33, 0], sizes = [1, 64], strides = [1, 1]} : vector<64x64xf32> to vector<1x64xf32>
    %296 = arith.maximumf %294, %295 : vector<1x64xf32>
    %297 = vector.extract_strided_slice %212 {offsets = [40, 0], sizes = [1, 64], strides = [1, 1]} : vector<64x64xf32> to vector<1x64xf32>
    %298 = vector.extract_strided_slice %212 {offsets = [41, 0], sizes = [1, 64], strides = [1, 1]} : vector<64x64xf32> to vector<1x64xf32>
    %299 = arith.maximumf %297, %298 : vector<1x64xf32>
    %300 = arith.maximumf %296, %299 : vector<1x64xf32>
    %c512 = arith.constant 512 : index
    %c0_238 = arith.constant 0 : index
    %301 = vector.load %arg8[%c512, %c0_238] : memref<1024x256xf32, #tpu.memory_space<vmem>>, vector<64x256xf32>
    %cst_239 = arith.constant dense<0.000000e+00> : vector<1x256xf32>
    %302 = tpu.matmul %300, %301, %cst_239 {dimension_numbers = #tpu.dot_dimension_numbers<[1], [0], [0], [1], [0, 0, 1, 1], [], []>} : vector<1x64xf32>, vector<64x256xf32>, vector<1x256xf32> -> vector<1x256xf32>
    %303 = arith.addf %293, %302 : vector<1x256xf32>
    %304 = vector.extract_strided_slice %212 {offsets = [34, 0], sizes = [1, 64], strides = [1, 1]} : vector<64x64xf32> to vector<1x64xf32>
    %305 = vector.extract_strided_slice %212 {offsets = [35, 0], sizes = [1, 64], strides = [1, 1]} : vector<64x64xf32> to vector<1x64xf32>
    %306 = arith.maximumf %304, %305 : vector<1x64xf32>
    %307 = vector.extract_strided_slice %212 {offsets = [42, 0], sizes = [1, 64], strides = [1, 1]} : vector<64x64xf32> to vector<1x64xf32>
    %308 = vector.extract_strided_slice %212 {offsets = [43, 0], sizes = [1, 64], strides = [1, 1]} : vector<64x64xf32> to vector<1x64xf32>
    %309 = arith.maximumf %307, %308 : vector<1x64xf32>
    %310 = arith.maximumf %306, %309 : vector<1x64xf32>
    %c576 = arith.constant 576 : index
    %c0_240 = arith.constant 0 : index
    %311 = vector.load %arg8[%c576, %c0_240] : memref<1024x256xf32, #tpu.memory_space<vmem>>, vector<64x256xf32>
    %cst_241 = arith.constant dense<0.000000e+00> : vector<1x256xf32>
    %312 = tpu.matmul %310, %311, %cst_241 {dimension_numbers = #tpu.dot_dimension_numbers<[1], [0], [0], [1], [0, 0, 1, 1], [], []>} : vector<1x64xf32>, vector<64x256xf32>, vector<1x256xf32> -> vector<1x256xf32>
    %313 = arith.addf %303, %312 : vector<1x256xf32>
    %314 = vector.extract_strided_slice %212 {offsets = [36, 0], sizes = [1, 64], strides = [1, 1]} : vector<64x64xf32> to vector<1x64xf32>
    %315 = vector.extract_strided_slice %212 {offsets = [37, 0], sizes = [1, 64], strides = [1, 1]} : vector<64x64xf32> to vector<1x64xf32>
    %316 = arith.maximumf %314, %315 : vector<1x64xf32>
    %317 = vector.extract_strided_slice %212 {offsets = [44, 0], sizes = [1, 64], strides = [1, 1]} : vector<64x64xf32> to vector<1x64xf32>
    %318 = vector.extract_strided_slice %212 {offsets = [45, 0], sizes = [1, 64], strides = [1, 1]} : vector<64x64xf32> to vector<1x64xf32>
    %319 = arith.maximumf %317, %318 : vector<1x64xf32>
    %320 = arith.maximumf %316, %319 : vector<1x64xf32>
    %c640 = arith.constant 640 : index
    %c0_242 = arith.constant 0 : index
    %321 = vector.load %arg8[%c640, %c0_242] : memref<1024x256xf32, #tpu.memory_space<vmem>>, vector<64x256xf32>
    %cst_243 = arith.constant dense<0.000000e+00> : vector<1x256xf32>
    %322 = tpu.matmul %320, %321, %cst_243 {dimension_numbers = #tpu.dot_dimension_numbers<[1], [0], [0], [1], [0, 0, 1, 1], [], []>} : vector<1x64xf32>, vector<64x256xf32>, vector<1x256xf32> -> vector<1x256xf32>
    %323 = arith.addf %313, %322 : vector<1x256xf32>
    %324 = vector.extract_strided_slice %212 {offsets = [38, 0], sizes = [1, 64], strides = [1, 1]} : vector<64x64xf32> to vector<1x64xf32>
    %325 = vector.extract_strided_slice %212 {offsets = [39, 0], sizes = [1, 64], strides = [1, 1]} : vector<64x64xf32> to vector<1x64xf32>
    %326 = arith.maximumf %324, %325 : vector<1x64xf32>
    %327 = vector.extract_strided_slice %212 {offsets = [46, 0], sizes = [1, 64], strides = [1, 1]} : vector<64x64xf32> to vector<1x64xf32>
    %328 = vector.extract_strided_slice %212 {offsets = [47, 0], sizes = [1, 64], strides = [1, 1]} : vector<64x64xf32> to vector<1x64xf32>
    %329 = arith.maximumf %327, %328 : vector<1x64xf32>
    %330 = arith.maximumf %326, %329 : vector<1x64xf32>
    %c704 = arith.constant 704 : index
    %c0_244 = arith.constant 0 : index
    %331 = vector.load %arg8[%c704, %c0_244] : memref<1024x256xf32, #tpu.memory_space<vmem>>, vector<64x256xf32>
    %cst_245 = arith.constant dense<0.000000e+00> : vector<1x256xf32>
    %332 = tpu.matmul %330, %331, %cst_245 {dimension_numbers = #tpu.dot_dimension_numbers<[1], [0], [0], [1], [0, 0, 1, 1], [], []>} : vector<1x64xf32>, vector<64x256xf32>, vector<1x256xf32> -> vector<1x256xf32>
    %333 = arith.addf %323, %332 : vector<1x256xf32>
    %334 = vector.extract_strided_slice %212 {offsets = [48, 0], sizes = [1, 64], strides = [1, 1]} : vector<64x64xf32> to vector<1x64xf32>
    %335 = vector.extract_strided_slice %212 {offsets = [49, 0], sizes = [1, 64], strides = [1, 1]} : vector<64x64xf32> to vector<1x64xf32>
    %336 = arith.maximumf %334, %335 : vector<1x64xf32>
    %337 = vector.extract_strided_slice %212 {offsets = [56, 0], sizes = [1, 64], strides = [1, 1]} : vector<64x64xf32> to vector<1x64xf32>
    %338 = vector.extract_strided_slice %212 {offsets = [57, 0], sizes = [1, 64], strides = [1, 1]} : vector<64x64xf32> to vector<1x64xf32>
    %339 = arith.maximumf %337, %338 : vector<1x64xf32>
    %340 = arith.maximumf %336, %339 : vector<1x64xf32>
    %c768 = arith.constant 768 : index
    %c0_246 = arith.constant 0 : index
    %341 = vector.load %arg8[%c768, %c0_246] : memref<1024x256xf32, #tpu.memory_space<vmem>>, vector<64x256xf32>
    %cst_247 = arith.constant dense<0.000000e+00> : vector<1x256xf32>
    %342 = tpu.matmul %340, %341, %cst_247 {dimension_numbers = #tpu.dot_dimension_numbers<[1], [0], [0], [1], [0, 0, 1, 1], [], []>} : vector<1x64xf32>, vector<64x256xf32>, vector<1x256xf32> -> vector<1x256xf32>
    %343 = arith.addf %333, %342 : vector<1x256xf32>
    %344 = vector.extract_strided_slice %212 {offsets = [50, 0], sizes = [1, 64], strides = [1, 1]} : vector<64x64xf32> to vector<1x64xf32>
    %345 = vector.extract_strided_slice %212 {offsets = [51, 0], sizes = [1, 64], strides = [1, 1]} : vector<64x64xf32> to vector<1x64xf32>
    %346 = arith.maximumf %344, %345 : vector<1x64xf32>
    %347 = vector.extract_strided_slice %212 {offsets = [58, 0], sizes = [1, 64], strides = [1, 1]} : vector<64x64xf32> to vector<1x64xf32>
    %348 = vector.extract_strided_slice %212 {offsets = [59, 0], sizes = [1, 64], strides = [1, 1]} : vector<64x64xf32> to vector<1x64xf32>
    %349 = arith.maximumf %347, %348 : vector<1x64xf32>
    %350 = arith.maximumf %346, %349 : vector<1x64xf32>
    %c832 = arith.constant 832 : index
    %c0_248 = arith.constant 0 : index
    %351 = vector.load %arg8[%c832, %c0_248] : memref<1024x256xf32, #tpu.memory_space<vmem>>, vector<64x256xf32>
    %cst_249 = arith.constant dense<0.000000e+00> : vector<1x256xf32>
    %352 = tpu.matmul %350, %351, %cst_249 {dimension_numbers = #tpu.dot_dimension_numbers<[1], [0], [0], [1], [0, 0, 1, 1], [], []>} : vector<1x64xf32>, vector<64x256xf32>, vector<1x256xf32> -> vector<1x256xf32>
    %353 = arith.addf %343, %352 : vector<1x256xf32>
    %354 = vector.extract_strided_slice %212 {offsets = [52, 0], sizes = [1, 64], strides = [1, 1]} : vector<64x64xf32> to vector<1x64xf32>
    %355 = vector.extract_strided_slice %212 {offsets = [53, 0], sizes = [1, 64], strides = [1, 1]} : vector<64x64xf32> to vector<1x64xf32>
    %356 = arith.maximumf %354, %355 : vector<1x64xf32>
    %357 = vector.extract_strided_slice %212 {offsets = [60, 0], sizes = [1, 64], strides = [1, 1]} : vector<64x64xf32> to vector<1x64xf32>
    %358 = vector.extract_strided_slice %212 {offsets = [61, 0], sizes = [1, 64], strides = [1, 1]} : vector<64x64xf32> to vector<1x64xf32>
    %359 = arith.maximumf %357, %358 : vector<1x64xf32>
    %360 = arith.maximumf %356, %359 : vector<1x64xf32>
    %c896 = arith.constant 896 : index
    %c0_250 = arith.constant 0 : index
    %361 = vector.load %arg8[%c896, %c0_250] : memref<1024x256xf32, #tpu.memory_space<vmem>>, vector<64x256xf32>
    %cst_251 = arith.constant dense<0.000000e+00> : vector<1x256xf32>
    %362 = tpu.matmul %360, %361, %cst_251 {dimension_numbers = #tpu.dot_dimension_numbers<[1], [0], [0], [1], [0, 0, 1, 1], [], []>} : vector<1x64xf32>, vector<64x256xf32>, vector<1x256xf32> -> vector<1x256xf32>
    %363 = arith.addf %353, %362 : vector<1x256xf32>
    %364 = vector.extract_strided_slice %212 {offsets = [54, 0], sizes = [1, 64], strides = [1, 1]} : vector<64x64xf32> to vector<1x64xf32>
    %365 = vector.extract_strided_slice %212 {offsets = [55, 0], sizes = [1, 64], strides = [1, 1]} : vector<64x64xf32> to vector<1x64xf32>
    %366 = arith.maximumf %364, %365 : vector<1x64xf32>
    %367 = vector.extract_strided_slice %212 {offsets = [62, 0], sizes = [1, 64], strides = [1, 1]} : vector<64x64xf32> to vector<1x64xf32>
    %368 = vector.extract_strided_slice %212 {offsets = [63, 0], sizes = [1, 64], strides = [1, 1]} : vector<64x64xf32> to vector<1x64xf32>
    %369 = arith.maximumf %367, %368 : vector<1x64xf32>
    %370 = arith.maximumf %366, %369 : vector<1x64xf32>
    %c960 = arith.constant 960 : index
    %c0_252 = arith.constant 0 : index
    %371 = vector.load %arg8[%c960, %c0_252] : memref<1024x256xf32, #tpu.memory_space<vmem>>, vector<64x256xf32>
    %cst_253 = arith.constant dense<0.000000e+00> : vector<1x256xf32>
    %372 = tpu.matmul %370, %371, %cst_253 {dimension_numbers = #tpu.dot_dimension_numbers<[1], [0], [0], [1], [0, 0, 1, 1], [], []>} : vector<1x64xf32>, vector<64x256xf32>, vector<1x256xf32> -> vector<1x256xf32>
    %373 = arith.addf %363, %372 : vector<1x256xf32>
    %cst_254 = arith.constant 0.000000e+00 : f32
    %374 = vector.broadcast %cst_254 : f32 to vector<1x256xf32>
    %375 = arith.maximumf %373, %374 : vector<1x256xf32>
    %c0_255 = arith.constant 0 : index
    %c0_256 = arith.constant 0 : index
    %376 = vector.load %arg10[%c0_255, %c0_256] : memref<256x64xf32, #tpu.memory_space<vmem>>, vector<256x64xf32>
    %cst_257 = arith.constant dense<0.000000e+00> : vector<1x64xf32>
    %377 = tpu.matmul %375, %376, %cst_257 {dimension_numbers = #tpu.dot_dimension_numbers<[1], [0], [0], [1], [0, 0, 1, 1], [], []>} : vector<1x256xf32>, vector<256x64xf32>, vector<1x64xf32> -> vector<1x64xf32>
    %c0_258 = arith.constant 0 : index
    %c0_259 = arith.constant 0 : index
    %378 = vector.load %arg11[%c0_258, %c0_259] : memref<1x64xf32, #tpu.memory_space<vmem>>, vector<1x64xf32>
    %379 = arith.addf %377, %378 : vector<1x64xf32>
    %cst_260 = arith.constant 0.000000e+00 : f32
    %380 = vector.broadcast %cst_260 : f32 to vector<1x64xf32>
    %381 = arith.maximumf %379, %380 : vector<1x64xf32>
    %c0_261 = arith.constant 0 : index
    %c0_262 = arith.constant 0 : index
    %382 = vector.load %arg12[%c0_261, %c0_262] : memref<64x128xf32, #tpu.memory_space<vmem>>, vector<64x128xf32>
    %cst_263 = arith.constant dense<0.000000e+00> : vector<1x128xf32>
    %383 = tpu.matmul %381, %382, %cst_263 {dimension_numbers = #tpu.dot_dimension_numbers<[1], [0], [0], [1], [0, 0, 1, 1], [], []>} : vector<1x64xf32>, vector<64x128xf32>, vector<1x128xf32> -> vector<1x128xf32>
    %c0_264 = arith.constant 0 : index
    %c0_265 = arith.constant 0 : index
    %384 = vector.load %arg13[%c0_264, %c0_265] : memref<1x128xf32, #tpu.memory_space<vmem>>, vector<1x128xf32>
    %385 = arith.addf %383, %384 : vector<1x128xf32>
    %cst_266 = arith.constant dense<0xFF800000> : vector<1xf32>
    %386 = vector.multi_reduction <maximumf>, %385, %cst_266 [1] : vector<1x128xf32> to vector<1xf32>
    %387 = vector.shape_cast %386 : vector<1xf32> to vector<1x1xf32>
    %388 = vector.broadcast %387 : vector<1x1xf32> to vector<1x128xf32>
    %389 = arith.subf %385, %388 : vector<1x128xf32>
    %390 = math.exp %389 : vector<1x128xf32>
    %cst_267 = arith.constant dense<0.000000e+00> : vector<1xf32>
    %391 = vector.multi_reduction <add>, %390, %cst_267 [1] : vector<1x128xf32> to vector<1xf32>
    %392 = vector.shape_cast %391 : vector<1xf32> to vector<1x1xf32>
    %393 = vector.broadcast %392 : vector<1x1xf32> to vector<1x128xf32>
    %394 = arith.divf %390, %393 : vector<1x128xf32>
    %c0_268 = arith.constant 0 : index
    %c0_269 = arith.constant 0 : index
    %c0_270 = arith.constant 0 : index
    %395 = vector.load %arg14[%c0_268, %c0_269, %c0_270] : memref<1x1x128xf32, #tpu.memory_space<vmem>>, vector<1x1x128xf32>
    %396 = vector.shape_cast %395 : vector<1x1x128xf32> to vector<1x128xf32>
    %397 = vector.shape_cast %394 : vector<1x128xf32> to vector<1x1x128xf32>
    tpu.vector_store %arg14[%c0_268, %c0_269, %c0_270], %397 {strides = array<i32>} : memref<1x1x128xf32, #tpu.memory_space<vmem>>, vector<1x1x128xf32>,
    return
  }
  func.func @transform_0(%arg0: i32) -> (i32, i32, i32) {
    %c0_i32 = arith.constant 0 : i32
    %c0_i32_0 = arith.constant 0 : i32
    %c0_i32_1 = arith.constant 0 : i32
    return %arg0, %c0_i32, %c0_i32_0 : i32, i32, i32
  }
  func.func @transform_1(%arg0: i32) -> (i32, i32) {
    %c0_i32 = arith.constant 0 : i32
    %c0_i32_0 = arith.constant 0 : i32
    %c0_i32_1 = arith.constant 0 : i32
    return %c0_i32, %c0_i32_0 : i32, i32
  }
  func.func @transform_2(%arg0: i32) -> (i32, i32) {
    %c0_i32 = arith.constant 0 : i32
    %c0_i32_0 = arith.constant 0 : i32
    %c0_i32_1 = arith.constant 0 : i32
    return %c0_i32, %c0_i32_0 : i32, i32
  }
  func.func @transform_3(%arg0: i32) -> (i32, i32, i32) {
    %c0_i32 = arith.constant 0 : i32
    %c0_i32_0 = arith.constant 0 : i32
    %c0_i32_1 = arith.constant 0 : i32
    %c0_i32_2 = arith.constant 0 : i32
    return %c0_i32, %c0_i32_0, %c0_i32_1 : i32, i32, i32
  }
  func.func @transform_4(%arg0: i32) -> (i32, i32) {
    %c0_i32 = arith.constant 0 : i32
    %c0_i32_0 = arith.constant 0 : i32
    %c0_i32_1 = arith.constant 0 : i32
    return %c0_i32, %c0_i32_0 : i32, i32
  }
  func.func @transform_5(%arg0: i32) -> (i32, i32, i32) {
    %c0_i32 = arith.constant 0 : i32
    %c0_i32_0 = arith.constant 0 : i32
    %c0_i32_1 = arith.constant 0 : i32
    %c0_i32_2 = arith.constant 0 : i32
    return %c0_i32, %c0_i32_0, %c0_i32_1 : i32, i32, i32
  }
  func.func @transform_6(%arg0: i32) -> (i32, i32) {
    %c0_i32 = arith.constant 0 : i32
    %c0_i32_0 = arith.constant 0 : i32
    %c0_i32_1 = arith.constant 0 : i32
    return %c0_i32, %c0_i32_0 : i32, i32
  }
  func.func @transform_7(%arg0: i32) -> (i32, i32) {
    %c0_i32 = arith.constant 0 : i32
    %c0_i32_0 = arith.constant 0 : i32
    %c0_i32_1 = arith.constant 0 : i32
    return %c0_i32, %c0_i32_0 : i32, i32
  }
  func.func @transform_8(%arg0: i32) -> (i32, i32) {
    %c0_i32 = arith.constant 0 : i32
    %c0_i32_0 = arith.constant 0 : i32
    %c0_i32_1 = arith.constant 0 : i32
    return %c0_i32, %c0_i32_0 : i32, i32
  }
  func.func @transform_9(%arg0: i32) -> (i32, i32) {
    %c0_i32 = arith.constant 0 : i32
    %c0_i32_0 = arith.constant 0 : i32
    %c0_i32_1 = arith.constant 0 : i32
    return %c0_i32, %c0_i32_0 : i32, i32
  }
  func.func @transform_10(%arg0: i32) -> (i32, i32) {
    %c0_i32 = arith.constant 0 : i32
    %c0_i32_0 = arith.constant 0 : i32
    %c0_i32_1 = arith.constant 0 : i32
    return %c0_i32, %c0_i32_0 : i32, i32
  }
  func.func @transform_11(%arg0: i32) -> (i32, i32) {
    %c0_i32 = arith.constant 0 : i32
    %c0_i32_0 = arith.constant 0 : i32
    %c0_i32_1 = arith.constant 0 : i32
    return %c0_i32, %c0_i32_0 : i32, i32
  }
  func.func @transform_12(%arg0: i32) -> (i32, i32) {
    %c0_i32 = arith.constant 0 : i32
    %c0_i32_0 = arith.constant 0 : i32
    %c0_i32_1 = arith.constant 0 : i32
    return %c0_i32, %c0_i32_0 : i32, i32
  }
  func.func @transform_13(%arg0: i32) -> (i32, i32, i32) {
    %c0_i32 = arith.constant 0 : i32
    %c0_i32_0 = arith.constant 0 : i32
    %c0_i32_1 = arith.constant 0 : i32
    return %arg0, %c0_i32, %c0_i32_0 : i32, i32, i32
  }
}

</mosaic_0001>

<bundles_post_ra>
// kernel: p_net_forward.1
= control target key start
LH: loop header
LB: loop body
LE: loop exit
PB: predicated region body
PF: predicated region fallthrough
CT: control target
= control target key end

     0   :  { %18 = vsyncpa [#allocation5], 0  ;;  %s10981_s0 = inlined_call_operand.vmem [shape: f32[2,256,64], index: 0, kind: input, shape index: {}]   ;;  %s10982_s1 = inlined_call_operand.vmem [shape: f32[64,16], index: 1, kind: input, shape index: {}]   ;;  %s10983_s2 = inlined_call_operand.vmem [shape: f32[1,16], index: 2, kind: input, shape index: {}]   ;;  %s10984_s3 = inlined_call_operand.vmem [shape: f32[16,16,32], index: 3, kind: input, shape index: {}]   ;;  %s10985_s4 = inlined_call_operand.vmem [shape: f32[1,32], index: 4, kind: input, shape index: {}]   ;;  %s10986_s5 = inlined_call_operand.vmem [shape: f32[9,32,64], index: 5, kind: input, shape index: {}]   ;;  %s10987_s6 = inlined_call_operand.vmem [shape: f32[1,64], index: 6, kind: input, shape index: {}]   ;;  %s10988_s7 = inlined_call_operand.vmem [shape: f32[1024,256], index: 7, kind: input, shape index: {}]   ;;  %s10989_s8 = inlined_call_operand.vmem [shape: f32[1,256], index: 8, kind: input, shape index: {}]   ;;  %s10990_s9 = inlined_call_operand.vmem [shape: f32[256,64], index: 9, kind: input, shape index: {}]   ;;  %s10991_s10 = inlined_call_operand.vmem [shape: f32[1,64], index: 10, kind: input, shape index: {}]   ;;  %s10992_s11 = inlined_call_operand.vmem [shape: f32[64,128], index: 11, kind: input, shape index: {}]   ;;  %s10993_s12 = inlined_call_operand.vmem [shape: f32[1,128], index: 12, kind: input, shape index: {}]   ;;  %s10994_s13 = inlined_call_operand.hbm [shape: f32[2,1,128], index: 13, kind: output, shape index: {}]  }
   0x1   :  { %20 = vsyncpa [#allocation5 + $0x1], 0  ;;  %s8800_s25 = smov 0   ;;  %s8802_s26 = smov 0  }
   0x2   :  { %s8804_s27 = smov 0   ;;  %s8806_s28 = smov 0  }
   0x3 LB: > { %11002 = sst [smem:[#allocation7_spill]] %s8719_s27  ;;  %s8821_s29 = sadd.s32 4294967295, %s8723_s28   ;;  %s8723_s28 = sphi %s8806_s28, %s11012_s28   ;;  %s8719_s27 = sphi %s8804_s27, %s11014_s27   ;;  %s8715_s26 = sphi %s8802_s26, %s11016_s26   ;;  %s8711_s25 = sphi %s8800_s25, %s11015_s25  }
   0x4   : > { %s6783_s30 = sadd.s32 4294967294, %s8723_s28   ;;  %s8825_s14 = sadd.s32 1, %s8723_s28  }
   0x5   : > { %11003 = sst [smem:[#allocation8_spill]] %s8825_s14  ;;  %s311_s15 = sadd.s32 1, %s8719_s27 }
   0x6   : > { %s308_s16 = ssub.s32 %s8723_s28, %s8825_s14  ;;  %p321_p0 = scmp.ne.s32.totalorder %s8719_s27, %s8715_s26 }
   0x7   : > { %p309_p1 = scmp.eq.s32.totalorder %s308_s16, 0  ;;  %p322_p2 = scmp.eq.s32.totalorder %s8821_s29, 1 }
   0x8   : > { %p327_p3 = scmp.ne.s32.totalorder %s8715_s26, %s8711_s25  ;;  %p328_p4 = scmp.eq.s32.totalorder %s6783_s30, 1 }
   0x9   : > { %s8836_s17 = scalar_select %p309_p1, %s8719_s27, %s311_s15  }
   0xa   : > { %p8838_p5 = por %p322_p2, %p321_p0  ;;  %p8842_p6 = por %p328_p4, %p327_p3 }
   0xb   : > { %11004 = sst [smem:[#allocation9_spill]] %s8836_s17  ;;  %p6786_p7 = scmp.ge.s32.totalorder %s8723_s28, 1 }
   0xc   : > { %p390_p8 = scmp.lt.s32.totalorder %s8723_s28, 3 }
   0xe   : > { %p391_p9 = pnand %p6786_p7, %p390_p8 }
  0x10   : > { %394 = sbr.rel (%p391_p9) target bundleno = 2232 (0x8b8), region = 72 }
  0x17   : > { %v470_v0 = vld [vmem:[%s10982_s1] sm:$0xff]  ;;  %v471_v1 = vld [vmem:[%s10982_s1 + $0x8] sm:$0xff]  ;;  %v472_v2 = vld [vmem:[%s10982_s1 + $0x10] sm:$0xff]  ;;  %p433_p10 = scmp.lt.s32.totalorder %s8821_s29, 1  ;;  %vm485_vm0 = vcmask 523264   ;;  %vm839_vm1 = vcmask 130048  }
  0x18   : > { %v7978_v3 = vpack.c.bf16 %v471_v1, %v470_v0  ;;  %v473_v4 = vld [vmem:[%s10982_s1 + $0x18] sm:$0xff]  ;;  %v474_v6 = vld [vmem:[%s10982_s1 + $0x20] sm:$0xff]  ;;  %v475_v7 = vld [vmem:[%s10982_s1 + $0x28] sm:$0xff]  ;;  %vm841_vm2 = vcmask 123904   ;;  %v10998_v44 = vmov 0.0   ;;  %vm3335_vm3 = vcmask 261120  }
  0x19   : > { %v7982_v5 = vpack.c.bf16 %v473_v4, %v472_v2  ;;  %s434_s22 = scalar_select %p433_p10, %s8821_s29, 1  ;;  %v7986_v8 = vpack.c.bf16 %v475_v7, %v474_v6  ;;  %v476_v9 = vld [vmem:[%s10982_s1 + $0x30] sm:$0xff]  ;;  %v477_v10 = vld [vmem:[%s10982_s1 + $0x38] sm:$0xff]  ;;  %845 = vst.msk [vmem:[#allocation2 + $0x20] sm:$0xff] %vm839_vm1, %v10998_v44  ;;  %843 = vst.msk [vmem:[#allocation2 + $0x10] sm:$0xff] %vm839_vm1, %v10998_v44  ;;  %vm3337_vm4 = vcmask 254976  }
  0x1a   : > { %7979 = vmatprep.subr.bf16.mxu0 %v7978_v3  ;;  %v7990_v12 = vpack.c.bf16 %v477_v10, %v476_v9  ;;  %846 = vst.msk [vmem:[#allocation2 + $0x28] sm:$0x3] %vm841_vm2, %v10998_v44  ;;  %844 = vst.msk [vmem:[#allocation2 + $0x18] sm:$0x3] %vm841_vm2, %v10998_v44  ;;  %v6822_v45 = vld [vmem:[%s10984_s3 + $0x10] sm:$0xff]  ;;  %v6823_v46 = vld [vmem:[%s10984_s3 + $0x18] sm:$0xff] }
  0x1b   : > { %7981 = vmatpush3.bf16.msra.mxu0 %v7978_v3  ;;  %s7106_s23 = sshll.u32 %s434_s22, 8  ;;  %847 = vst.msk [vmem:[#allocation2 + $0x30] sm:$0xff] %vm839_vm1, %v10998_v44  ;;  %849 = vst.msk [vmem:[#allocation2 + $0x40] sm:$0xff] %vm839_vm1, %v10998_v44  ;;  %v7994_v47 = vpack.c.bf16 %v6823_v46, %v6822_v45  ;;  %v966_v49 = vld [vmem:[%s10984_s3] sm:$0xff]  ;;  %v967_v50 = vld [vmem:[%s10984_s3 + $0x8] sm:$0xff]  ;;  %vm8728_vm5 = vmmov 0  }
  0x1c   : > { %7983 = vmatprep.subr.bf16.mxu0 %v7982_v5  ;;  %s8871_s15 = scalar_lea.vmem %s10981_s0, %s7106_s23  ;;  %848 = vst.msk [vmem:[#allocation2 + $0x38] sm:$0x3] %vm841_vm2, %v10998_v44  ;;  %850 = vst.msk [vmem:[#allocation2 + $0x48] sm:$0x3] %vm841_vm2, %v10998_v44  ;;  %v9100_v51 = vpack.c.bf16 %v967_v50, %v966_v49  ;;  %v9106_v52 = vld [vmem:[%s10983_s2] ss:$0 sm:$0xff] }
  0x1d   : > { %v438_v11 = vld [vmem:[%s8871_s15] sm:$0xff]  ;;  %v439_v13 = vld [vmem:[%s8871_s15 + $0x8] sm:$0xff]  ;;  %v440_v14 = vld [vmem:[%s8871_s15 + $0x10] sm:$0xff]  ;;  %851 = vst.msk [vmem:[#allocation2 + $0x50] sm:$0xff] %vm839_vm1, %v10998_v44  ;;  %7995 = vmatprep.subr.bf16.mxu1 %v7994_v47  ;;  %vm6702_vm6 = vcmask 1040384   ;;  %s431_s22 = sand.u32 1, %s8715_s26  }
  0x1e   : > { %7475 = vmatprep.mubr.msk.f32.mxu0 %vm485_vm0, %v438_v11  ;;  %v441_v15 = vld [vmem:[%s8871_s15 + $0x18] sm:$0xff]  ;;  %v442_v16 = vld [vmem:[%s8871_s15 + $0x20] sm:$0xff]  ;;  %v443_v17 = vld [vmem:[%s8871_s15 + $0x28] sm:$0xff]  ;;  %852 = vst.msk [vmem:[#allocation2 + $0x58] sm:$0x3] %vm841_vm2, %v10998_v44  ;;  %7997 = vmatpush3.bf16.msra.mxu1 %v7994_v47  ;;  %s7103_s23 = sshll.u32 %s8821_s29, 4 }
  0x1f   : > { %7985 = vmatpush3.bf16.msra.mxu0 %v7982_v5  ;;  %v444_v18 = vld [vmem:[%s8871_s15 + $0x30] sm:$0xff]  ;;  %v445_v19 = vld [vmem:[%s8871_s15 + $0x38] sm:$0xff]  ;;  %v446_v20 = vld [vmem:[%s8871_s15 + $0x40] sm:$0xff]  ;;  %853 = vst.msk [vmem:[#allocation2 + $0x60] sm:$0xff] %vm839_vm1, %v10998_v44  ;;  %7999 = vmatprep.subr.bf16.mxu1 %v9100_v51  ;;  %s432_s24 = scalar_lea.vmem [#allocation4], %s431_s22  ;;  %s10939_s27 = scalar_lea.hbm %s10994_s13, %s7103_s23 }
  0x20   : > { %7987 = vmatprep.subr.bf16.mxu0 %v7986_v8  ;;  %v447_v21 = vld [vmem:[%s8871_s15 + $0x48] sm:$0xff]  ;;  %v448_v22 = vld [vmem:[%s8871_s15 + $0x50] sm:$0xff]  ;;  %v449_v23 = vld [vmem:[%s8871_s15 + $0x58] sm:$0xff]  ;;  %854 = vst.msk [vmem:[#allocation2 + $0x68] sm:$0x3] %vm841_vm2, %v10998_v44  ;;  %s6728_s30 = sshll.u32 %s432_s24, 4  ;;  %s10941_s30 = int_to_ptr.vmem [resolvable:$true] %s6728_s30 }
  0x21   : > { %v450_v24 = vld [vmem:[%s8871_s15 + $0x60] sm:$0xff]  ;;  %v451_v25 = vld [vmem:[%s8871_s15 + $0x68] sm:$0xff]  ;;  %v452_v26 = vld [vmem:[%s8871_s15 + $0x70] sm:$0xff]  ;;  %855 = vst.msk [vmem:[#allocation2 + $0x70] sm:$0xff] %vm839_vm1, %v10998_v44  ;;  %s6716_s17 = scalar_lea.sflag [#allocation5], %s431_s22  ;;  %s8661_s14 = scalar_lea.vmem %s10941_s30, 16 }
  0x22   : > { %v453_v27 = vld [vmem:[%s8871_s15 + $0x78] sm:$0xff]  ;;  %v454_v28 = vld [vmem:[%s8871_s15 + $0x80] sm:$0xff]  ;;  %v455_v29 = vld [vmem:[%s8871_s15 + $0x88] sm:$0xff]  ;;  %856 = vst.msk [vmem:[#allocation2 + $0x78] sm:$0x3] %vm841_vm2, %v10998_v44  ;;  %p8662_p11 = scmp.ne.s32.totalorder %s10941_s30, %s8661_s14  ;;  %s8729_s29 = smov [#allocation4]  }
  0x23   : > { %7989 = vmatpush3.bf16.msra.mxu0 %v7986_v8  ;;  %v456_v30 = vld [vmem:[%s8871_s15 + $0x90] sm:$0xff]  ;;  %v457_v31 = vld [vmem:[%s8871_s15 + $0x98] sm:$0xff]  ;;  %v458_v32 = vld [vmem:[%s8871_s15 + $0xa0] sm:$0xff]  ;;  %857 = vst.msk [vmem:[#allocation2 + $0x80] sm:$0xff] %vm839_vm1, %v10998_v44  ;;  %s8665_s20 = sshll.u32 %s8729_s29, 4  ;;  %s8666_s20 = int_to_ptr.vmem [resolvable:$false] %s8665_s20 }
  0x24   : > { %7991 = vmatprep.subr.bf16.mxu0 %v7990_v12  ;;  %v459_v33 = vld [vmem:[%s8871_s15 + $0xa8] sm:$0xff]  ;;  %v460_v34 = vld [vmem:[%s8871_s15 + $0xb0] sm:$0xff]  ;;  %v461_v35 = vld [vmem:[%s8871_s15 + $0xb8] sm:$0xff]  ;;  %858 = vst.msk [vmem:[#allocation2 + $0x88] sm:$0x3] %vm841_vm2, %v10998_v44  ;;  %p8663_p12 = pnand %p8662_p11, %p8838_p5  ;;  %s8667_s21 = scalar_lea.vmem %s8666_s20, 32 }
  0x25   : > { %v462_v36 = vld [vmem:[%s8871_s15 + $0xc0] sm:$0xff]  ;;  %v463_v37 = vld [vmem:[%s8871_s15 + $0xc8] sm:$0xff]  ;;  %v464_v38 = vld [vmem:[%s8871_s15 + $0xd0] sm:$0xff]  ;;  %859 = vst.msk [vmem:[#allocation2 + $0x90] sm:$0xff] %vm839_vm1, %v10998_v44  ;;  %p8668_p0 = scmp.lt.s32.totalorder %s10941_s30, %s8666_s20  ;;  %p8669_p1 = scmp.lt.s32.totalorder %s8667_s21, %s8661_s14 }
  0x26   : > { %v465_v39 = vld [vmem:[%s8871_s15 + $0xd8] sm:$0xff]  ;;  %v466_v40 = vld [vmem:[%s8871_s15 + $0xe0] sm:$0xff]  ;;  %v467_v41 = vld [vmem:[%s8871_s15 + $0xe8] sm:$0xff]  ;;  %860 = vst.msk [vmem:[#allocation2 + $0x98] sm:$0x3] %vm841_vm2, %v10998_v44  ;;  %p8664_p13 = pneg %p8663_p12 }
  0x27   : > { %7993 = vmatpush3.bf16.msra.mxu0 %v7990_v12  ;;  %v468_v42 = vld [vmem:[%s8871_s15 + $0xf0] sm:$0xff]  ;;  %v469_v43 = vld [vmem:[%s8871_s15 + $0xf8] sm:$0xff]  ;;  %863 = vst.msk [vmem:[#allocation2 + $0xb0] sm:$0xff] %vm839_vm1, %v10998_v44  ;;  %865 = vst.msk [vmem:[#allocation2 + $0xc0] sm:$0xff] %vm839_vm1, %v10998_v44  ;;  %p8670_p2 = por %p8669_p1, %p8668_p0 }
  0x28   : > { %864 = vst.msk [vmem:[#allocation2 + $0xb8] sm:$0x3] %vm841_vm2, %v10998_v44  ;;  %866 = vst.msk [vmem:[#allocation2 + $0xc8] sm:$0x3] %vm841_vm2, %v10998_v44 }
  0x29   : > { %867 = vst.msk [vmem:[#allocation2 + $0xd0] sm:$0xff] %vm839_vm1, %v10998_v44  ;;  %869 = vst.msk [vmem:[#allocation2 + $0xe0] sm:$0xff] %vm839_vm1, %v10998_v44  ;;  %p8671_p3 = pnand %p8670_p2, %p8664_p13 }
  0x2a   : > { %7476 = vmatmul.mubr.msk.f32.vlgmr.msra.gmra.mrb[0].mxu0 %vm485_vm0, %v439_v13  ;;  %868 = vst.msk [vmem:[#allocation2 + $0xd8] sm:$0x3] %vm841_vm2, %v10998_v44  ;;  %870 = vst.msk [vmem:[#allocation2 + $0xe8] sm:$0x3] %vm841_vm2, %v10998_v44 }
  0x2b   : > { %7478 = vmatprep.mubr.msk.f32.mxu0 %vm485_vm0, %v440_v14  ;;  %871 = vst.msk [vmem:[#allocation2 + $0xf0] sm:$0xff] %vm839_vm1, %v10998_v44  ;;  %873 = vst.msk [vmem:[#allocation2 + $0x100] sm:$0xff] %vm839_vm1, %v10998_v44 }
  0x2c   : > { %872 = vst.msk [vmem:[#allocation2 + $0xf8] sm:$0x3] %vm841_vm2, %v10998_v44  ;;  %874 = vst.msk [vmem:[#allocation2 + $0x108] sm:$0x3] %vm841_vm2, %v10998_v44 }
  0x2d   : > { %875 = vst.msk [vmem:[#allocation2 + $0x110] sm:$0xff] %vm839_vm1, %v10998_v44  ;;  %877 = vst.msk [vmem:[#allocation2 + $0x120] sm:$0xff] %vm839_vm1, %v10998_v44 }
  0x2e   : > { %7479 = vmatmul.mubr.msk.f32.gmra.mrb[2].mxu0 %vm485_vm0, %v441_v15  ;;  %876 = vst.msk [vmem:[#allocation2 + $0x118] sm:$0x3] %vm841_vm2, %v10998_v44  ;;  %878 = vst.msk [vmem:[#allocation2 + $0x128] sm:$0x3] %vm841_vm2, %v10998_v44 }
  0x2f   : > { %7481 = vmatprep.mubr.msk.f32.mxu0 %vm485_vm0, %v442_v16  ;;  %879 = vst.msk [vmem:[#allocation2 + $0x130] sm:$0xff] %vm839_vm1, %v10998_v44  ;;  %881 = vst.msk [vmem:[#allocation2 + $0x140] sm:$0xff] %vm839_vm1, %v10998_v44 }
  0x30   : > { %880 = vst.msk [vmem:[#allocation2 + $0x138] sm:$0x3] %vm841_vm2, %v10998_v44  ;;  %882 = vst.msk [vmem:[#allocation2 + $0x148] sm:$0x3] %vm841_vm2, %v10998_v44 }
  0x31   : > { %883 = vst.msk [vmem:[#allocation2 + $0x150] sm:$0xff] %vm839_vm1, %v10998_v44  ;;  %885 = vst.msk [vmem:[#allocation2 + $0x160] sm:$0xff] %vm839_vm1, %v10998_v44 }
  0x32   : > { %7482 = vmatmul.mubr.msk.f32.gmra.mrb[4].mxu0 %vm485_vm0, %v443_v17  ;;  %884 = vst.msk [vmem:[#allocation2 + $0x158] sm:$0x3] %vm841_vm2, %v10998_v44  ;;  %886 = vst.msk [vmem:[#allocation2 + $0x168] sm:$0x3] %vm841_vm2, %v10998_v44 }
  0x33   : > { %7484 = vmatprep.mubr.msk.f32.mxu0 %vm485_vm0, %v444_v18  ;;  %887 = vst.msk [vmem:[#allocation2 + $0x170] sm:$0xff] %vm839_vm1, %v10998_v44  ;;  %889 = vst.msk [vmem:[#allocation2 + $0x180] sm:$0xff] %vm839_vm1, %v10998_v44 }
  0x34   : > { %888 = vst.msk [vmem:[#allocation2 + $0x178] sm:$0x3] %vm841_vm2, %v10998_v44  ;;  %890 = vst.msk [vmem:[#allocation2 + $0x188] sm:$0x3] %vm841_vm2, %v10998_v44 }
  0x35   : > { %891 = vst.msk [vmem:[#allocation2 + $0x190] sm:$0xff] %vm839_vm1, %v10998_v44  ;;  %893 = vst.msk [vmem:[#allocation2 + $0x1a0] sm:$0xff] %vm839_vm1, %v10998_v44 }
  0x36   : > { %7485 = vmatmul.mubr.msk.f32.gmra.mrb[6].mxu0 %vm485_vm0, %v445_v19  ;;  %892 = vst.msk [vmem:[#allocation2 + $0x198] sm:$0x3] %vm841_vm2, %v10998_v44  ;;  %894 = vst.msk [vmem:[#allocation2 + $0x1a8] sm:$0x3] %vm841_vm2, %v10998_v44 }
  0x37   : > { %7487 = vmatprep.mubr.msk.f32.mxu0 %vm485_vm0, %v446_v20  ;;  %895 = vst.msk [vmem:[#allocation2 + $0x1b0] sm:$0xff] %vm839_vm1, %v10998_v44  ;;  %897 = vst.msk [vmem:[#allocation2 + $0x1c0] sm:$0xff] %vm839_vm1, %v10998_v44  ;;  %v969_v48 = vld [vmem:[#allocation2 + $0x141] sm:$0xff] }
  0x38   : > { %896 = vst.msk [vmem:[#allocation2 + $0x1b8] sm:$0x3] %vm841_vm2, %v10998_v44  ;;  %898 = vst.msk [vmem:[#allocation2 + $0x1c8] sm:$0x3] %vm841_vm2, %v10998_v44  ;;  %7527 = vmatprep.mubr.msk.f32.mxu1 %vm839_vm1, %v969_v48 }
  0x39   : > { %901 = vst.msk [vmem:[#allocation2 + $0x1e0] sm:$0xff] %vm839_vm1, %v10998_v44  ;;  %903 = vst.msk [vmem:[#allocation2 + $0x1f0] sm:$0xff] %vm839_vm1, %v10998_v44 }
  0x3a   : > { %7488 = vmatmul.mubr.msk.f32.gmra.mrb[8].mxu0 %vm485_vm0, %v447_v21  ;;  %902 = vst.msk [vmem:[#allocation2 + $0x1e8] sm:$0x3] %vm841_vm2, %v10998_v44  ;;  %904 = vst.msk [vmem:[#allocation2 + $0x1f8] sm:$0x3] %vm841_vm2, %v10998_v44 }
  0x3b   : > { %7490 = vmatprep.mubr.msk.f32.mxu0 %vm485_vm0, %v448_v22  ;;  %905 = vst.msk [vmem:[#allocation2 + $0x200] sm:$0xff] %vm839_vm1, %v10998_v44  ;;  %907 = vst.msk [vmem:[#allocation2 + $0x210] sm:$0xff] %vm839_vm1, %v10998_v44 }
  0x3c   : > { %906 = vst.msk [vmem:[#allocation2 + $0x208] sm:$0x3] %vm841_vm2, %v10998_v44  ;;  %908 = vst.msk [vmem:[#allocation2 + $0x218] sm:$0x3] %vm841_vm2, %v10998_v44 }
  0x3d   : > { %909 = vst.msk [vmem:[#allocation2 + $0x220] sm:$0xff] %vm839_vm1, %v10998_v44  ;;  %911 = vst.msk [vmem:[#allocation2 + $0x230] sm:$0xff] %vm839_vm1, %v10998_v44 }
  0x3e   : > { %7491 = vmatmul.mubr.msk.f32.gmra.mrb[10].mxu0 %vm485_vm0, %v449_v23  ;;  %910 = vst.msk [vmem:[#allocation2 + $0x228] sm:$0x3] %vm841_vm2, %v10998_v44  ;;  %912 = vst.msk [vmem:[#allocation2 + $0x238] sm:$0x3] %vm841_vm2, %v10998_v44 }
  0x3f   : > { %7493 = vmatprep.mubr.msk.f32.mxu0 %vm485_vm0, %v450_v24  ;;  %913 = vst.msk [vmem:[#allocation2 + $0x240] sm:$0xff] %vm839_vm1, %v10998_v44  ;;  %915 = vst.msk [vmem:[#allocation2 + $0x250] sm:$0xff] %vm839_vm1, %v10998_v44 }
  0x40   : > { %914 = vst.msk [vmem:[#allocation2 + $0x248] sm:$0x3] %vm841_vm2, %v10998_v44  ;;  %916 = vst.msk [vmem:[#allocation2 + $0x258] sm:$0x3] %vm841_vm2, %v10998_v44 }
  0x41   : > { %917 = vst.msk [vmem:[#allocation2 + $0x260] sm:$0xff] %vm839_vm1, %v10998_v44 }
  0x42   : > { %7494 = vmatmul.mubr.msk.f32.gmra.mrb[12].mxu0 %vm485_vm0, %v451_v25  ;;  %918 = vst.msk [vmem:[#allocation2 + $0x268] sm:$0x3] %vm841_vm2, %v10998_v44  ;;  %v6984_v44 = vld [vmem:[%s10986_s5 + $0x38] sm:$0xff] }
  0x43   : > { %7496 = vmatprep.mubr.msk.f32.mxu0 %vm485_vm0, %v452_v26 }
  0x46   : > { %7497 = vmatmul.mubr.msk.f32.gmra.mrb[14].mxu0 %vm485_vm0, %v453_v27 }
  0x47   : > { %7499 = vmatprep.mubr.msk.f32.mxu0 %vm485_vm0, %v454_v28 }
  0x4a   : > { %7500 = vmatmul.mubr.msk.f32.gmra.mrb[16].mxu0 %vm485_vm0, %v455_v29 }
  0x4b   : > { %7502 = vmatprep.mubr.msk.f32.mxu0 %vm485_vm0, %v456_v30 }
  0x4e   : > { %7503 = vmatmul.mubr.msk.f32.gmra.mrb[18].mxu0 %vm485_vm0, %v457_v31 }
  0x4f   : > { %7505 = vmatprep.mubr.msk.f32.mxu0 %vm485_vm0, %v458_v32 }
  0x52   : > { %7506 = vmatmul.mubr.msk.f32.gmra.mrb[20].mxu0 %vm485_vm0, %v459_v33 }
  0x53   : > { %7508 = vmatprep.mubr.msk.f32.mxu0 %vm485_vm0, %v460_v34 }
  0x56   : > { %7509 = vmatmul.mubr.msk.f32.gmra.mrb[22].mxu0 %vm485_vm0, %v461_v35 }
  0x57   : > { %7511 = vmatprep.mubr.msk.f32.mxu0 %vm485_vm0, %v462_v36 }
  0x5a   : > { %7512 = vmatmul.mubr.msk.f32.gmra.mrb[24].mxu0 %vm485_vm0, %v463_v37 }
  0x5b   : > { %7514 = vmatprep.mubr.msk.f32.mxu0 %vm485_vm0, %v464_v38 }
  0x5e   : > { %7515 = vmatmul.mubr.msk.f32.gmra.mrb[26].mxu0 %vm485_vm0, %v465_v39 }
  0x5f   : > { %7517 = vmatprep.mubr.msk.f32.mxu0 %vm485_vm0, %v466_v40 }
  0x62   : > { %7518 = vmatmul.mubr.msk.f32.gmra.mrb[28].mxu0 %vm485_vm0, %v467_v41 }
  0x63   : > { %7520 = vmatprep.mubr.msk.f32.mxu0 %vm485_vm0, %v468_v42 }
  0x66   : > { %7521 = vmatmul.mubr.msk.f32.gmra.mrb[30].mxu0 %vm485_vm0, %v469_v43 }
  0xfd   : > { %v7477_v53 = vpop.f32.mrb[0].mxu0 }
  0xfe   : > { %v654_v54 = vadd.f32 %v7477_v53, %v9106_v52  ;;  %v648_v55 = vpop.f32.mrb[1].mxu0 }
  0xff   : > { %v649_v56 = vadd.f32 %v9106_v52, %v648_v55  ;;  %v6840_v55 = vld [vmem:[%s10984_s3 + $0x20] sm:$0xff] }
 0x100   : > { %v808_v57 = vmax.f32 %v654_v54, 0.0 }
 0x101   : > { %v807_v58 = vmax.f32 %v649_v56, 0.0  ;;  %v7480_v59 = vpop.f32.mrb[2].mxu0  ;;  %v6841_v56 = vld [vmem:[%s10984_s3 + $0x28] sm:$0xff] }
 0x102   : > { %923 = vst.msk [vmem:[#allocation2 + $0x21] sm:$0xff] %vm839_vm1, %v808_v57  ;;  %v664_v60 = vadd.f32 %v7480_v59, %v9106_v52  ;;  %v658_v61 = vpop.f32.mrb[3].mxu0 }
 0x103   : > { %922 = vst.msk [vmem:[#allocation2 + $0x11] sm:$0xff] %vm839_vm1, %v807_v58  ;;  %v659_v62 = vadd.f32 %v9106_v52, %v658_v61  ;;  %v8002_v61 = vpack.c.bf16 %v6841_v56, %v6840_v55  ;;  %v1386_v56 = vld [vmem:[#allocation2 + $0x142] sm:$0xff] }
 0x104   : > { %v810_v63 = vmax.f32 %v664_v60, 0.0 }
 0x105   : > { %v809_v0 = vmax.f32 %v659_v62, 0.0  ;;  %v7483_v1 = vpop.f32.mrb[4].mxu0 }
 0x106   : > { %925 = vst.msk [vmem:[#allocation2 + $0x41] sm:$0xff] %vm839_vm1, %v810_v63  ;;  %v674_v2 = vadd.f32 %v7483_v1, %v9106_v52  ;;  %v668_v3 = vpop.f32.mrb[5].mxu0 }
 0x107   : > { %924 = vst.msk [vmem:[#allocation2 + $0x31] sm:$0xff] %vm839_vm1, %v809_v0  ;;  %v669_v4 = vadd.f32 %v9106_v52, %v668_v3 }
 0x108   : > { %v812_v5 = vmax.f32 %v674_v2, 0.0 }
 0x109   : > { %v811_v6 = vmax.f32 %v669_v4, 0.0  ;;  %v7486_v7 = vpop.f32.mrb[6].mxu0 }
 0x10a   : > { %927 = vst.msk [vmem:[#allocation2 + $0x61] sm:$0xff] %vm839_vm1, %v812_v5  ;;  %v684_v8 = vadd.f32 %v7486_v7, %v9106_v52  ;;  %v678_v9 = vpop.f32.mrb[7].mxu0 }
 0x10b   : > { %926 = vst.msk [vmem:[#allocation2 + $0x51] sm:$0xff] %vm839_vm1, %v811_v6  ;;  %v679_v10 = vadd.f32 %v9106_v52, %v678_v9 }
 0x10c   : > { %v814_v11 = vmax.f32 %v684_v8, 0.0 }
 0x10d   : > { %v813_v12 = vmax.f32 %v679_v10, 0.0  ;;  %v7489_v13 = vpop.f32.mrb[8].mxu0 }
 0x10e   : > { %929 = vst.msk [vmem:[#allocation2 + $0x81] sm:$0xff] %vm839_vm1, %v814_v11  ;;  %v694_v14 = vadd.f32 %v7489_v13, %v9106_v52  ;;  %v688_v15 = vpop.f32.mrb[9].mxu0 }
 0x10f   : > { %928 = vst.msk [vmem:[#allocation2 + $0x71] sm:$0xff] %vm839_vm1, %v813_v12  ;;  %v689_v16 = vadd.f32 %v9106_v52, %v688_v15 }
 0x110   : > { %v816_v17 = vmax.f32 %v694_v14, 0.0 }
 0x111   : > { %v815_v18 = vmax.f32 %v689_v16, 0.0  ;;  %v7492_v19 = vpop.f32.mrb[10].mxu0 }
 0x112   : > { %932 = vst.msk [vmem:[#allocation2 + $0xc1] sm:$0xff] %vm839_vm1, %v816_v17  ;;  %v704_v20 = vadd.f32 %v7492_v19, %v9106_v52  ;;  %v698_v21 = vpop.f32.mrb[11].mxu0 }
 0x113   : > { %931 = vst.msk [vmem:[#allocation2 + $0xb1] sm:$0xff] %vm839_vm1, %v815_v18  ;;  %v699_v22 = vadd.f32 %v9106_v52, %v698_v21  ;;  %v958_v21 = vld [vmem:[#allocation2 + $0x1e0] sm:$0xff] }
 0x114   : > { %v818_v23 = vmax.f32 %v704_v20, 0.0 }
 0x115   : > { %v817_v24 = vmax.f32 %v699_v22, 0.0  ;;  %v7495_v25 = vpop.f32.mrb[12].mxu0 }
 0x116   : > { %934 = vst.msk [vmem:[#allocation2 + $0xe1] sm:$0xff] %vm839_vm1, %v818_v23  ;;  %v714_v26 = vadd.f32 %v7495_v25, %v9106_v52  ;;  %v708_v27 = vpop.f32.mrb[13].mxu0  ;;  %v6850_v25 = vld [vmem:[%s10984_s3 + $0x30] sm:$0xff] }
 0x117   : > { %933 = vst.msk [vmem:[#allocation2 + $0xd1] sm:$0xff] %vm839_vm1, %v817_v24  ;;  %v709_v28 = vadd.f32 %v9106_v52, %v708_v27 }
 0x118   : > { %v820_v29 = vmax.f32 %v714_v26, 0.0  ;;  %v6851_v26 = vld [vmem:[%s10984_s3 + $0x38] sm:$0xff] }
 0x119   : > { %v819_v30 = vmax.f32 %v709_v28, 0.0  ;;  %v7498_v31 = vpop.f32.mrb[14].mxu0 }
 0x11a   : > { %936 = vst.msk [vmem:[#allocation2 + $0x101] sm:$0xff] %vm839_vm1, %v820_v29  ;;  %v724_v32 = vadd.f32 %v7498_v31, %v9106_v52  ;;  %v718_v33 = vpop.f32.mrb[15].mxu0  ;;  %v8006_v31 = vpack.c.bf16 %v6851_v26, %v6850_v25  ;;  %v9354_v25 = vld [vmem:[#allocation2 + $0x21] sm:$0xff]  ;;  %v9358_v26 = vld [vmem:[#allocation2 + $0x31] sm:$0xff] }
 0x11b   : > { %935 = vst.msk [vmem:[#allocation2 + $0xf1] sm:$0xff] %vm839_vm1, %v819_v30  ;;  %v719_v34 = vadd.f32 %v9106_v52, %v718_v33 }
 0x11c   : > { %v822_v35 = vmax.f32 %v724_v32, 0.0 }
 0x11d   : > { %v821_v36 = vmax.f32 %v719_v34, 0.0  ;;  %v7501_v37 = vpop.f32.mrb[16].mxu0 }
 0x11e   : > { %938 = vst.msk [vmem:[#allocation2 + $0x121] sm:$0xff] %vm839_vm1, %v822_v35  ;;  %v734_v38 = vadd.f32 %v7501_v37, %v9106_v52  ;;  %v728_v39 = vpop.f32.mrb[17].mxu0 }
 0x11f   : > { %937 = vst.msk [vmem:[#allocation2 + $0x111] sm:$0xff] %vm839_vm1, %v821_v36  ;;  %v729_v40 = vadd.f32 %v9106_v52, %v728_v39 }
 0x120   : > { %v824_v41 = vmax.f32 %v734_v38, 0.0 }
 0x121   : > { %v823_v42 = vmax.f32 %v729_v40, 0.0  ;;  %v7504_v43 = vpop.f32.mrb[18].mxu0 }
 0x122   : > { %941 = vst.msk [vmem:[#allocation2 + $0x161] sm:$0xff] %vm839_vm1, %v824_v41  ;;  %v744_v45 = vadd.f32 %v7504_v43, %v9106_v52  ;;  %v738_v46 = vpop.f32.mrb[19].mxu0 }
 0x123   : > { %940 = vst.msk [vmem:[#allocation2 + $0x151] sm:$0xff] %vm839_vm1, %v823_v42  ;;  %v739_v47 = vadd.f32 %v9106_v52, %v738_v46  ;;  %v1238_v42 = vld [vmem:[#allocation2 + $0x1e1] sm:$0xff] }
 0x124   : > { %v826_v48 = vmax.f32 %v744_v45, 0.0  ;;  %v6860_v45 = vld [vmem:[%s10984_s3 + $0x40] sm:$0xff]  ;;  %v6861_v46 = vld [vmem:[%s10984_s3 + $0x48] sm:$0xff] }
 0x125   : > { %v825_v49 = vmax.f32 %v739_v47, 0.0  ;;  %v7507_v50 = vpop.f32.mrb[20].mxu0  ;;  %v8010_v47 = vpack.c.bf16 %v6861_v46, %v6860_v45  ;;  %v9397_v45 = vld [vmem:[#allocation2 + $0xe1] sm:$0xff]  ;;  %v9401_v46 = vld [vmem:[#allocation2 + $0xf1] sm:$0xff] }
 0x126   : > { %943 = vst.msk [vmem:[#allocation2 + $0x181] sm:$0xff] %vm839_vm1, %v826_v48  ;;  %v754_v53 = vadd.f32 %v7507_v50, %v9106_v52  ;;  %v748_v54 = vpop.f32.mrb[21].mxu0 }
 0x127   : > { %942 = vst.msk [vmem:[#allocation2 + $0x171] sm:$0xff] %vm839_vm1, %v825_v49  ;;  %v749_v57 = vadd.f32 %v9106_v52, %v748_v54 }
 0x128   : > { %v828_v58 = vmax.f32 %v754_v53, 0.0 }
 0x129   : > { %v827_v59 = vmax.f32 %v749_v57, 0.0  ;;  %v7510_v60 = vpop.f32.mrb[22].mxu0  ;;  %v9164_v2 = vld [vmem:[#allocation2 + $0x161] sm:$0xff] }
 0x12a   : > { %945 = vst.msk [vmem:[#allocation2 + $0x1a1] sm:$0xff] %vm839_vm1, %v828_v58  ;;  %v764_v62 = vadd.f32 %v7510_v60, %v9106_v52  ;;  %v758_v63 = vpop.f32.mrb[23].mxu0  ;;  %v9158_v0 = vld [vmem:[#allocation2 + $0x151] sm:$0xff] }
 0x12b   : > { %944 = vst.msk [vmem:[#allocation2 + $0x191] sm:$0xff] %vm839_vm1, %v827_v59  ;;  %v759_v1 = vadd.f32 %v9106_v52, %v758_v63  ;;  %7528 = vmatmul.mubr.msk.f32.vlgmr.msra.gmra.mrb[0].mxu1 %vm839_vm1, %v9158_v0  ;;  %v6870_v58 = vld [vmem:[%s10984_s3 + $0x50] sm:$0xff]  ;;  %v6871_v59 = vld [vmem:[%s10984_s3 + $0x58] sm:$0xff] }
 0x12c   : > { %v830_v3 = vmax.f32 %v764_v62, 0.0  ;;  %8001 = vmatpush3.bf16.msra.mxu1 %v9100_v51  ;;  %7530 = vmatprep.mubr.msk.f32.mxu1 %vm839_vm1, %v9164_v2  ;;  %v8014_v60 = vpack.c.bf16 %v6871_v59, %v6870_v58  ;;  %v9288_v62 = vld [vmem:[#allocation2 + $0x162] sm:$0xff]  ;;  %v6910_v59 = vld [vmem:[%s10984_s3 + $0x90] sm:$0xff] }
 0x12d   : > { %v829_v4 = vmax.f32 %v759_v1, 0.0  ;;  %v7513_v5 = vpop.f32.mrb[24].mxu0  ;;  %8003 = vmatprep.subr.bf16.mxu1 %v8002_v61  ;;  %v9177_v51 = vld [vmem:[#allocation2 + $0x181] sm:$0xff] }
 0x12e   : > { %947 = vst.msk [vmem:[#allocation2 + $0x1c1] sm:$0xff] %vm839_vm1, %v830_v3  ;;  %v774_v6 = vadd.f32 %v7513_v5, %v9106_v52  ;;  %v768_v7 = vpop.f32.mrb[25].mxu0  ;;  %v9171_v8 = vld [vmem:[#allocation2 + $0x171] sm:$0xff]  ;;  %v9296_v1 = vld [vmem:[#allocation2 + $0x182] sm:$0xff] }
 0x12f   : > { %946 = vst.msk [vmem:[#allocation2 + $0x1b1] sm:$0xff] %vm839_vm1, %v829_v4  ;;  %v769_v9 = vadd.f32 %v9106_v52, %v768_v7  ;;  %7531 = vmatmul.mubr.msk.f32.gmra.mrb[2].mxu1 %vm839_vm1, %v9171_v8  ;;  %v9292_v63 = vld [vmem:[#allocation2 + $0x172] sm:$0xff]  ;;  %v6881_v7 = vld [vmem:[%s10984_s3 + $0x68] sm:$0xff] }
 0x130   : > { %v832_v10 = vmax.f32 %v774_v6, 0.0  ;;  %7533 = vmatprep.mubr.msk.f32.mxu1 %vm839_vm1, %v9177_v51  ;;  %v6880_v6 = vld [vmem:[%s10984_s3 + $0x60] sm:$0xff] }
 0x131   : > { %v831_v11 = vmax.f32 %v769_v9, 0.0  ;;  %v7516_v12 = vpop.f32.mrb[26].mxu0  ;;  %v9189_v17 = vld [vmem:[#allocation2 + $0x1a1] sm:$0xff]  ;;  %v1534_v9 = vld [vmem:[#allocation2 + $0xb0] sm:$0xff] }
 0x132   : > { %950 = vst.msk [vmem:[#allocation2 + $0x201] sm:$0xff] %vm839_vm1, %v832_v10  ;;  %v784_v13 = vadd.f32 %v7516_v12, %v9106_v52  ;;  %v778_v14 = vpop.f32.mrb[27].mxu0  ;;  %v9183_v15 = vld [vmem:[#allocation2 + $0x191] sm:$0xff]  ;;  %v9304_v4 = vld [vmem:[#allocation2 + $0x1a2] sm:$0xff]  ;;  %v8018_v10 = vpack.c.bf16 %v6881_v7, %v6880_v6 }
 0x133   : > { %949 = vst.msk [vmem:[#allocation2 + $0x1f1] sm:$0xff] %vm839_vm1, %v831_v11  ;;  %v779_v16 = vadd.f32 %v9106_v52, %v778_v14  ;;  %7534 = vmatmul.mubr.msk.f32.gmra.mrb[4].mxu1 %vm839_vm1, %v9183_v15  ;;  %v9300_v3 = vld [vmem:[#allocation2 + $0x192] sm:$0xff]  ;;  %v9319_v11 = vld [vmem:[#allocation2 + $0xc0] sm:$0xff] }
 0x134   : > { %v834_v18 = vmax.f32 %v784_v13, 0.0  ;;  %7536 = vmatprep.mubr.msk.f32.mxu1 %vm839_vm1, %v9189_v17  ;;  %v9323_v12 = vld [vmem:[#allocation2 + $0xd0] sm:$0xff]  ;;  %v9327_v13 = vld [vmem:[#allocation2 + $0xe0] sm:$0xff] }
 0x135   : > { %v833_v19 = vmax.f32 %v779_v16, 0.0  ;;  %v7519_v20 = vpop.f32.mrb[28].mxu0  ;;  %v9331_v14 = vld [vmem:[#allocation2 + $0xf0] sm:$0xff]  ;;  %v9335_v16 = vld [vmem:[#allocation2 + $0x100] sm:$0xff] }
 0x136   : > { %952 = vst.msk [vmem:[#allocation2 + $0x221] sm:$0xff] %vm839_vm1, %v834_v18  ;;  %v794_v22 = vadd.f32 %v7519_v20, %v9106_v52  ;;  %v788_v23 = vpop.f32.mrb[29].mxu0  ;;  %v9195_v24 = vld [vmem:[#allocation2 + $0x1b1] sm:$0xff]  ;;  %v9413_v58 = vld [vmem:[#allocation2 + $0x121] sm:$0xff] }
 0x137   : > { %951 = vst.msk [vmem:[#allocation2 + $0x211] sm:$0xff] %vm839_vm1, %v833_v19  ;;  %v789_v27 = vadd.f32 %v9106_v52, %v788_v23  ;;  %7537 = vmatmul.mubr.msk.f32.gmra.mrb[6].mxu1 %vm839_vm1, %v9195_v24  ;;  %v9308_v5 = vld [vmem:[#allocation2 + $0x1b2] sm:$0xff]  ;;  %v9343_v19 = vld [vmem:[#allocation2 + $0x120] sm:$0xff] }
 0x138   : > { %v836_v28 = vmax.f32 %v794_v22, 0.0  ;;  %7543 = vmatprep.mubr.msk.f32.mxu1 %vm839_vm1, %v958_v21  ;;  %v9339_v18 = vld [vmem:[#allocation2 + $0x110] sm:$0xff]  ;;  %v6891_v21 = vld [vmem:[%s10984_s3 + $0x78] sm:$0xff] }
 0x139   : > { %v835_v29 = vmax.f32 %v789_v27, 0.0  ;;  %v7522_v30 = vpop.f32.mrb[30].mxu0  ;;  %v9216_v36 = vld [vmem:[#allocation2 + $0x200] sm:$0xff]  ;;  %v6890_v20 = vld [vmem:[%s10984_s3 + $0x70] sm:$0xff] }
 0x13a   : > { %954 = vst.msk [vmem:[#allocation2 + $0x241] sm:$0xff] %vm839_vm1, %v836_v28  ;;  %v804_v32 = vadd.f32 %v7522_v30, %v9106_v52  ;;  %v798_v33 = vpop.f32.mrb[31].mxu0  ;;  %v9210_v34 = vld [vmem:[#allocation2 + $0x1f0] sm:$0xff]  ;;  %v9253_v49 = vld [vmem:[#allocation2 + $0x201] sm:$0xff]  ;;  %v8022_v23 = vpack.c.bf16 %v6891_v21, %v6890_v20 }
 0x13b   : > { %953 = vst.msk [vmem:[#allocation2 + $0x231] sm:$0xff] %vm839_vm1, %v835_v29  ;;  %v799_v35 = vadd.f32 %v9106_v52, %v798_v33  ;;  %7544 = vmatmul.mubr.msk.f32.vlgmr.msra.gmra.mrb[0].mxu1 %vm839_vm1, %v9210_v34  ;;  %v9249_v48 = vld [vmem:[#allocation2 + $0x1f1] sm:$0xff]  ;;  %v9362_v27 = vld [vmem:[#allocation2 + $0x41] sm:$0xff] }
 0x13c   : > { %v838_v37 = vmax.f32 %v804_v32, 0.0  ;;  %8005 = vmatpush3.bf16.msra.mxu1 %v8002_v61  ;;  %7546 = vmatprep.mubr.msk.f32.mxu1 %vm839_vm1, %v9216_v36  ;;  %v9284_v61 = vld [vmem:[#allocation2 + $0x152] sm:$0xff]  ;;  %v9370_v29 = vld [vmem:[#allocation2 + $0x61] sm:$0xff] }
 0x13d   : > { %v837_v38 = vmax.f32 %v799_v35, 0.0  ;;  %8007 = vmatprep.subr.bf16.mxu1 %v8006_v31  ;;  %v9226_v52 = vld [vmem:[#allocation2 + $0x220] sm:$0xff]  ;;  %v1682_v22 = vld [vmem:[#allocation2 + $0x11] sm:$0xff]  ;;  %v6901_v33 = vld [vmem:[%s10984_s3 + $0x88] sm:$0xff] }
 0x13e   : > { %956 = vst.msk [vmem:[#allocation2 + $0x261] sm:$0xff] %vm839_vm1, %v838_v37  ;;  %v9221_v39 = vld [vmem:[#allocation2 + $0x210] sm:$0xff]  ;;  %v9261_v53 = vld [vmem:[#allocation2 + $0x221] sm:$0xff] }
 0x13f   : > { %955 = vst.msk [vmem:[#allocation2 + $0x251] sm:$0xff] %vm839_vm1, %v837_v38  ;;  %7547 = vmatmul.mubr.msk.f32.gmra.mrb[2].mxu1 %vm839_vm1, %v9221_v39  ;;  %v9257_v50 = vld [vmem:[#allocation2 + $0x211] sm:$0xff]  ;;  %v6900_v32 = vld [vmem:[%s10984_s3 + $0x80] sm:$0xff] }
 0x140   : > { %7549 = vmatprep.mubr.msk.f32.mxu1 %vm839_vm1, %v9226_v52  ;;  %v9366_v28 = vld [vmem:[#allocation2 + $0x51] sm:$0xff]  ;;  %v8026_v37 = vpack.c.bf16 %v6901_v33, %v6900_v32  ;;  %v9389_v38 = vld [vmem:[#allocation2 + $0xc1] sm:$0xff] }
 0x141   : > { %v9234_v41 = vld [vmem:[#allocation2 + $0x240] sm:$0xff]  ;;  %v9374_v30 = vld [vmem:[#allocation2 + $0x71] sm:$0xff] }
 0x142   : > { %v9230_v40 = vld [vmem:[#allocation2 + $0x230] sm:$0xff]  ;;  %v9269_v55 = vld [vmem:[#allocation2 + $0x241] sm:$0xff] }
 0x143   : > { %7550 = vmatmul.mubr.msk.f32.gmra.mrb[4].mxu1 %vm839_vm1, %v9230_v40  ;;  %v9265_v54 = vld [vmem:[#allocation2 + $0x231] sm:$0xff]  ;;  %v9432_v20 = vld [vmem:[#allocation2 + $0x42] sm:$0xff] }
 0x144   : > { %7552 = vmatprep.mubr.msk.f32.mxu1 %vm839_vm1, %v9234_v41  ;;  %v1830_v35 = vld [vmem:[#allocation2 + $0xb1] sm:$0xff]  ;;  %v9448_v32 = vld [vmem:[#allocation2 + $0x82] sm:$0xff] }
 0x145   : > { %v1978_v6 = vld [vmem:[#allocation2 + $0x12] sm:$0xff]  ;;  %11008 = vst [vmem:[#allocation11_spill] sm:$0xff] %v9448_v32  ;;  %v6920_v33 = vld [vmem:[%s10984_s3 + $0xa0] sm:$0xff] }
 0x146   : > { %v9238_v43 = vld [vmem:[#allocation2 + $0x250] sm:$0xff] }
 0x147   : > { %7553 = vmatmul.mubr.msk.f32.gmra.mrb[6].mxu1 %vm839_vm1, %v9238_v43  ;;  %v9273_v57 = vld [vmem:[#allocation2 + $0x251] sm:$0xff] }
 0x148   : > { %7559 = vmatprep.mubr.msk.f32.mxu1 %vm839_vm1, %v1238_v42  ;;  %v9393_v42 = vld [vmem:[#allocation2 + $0xd1] sm:$0xff] }
 0x149   : > { %v9436_v21 = vld [vmem:[#allocation2 + $0x52] sm:$0xff] }
 0x14b   : > { %7560 = vmatmul.mubr.msk.f32.vlgmr.msra.gmra.mrb[0].mxu1 %vm839_vm1, %v9249_v48 }
 0x14c   : > { %8009 = vmatpush3.bf16.msra.mxu1 %v8006_v31  ;;  %7562 = vmatprep.mubr.msk.f32.mxu1 %vm839_vm1, %v9253_v49  ;;  %v9378_v31 = vld [vmem:[#allocation2 + $0x81] sm:$0xff] }
 0x14d   : > { %8011 = vmatprep.subr.bf16.mxu1 %v8010_v47 }
 0x14f   : > { %7563 = vmatmul.mubr.msk.f32.gmra.mrb[2].mxu1 %vm839_vm1, %v9257_v50 }
 0x150   : > { %7565 = vmatprep.mubr.msk.f32.mxu1 %vm839_vm1, %v9261_v53 }
 0x153   : > { %7566 = vmatmul.mubr.msk.f32.gmra.mrb[4].mxu1 %vm839_vm1, %v9265_v54 }
 0x154   : > { %7568 = vmatprep.mubr.msk.f32.mxu1 %vm839_vm1, %v9269_v55 }
 0x157   : > { %7569 = vmatmul.mubr.msk.f32.gmra.mrb[6].mxu1 %vm839_vm1, %v9273_v57 }
 0x158   : > { %7575 = vmatprep.mubr.msk.f32.mxu1 %vm839_vm1, %v1386_v56  ;;  %v9409_v56 = vld [vmem:[#allocation2 + $0x111] sm:$0xff] }
 0x15b   : > { %7576 = vmatmul.mubr.msk.f32.vlgmr.msra.gmra.mrb[0].mxu1 %vm839_vm1, %v9284_v61 }
 0x15c   : > { %8013 = vmatpush3.bf16.msra.mxu1 %v8010_v47  ;;  %7578 = vmatprep.mubr.msk.f32.mxu1 %vm839_vm1, %v9288_v62  ;;  %v9405_v47 = vld [vmem:[#allocation2 + $0x101] sm:$0xff] }
 0x15d   : > { %8015 = vmatprep.subr.bf16.mxu1 %v8014_v60 }
 0x15f   : > { %7579 = vmatmul.mubr.msk.f32.gmra.mrb[2].mxu1 %vm839_vm1, %v9292_v63 }
 0x160   : > { %7581 = vmatprep.mubr.msk.f32.mxu1 %vm839_vm1, %v9296_v1 }
 0x163   : > { %7582 = vmatmul.mubr.msk.f32.gmra.mrb[4].mxu1 %vm839_vm1, %v9300_v3 }
 0x164   : > { %7584 = vmatprep.mubr.msk.f32.mxu1 %vm839_vm1, %v9304_v4 }
 0x167   : > { %7585 = vmatmul.mubr.msk.f32.gmra.mrb[6].mxu1 %vm839_vm1, %v9308_v5 }
 0x168   : > { %7591 = vmatprep.mubr.msk.f32.mxu1 %vm839_vm1, %v1534_v9  ;;  %v9424_v9 = vld [vmem:[#allocation2 + $0x22] sm:$0xff] }
 0x16b   : > { %7592 = vmatmul.mubr.msk.f32.vlgmr.msra.gmra.mrb[0].mxu1 %vm839_vm1, %v9319_v11 }
 0x16c   : > { %8017 = vmatpush3.bf16.msra.mxu1 %v8014_v60  ;;  %7594 = vmatprep.mubr.msk.f32.mxu1 %vm839_vm1, %v9323_v12  ;;  %v6911_v60 = vld [vmem:[%s10984_s3 + $0x98] sm:$0xff] }
 0x16d   : > { %8019 = vmatprep.subr.bf16.mxu1 %v8018_v10  ;;  %v8030_v7 = vpack.c.bf16 %v6911_v60, %v6910_v59  ;;  %v6982_v59 = vld [vmem:[%s10986_s5 + $0x28] sm:$0xff]  ;;  %v6983_v60 = vld [vmem:[%s10986_s5 + $0x30] sm:$0xff] }
 0x16f   : > { %7595 = vmatmul.mubr.msk.f32.gmra.mrb[2].mxu1 %vm839_vm1, %v9327_v13 }
 0x170   : > { %7597 = vmatprep.mubr.msk.f32.mxu1 %vm839_vm1, %v9331_v14 }
 0x173   : > { %7598 = vmatmul.mubr.msk.f32.gmra.mrb[4].mxu1 %vm839_vm1, %v9335_v16 }
 0x174   : > { %7600 = vmatprep.mubr.msk.f32.mxu1 %vm839_vm1, %v9339_v18 }
 0x177   : > { %7601 = vmatmul.mubr.msk.f32.gmra.mrb[6].mxu1 %vm839_vm1, %v9343_v19 }
 0x178   : > { %7607 = vmatprep.mubr.msk.f32.mxu1 %vm839_vm1, %v1682_v22  ;;  %v9440_v22 = vld [vmem:[#allocation2 + $0x62] sm:$0xff] }
 0x17b   : > { %7608 = vmatmul.mubr.msk.f32.vlgmr.msra.gmra.mrb[0].mxu1 %vm839_vm1, %v9354_v25 }
 0x17c   : > { %8021 = vmatpush3.bf16.msra.mxu1 %v8018_v10  ;;  %7610 = vmatprep.mubr.msk.f32.mxu1 %vm839_vm1, %v9358_v26  ;;  %v9428_v10 = vld [vmem:[#allocation2 + $0x32] sm:$0xff] }
 0x17d   : > { %8023 = vmatprep.subr.bf16.mxu1 %v8022_v23 }
 0x17f   : > { %7611 = vmatmul.mubr.msk.f32.gmra.mrb[2].mxu1 %vm839_vm1, %v9362_v27 }
 0x180   : > { %7613 = vmatprep.mubr.msk.f32.mxu1 %vm839_vm1, %v9366_v28 }
 0x183   : > { %7614 = vmatmul.mubr.msk.f32.gmra.mrb[4].mxu1 %vm839_vm1, %v9370_v29 }
 0x184   : > { %7616 = vmatprep.mubr.msk.f32.mxu1 %vm839_vm1, %v9374_v30 }
 0x187   : > { %7617 = vmatmul.mubr.msk.f32.gmra.mrb[6].mxu1 %vm839_vm1, %v9378_v31 }
 0x188   : > { %7623 = vmatprep.mubr.msk.f32.mxu1 %vm839_vm1, %v1830_v35  ;;  %v6921_v35 = vld [vmem:[%s10984_s3 + $0xa8] sm:$0xff] }
 0x18b   : > { %7624 = vmatmul.mubr.msk.f32.vlgmr.msra.gmra.mrb[0].mxu1 %vm839_vm1, %v9389_v38 }
 0x18c   : > { %8025 = vmatpush3.bf16.msra.mxu1 %v8022_v23  ;;  %7626 = vmatprep.mubr.msk.f32.mxu1 %vm839_vm1, %v9393_v42  ;;  %v9444_v23 = vld [vmem:[#allocation2 + $0x72] sm:$0xff] }
 0x18d   : > { %8027 = vmatprep.subr.bf16.mxu1 %v8026_v37  ;;  %11007 = vst [vmem:[#allocation10_spill] sm:$0xff] %v9444_v23 }
 0x18f   : > { %7627 = vmatmul.mubr.msk.f32.gmra.mrb[2].mxu1 %vm839_vm1, %v9397_v45 }
 0x190   : > { %7629 = vmatprep.mubr.msk.f32.mxu1 %vm839_vm1, %v9401_v46 }
 0x193   : > { %7630 = vmatmul.mubr.msk.f32.gmra.mrb[4].mxu1 %vm839_vm1, %v9405_v47 }
 0x194   : > { %7632 = vmatprep.mubr.msk.f32.mxu1 %vm839_vm1, %v9409_v56 }
 0x197   : > { %7633 = vmatmul.mubr.msk.f32.gmra.mrb[6].mxu1 %vm839_vm1, %v9413_v58 }
 0x198   : > { %7639 = vmatprep.mubr.msk.f32.mxu1 %vm839_vm1, %v1978_v6 }
 0x19b   : > { %7640 = vmatmul.mubr.msk.f32.vlgmr.msra.gmra.mrb[0].mxu1 %vm839_vm1, %v9424_v9 }
 0x19c   : > { %8029 = vmatpush3.bf16.msra.mxu1 %v8026_v37  ;;  %7642 = vmatprep.mubr.msk.f32.mxu1 %vm839_vm1, %v9428_v10  ;;  %v6981_v37 = vld [vmem:[%s10986_s5 + $0x20] sm:$0xff] }
 0x19d   : > { %8031 = vmatprep.subr.bf16.mxu1 %v8030_v7  ;;  %v8058_v6 = vpack.c.bf16 %v6982_v59, %v6981_v37 }
 0x19f   : > { %7643 = vmatmul.mubr.msk.f32.gmra.mrb[2].mxu1 %vm839_vm1, %v9432_v20  ;;  %8059 = vmatprep.subr.bf16.mxu0 %v8058_v6 }
 0x1a0   : > { %7645 = vmatprep.mubr.msk.f32.mxu1 %vm839_vm1, %v9436_v21  ;;  %8061 = vmatpush3.bf16.msra.mxu0 %v8058_v6 }
 0x1a3   : > { %7646 = vmatmul.mubr.msk.f32.gmra.mrb[4].mxu1 %vm839_vm1, %v9440_v22 }
 0x1a4   : > { %7648 = vmatprep.mubr.msk.f32.mxu1 %vm839_vm1, %v9444_v23  ;;  %v8062_v23 = vpack.c.bf16 %v6984_v44, %v6983_v60  ;;  %v2133_v44 = vld [vmem:[#allocation2 + $0x260] sm:$0xff] }
 0x1a6   : > { %8063 = vmatprep.subr.bf16.mxu0 %v8062_v23 }
 0x1a7   : > { %7649 = vmatmul.mubr.msk.f32.gmra.mrb[6].mxu1 %vm839_vm1, %v9448_v32  ;;  %v8034_v32 = vpack.c.bf16 %v6921_v35, %v6920_v33  ;;  %8065 = vmatpush3.bf16.msra.mxu0 %v8062_v23  ;;  %v7001_v23 = vld [vmem:[%s10986_s5 + $0x40] sm:$0xff] }
 0x1a8   : > { %7655 = vmatprep.mubr.msk.f32.mxu1 %vm839_vm1, %v9210_v34  ;;  %v6930_v34 = vld [vmem:[%s10984_s3 + $0xb0] sm:$0xff] }
 0x1ab   : > { %7656 = vmatmul.mubr.msk.f32.vlgmr.msra.gmra.mrb[0].mxu1 %vm839_vm1, %v9216_v36  ;;  %v6931_v36 = vld [vmem:[%s10984_s3 + $0xb8] sm:$0xff] }
 0x1ac   : > { %8033 = vmatpush3.bf16.msra.mxu1 %v8030_v7  ;;  %7658 = vmatprep.mubr.msk.f32.mxu1 %vm839_vm1, %v9221_v39  ;;  %v8038_v39 = vpack.c.bf16 %v6931_v36, %v6930_v34 }
 0x1ad   : > { %8035 = vmatprep.subr.bf16.mxu1 %v8034_v32 }
 0x1af   : > { %7659 = vmatmul.mubr.msk.f32.gmra.mrb[2].mxu1 %vm839_vm1, %v9226_v52 }
 0x1b0   : > { %7661 = vmatprep.mubr.msk.f32.mxu1 %vm839_vm1, %v9230_v40  ;;  %v2577_v40 = vld [vmem:[#allocation2 + $0x1c2] sm:$0xff] }
 0x1b3   : > { %7662 = vmatmul.mubr.msk.f32.gmra.mrb[4].mxu1 %vm839_vm1, %v9234_v41  ;;  %v6960_v41 = vld [vmem:[%s10984_s3 + $0xe0] sm:$0xff] }
 0x1b4   : > { %7664 = vmatprep.mubr.msk.f32.mxu1 %vm839_vm1, %v9238_v43  ;;  %v6961_v43 = vld [vmem:[%s10984_s3 + $0xe8] sm:$0xff] }
 0x1b7   : > { %7665 = vmatmul.mubr.msk.f32.gmra.mrb[6].mxu1 %vm839_vm1, %v2133_v44 }
 0x1b8   : > { %7671 = vmatprep.mubr.msk.f32.mxu1 %vm839_vm1, %v9158_v0  ;;  %v2281_v0 = vld [vmem:[#allocation2 + $0x1c1] sm:$0xff] }
 0x1bb   : > { %7672 = vmatmul.mubr.msk.f32.vlgmr.msra.gmra.mrb[0].mxu1 %vm839_vm1, %v9164_v2  ;;  %v6940_v2 = vld [vmem:[%s10984_s3 + $0xc0] sm:$0xff] }
 0x1bc   : > { %8037 = vmatpush3.bf16.msra.mxu1 %v8034_v32  ;;  %7674 = vmatprep.mubr.msk.f32.mxu1 %vm839_vm1, %v9171_v8  ;;  %v6941_v8 = vld [vmem:[%s10984_s3 + $0xc8] sm:$0xff] }
 0x1bd   : > { %8039 = vmatprep.subr.bf16.mxu1 %v8038_v39  ;;  %v7002_v32 = vld [vmem:[%s10986_s5 + $0x48] sm:$0xff] }
 0x1be   : > { %v8074_v60 = vpack.c.bf16 %v7002_v32, %v7001_v23  ;;  %v7061_v23 = vld [vmem:[%s10986_s5 + $0xe0] sm:$0xff]  ;;  %v7062_v32 = vld [vmem:[%s10986_s5 + $0xe8] sm:$0xff] }
 0x1bf   : > { %7675 = vmatmul.mubr.msk.f32.gmra.mrb[2].mxu1 %vm839_vm1, %v9177_v51  ;;  %v8042_v51 = vpack.c.bf16 %v6941_v8, %v6940_v2  ;;  %v7003_v2 = vld [vmem:[%s10986_s5 + $0x50] sm:$0xff]  ;;  %v7004_v8 = vld [vmem:[%s10986_s5 + $0x58] sm:$0xff] }
 0x1c0   : > { %7677 = vmatprep.mubr.msk.f32.mxu1 %vm839_vm1, %v9183_v15  ;;  %v2429_v15 = vld [vmem:[#allocation2 + $0x261] sm:$0xff] }
 0x1c3   : > { %7678 = vmatmul.mubr.msk.f32.gmra.mrb[4].mxu1 %vm839_vm1, %v9189_v17  ;;  %v6950_v17 = vld [vmem:[%s10984_s3 + $0xd0] sm:$0xff] }
 0x1c4   : > { %7680 = vmatprep.mubr.msk.f32.mxu1 %vm839_vm1, %v9195_v24  ;;  %v6951_v24 = vld [vmem:[%s10984_s3 + $0xd8] sm:$0xff] }
 0x1c5   : > { %v8046_v52 = vpack.c.bf16 %v6951_v24, %v6950_v17  ;;  %v8078_v17 = vpack.c.bf16 %v7004_v8, %v7003_v2  ;;  %v7073_v2 = vld [vmem:[%s10986_s5 + $0x100] sm:$0xff]  ;;  %v7074_v8 = vld [vmem:[%s10986_s5 + $0x108] sm:$0xff] }
 0x1c7   : > { %7681 = vmatmul.mubr.msk.f32.gmra.mrb[6].mxu1 %vm839_vm1, %v2281_v0 }
 0x1c8   : > { %7687 = vmatprep.mubr.msk.f32.mxu1 %vm839_vm1, %v9249_v48  ;;  %v8050_v48 = vpack.c.bf16 %v6961_v43, %v6960_v41  ;;  %v7013_v43 = vld [vmem:[%s10986_s5 + $0x60] sm:$0xff] }
 0x1cb   : > { %7688 = vmatmul.mubr.msk.f32.vlgmr.msra.gmra.mrb[0].mxu1 %vm839_vm1, %v9253_v49  ;;  %v2726_v49 = vld [vmem:[#allocation2 + $0x130] sm:$0xff] }
 0x1cc   : > { %8041 = vmatpush3.bf16.msra.mxu1 %v8038_v39  ;;  %7690 = vmatprep.mubr.msk.f32.mxu1 %vm839_vm1, %v9257_v50  ;;  %v6970_v50 = vld [vmem:[%s10984_s3 + $0xf0] sm:$0xff] }
 0x1cd   : > { %8043 = vmatprep.subr.bf16.mxu1 %v8042_v51 }
 0x1cf   : > { %7691 = vmatmul.mubr.msk.f32.gmra.mrb[2].mxu1 %vm839_vm1, %v9261_v53  ;;  %v6971_v53 = vld [vmem:[%s10984_s3 + $0xf8] sm:$0xff] }
 0x1d0   : > { %7693 = vmatprep.mubr.msk.f32.mxu1 %vm839_vm1, %v9265_v54  ;;  %v8054_v54 = vpack.c.bf16 %v6971_v53, %v6970_v50 }
 0x1d3   : > { %7694 = vmatmul.mubr.msk.f32.gmra.mrb[4].mxu1 %vm839_vm1, %v9269_v55  ;;  %v2875_v55 = vld [vmem:[#allocation2 + $0x91] sm:$0xff] }
 0x1d4   : > { %7696 = vmatprep.mubr.msk.f32.mxu1 %vm839_vm1, %v9273_v57  ;;  %v3023_v57 = vld [vmem:[#allocation2 + $0x131] sm:$0xff] }
 0x1d7   : > { %7697 = vmatmul.mubr.msk.f32.gmra.mrb[6].mxu1 %vm839_vm1, %v2429_v15  ;;  %v5063_v15 = vld [vmem:[%s10988_s7 + $0x198] sm:$0xff] }
 0x1d8   : > { %7703 = vmatprep.mubr.msk.f32.mxu1 %vm839_vm1, %v9284_v61  ;;  %v11009_v61 = vld [vmem:[#allocation10_spill] sm:$0xff] }
 0x1db   : > { %7704 = vmatmul.mubr.msk.f32.vlgmr.msra.gmra.mrb[0].mxu1 %vm839_vm1, %v9288_v62  ;;  %v11010_v62 = vld [vmem:[#allocation11_spill] sm:$0xff] }
 0x1dc   : > { %8045 = vmatpush3.bf16.msra.mxu1 %v8042_v51  ;;  %7706 = vmatprep.mubr.msk.f32.mxu1 %vm839_vm1, %v9292_v63  ;;  %v3171_v63 = vld [vmem:[#allocation2 + $0x92] sm:$0xff]  ;;  %v5061_v51 = vld [vmem:[%s10988_s7 + $0x188] sm:$0xff] }
 0x1dd   : > { %8047 = vmatprep.subr.bf16.mxu1 %v8046_v52  ;;  %v8178_v24 = vpack.c.bf16 %v5063_v15, %v5061_v51  ;;  %v8122_v51 = vpack.c.bf16 %v7074_v8, %v7073_v2 }
 0x1df   : > { %7707 = vmatmul.mubr.msk.f32.gmra.mrb[2].mxu1 %vm839_vm1, %v9296_v1  ;;  %v11011_v1 = vmov 0.0  }
 0x1e0   : > { %7709 = vmatprep.mubr.msk.f32.mxu1 %vm839_vm1, %v9300_v3  ;;  %3341 = vst.msk [vmem:[#allocation3 + $0x20] sm:$0xff] %vm3335_vm3, %v11011_v1  ;;  %3336 = vst.msk [vmem:[#allocation3] sm:$0xff] %vm3335_vm3, %v11011_v1 }
 0x1e1   : > { %3342 = vst.msk [vmem:[#allocation3 + $0x28] sm:$0x3] %vm3337_vm4, %v11011_v1  ;;  %3338 = vst.msk [vmem:[#allocation3 + $0x8] sm:$0x3] %vm3337_vm4, %v11011_v1 }
 0x1e2   : > { %3339 = vst.msk [vmem:[#allocation3 + $0x10] sm:$0xff] %vm3335_vm3, %v11011_v1  ;;  %3343 = vst.msk [vmem:[#allocation3 + $0x30] sm:$0xff] %vm3335_vm3, %v11011_v1 }
 0x1e3   : > { %7710 = vmatmul.mubr.msk.f32.gmra.mrb[4].mxu1 %vm839_vm1, %v9304_v4  ;;  %3340 = vst.msk [vmem:[#allocation3 + $0x18] sm:$0x3] %vm3337_vm4, %v11011_v1  ;;  %3344 = vst.msk [vmem:[#allocation3 + $0x38] sm:$0x3] %vm3337_vm4, %v11011_v1  ;;  %v3374_v4 = vld [vmem:[%s10986_s5] sm:$0xff] }
 0x1e4   : > { %7712 = vmatprep.mubr.msk.f32.mxu1 %vm839_vm1, %v9308_v5  ;;  %3345 = vst.msk [vmem:[#allocation3 + $0x40] sm:$0xff] %vm3335_vm3, %v11011_v1  ;;  %3347 = vst.msk [vmem:[#allocation3 + $0x50] sm:$0xff] %vm3335_vm3, %v11011_v1  ;;  %v3375_v5 = vld [vmem:[%s10986_s5 + $0x8] sm:$0xff] }
 0x1e5   : > { %3346 = vst.msk [vmem:[#allocation3 + $0x48] sm:$0x3] %vm3337_vm4, %v11011_v1  ;;  %3348 = vst.msk [vmem:[#allocation3 + $0x58] sm:$0x3] %vm3337_vm4, %v11011_v1 }
 0x1e6   : > { %3349 = vst.msk [vmem:[#allocation3 + $0x60] sm:$0xff] %vm3335_vm3, %v11011_v1  ;;  %3351 = vst.msk [vmem:[#allocation3 + $0x70] sm:$0xff] %vm3335_vm3, %v11011_v1 }
 0x1e7   : > { %7713 = vmatmul.mubr.msk.f32.gmra.mrb[6].mxu1 %vm839_vm1, %v2577_v40  ;;  %3350 = vst.msk [vmem:[#allocation3 + $0x68] sm:$0x3] %vm3337_vm4, %v11011_v1  ;;  %3352 = vst.msk [vmem:[#allocation3 + $0x78] sm:$0x3] %vm3337_vm4, %v11011_v1  ;;  %v3366_v39 = vld [vmem:[#allocation3] sm:$0xff]  ;;  %v5062_v40 = vld [vmem:[%s10988_s7 + $0x190] sm:$0xff] }
 0x1e8   : > { %7719 = vmatprep.mubr.msk.f32.mxu1 %vm839_vm1, %v9319_v11  ;;  %3353 = vst.msk [vmem:[#allocation3 + $0x80] sm:$0xff] %vm3335_vm3, %v11011_v1  ;;  %3355 = vst.msk [vmem:[#allocation3 + $0x90] sm:$0xff] %vm3335_vm3, %v11011_v1  ;;  %v3378_v3 = vld [vmem:[#allocation3 + $0x1] sm:$0xff]  ;;  %v8066_v11 = vpack.c.bf16 %v3375_v5, %v3374_v4  ;;  %v7016_v4 = vld [vmem:[%s10986_s5 + $0x78] sm:$0xff] }
 0x1e9   : > { %3354 = vst.msk [vmem:[#allocation3 + $0x88] sm:$0x3] %vm3337_vm4, %v11011_v1  ;;  %3356 = vst.msk [vmem:[#allocation3 + $0x98] sm:$0x3] %vm3337_vm4, %v11011_v1  ;;  %7787 = vmatprep.mubr.msk.f32.mxu0 %vm3335_vm3, %v3378_v3  ;;  %v7015_v3 = vld [vmem:[%s10986_s5 + $0x70] sm:$0xff] }
 0x1ea   : > { %8067 = vmatprep.subr.bf16.mxu0 %v8066_v11  ;;  %v8086_v5 = vpack.c.bf16 %v7016_v4, %v7015_v3  ;;  %v4742_v4 = vld [vmem:[%s10988_s7 + $0x48] sm:$0xff] }
 0x1eb   : > { %7720 = vmatmul.mubr.msk.f32.vlgmr.msra.gmra.mrb[0].mxu1 %vm839_vm1, %v9323_v12  ;;  %v6980_v12 = vld [vmem:[%s10985_s4] ss:$0 sm:$0xff] }
 0x1ec   : > { %8049 = vmatpush3.bf16.msra.mxu1 %v8046_v52  ;;  %7722 = vmatprep.mubr.msk.f32.mxu1 %vm839_vm1, %v9327_v13  ;;  %v5060_v52 = vld [vmem:[%s10988_s7 + $0x180] sm:$0xff] }
 0x1ed   : > { %8051 = vmatprep.subr.bf16.mxu1 %v8050_v48 }
 0x1ef   : > { %7723 = vmatmul.mubr.msk.f32.gmra.mrb[2].mxu1 %vm839_vm1, %v9331_v14  ;;  %v4257_v15 = vld [vmem:[#allocation3 + $0x90] sm:$0xff] }
 0x1f0   : > { %7725 = vmatprep.mubr.msk.f32.mxu1 %vm839_vm1, %v9335_v16 }
 0x1f3   : > { %7726 = vmatmul.mubr.msk.f32.gmra.mrb[4].mxu1 %vm839_vm1, %v9339_v18 }
 0x1f4   : > { %7728 = vmatprep.mubr.msk.f32.mxu1 %vm839_vm1, %v9343_v19 }
 0x1f7   : > { %7729 = vmatmul.mubr.msk.f32.gmra.mrb[6].mxu1 %vm839_vm1, %v2726_v49  ;;  %v8180_v49 = vpack.c.bf16 %v5062_v40, %v5060_v52  ;;  %v4734_v40 = vld [vmem:[%s10988_s7 + $0x8] sm:$0xff] }
 0x1f8   : > { %7735 = vmatprep.mubr.msk.f32.mxu1 %vm839_vm1, %v9354_v25 }
 0x1fb   : > { %7736 = vmatmul.mubr.msk.f32.vlgmr.msra.gmra.mrb[0].mxu1 %vm839_vm1, %v9358_v26 }
 0x1fc   : > { %8053 = vmatpush3.bf16.msra.mxu1 %v8050_v48  ;;  %7738 = vmatprep.mubr.msk.f32.mxu1 %vm839_vm1, %v9362_v27  ;;  %v7014_v48 = vld [vmem:[%s10986_s5 + $0x68] sm:$0xff] }
 0x1fd   : > { %8055 = vmatprep.subr.bf16.mxu1 %v8054_v54  ;;  %v8082_v53 = vpack.c.bf16 %v7014_v48, %v7013_v43 }
 0x1ff   : > { %7739 = vmatmul.mubr.msk.f32.gmra.mrb[2].mxu1 %vm839_vm1, %v9366_v28 }
 0x200   : > { %7741 = vmatprep.mubr.msk.f32.mxu1 %vm839_vm1, %v9370_v29 }
 0x203   : > { %7742 = vmatmul.mubr.msk.f32.gmra.mrb[4].mxu1 %vm839_vm1, %v9374_v30 }
 0x204   : > { %7744 = vmatprep.mubr.msk.f32.mxu1 %vm839_vm1, %v9378_v31 }
 0x207   : > { %7745 = vmatmul.mubr.msk.f32.gmra.mrb[6].mxu1 %vm839_vm1, %v2875_v55 }
 0x208   : > { %7751 = vmatprep.mubr.msk.f32.mxu1 %vm839_vm1, %v9389_v38 }
 0x20b   : > { %7752 = vmatmul.mubr.msk.f32.vlgmr.msra.gmra.mrb[0].mxu1 %vm839_vm1, %v9393_v42 }
 0x20c   : > { %8057 = vmatpush3.bf16.msra.mxu1 %v8054_v54  ;;  %7754 = vmatprep.mubr.msk.f32.mxu1 %vm839_vm1, %v9397_v45 }
 0x20d   : > { %8179 = vmatprep.subr.bf16.mxu1 %v8178_v24  ;;  %v7076_v24 = vld [vmem:[%s10986_s5 + $0x118] sm:$0xff] }
 0x20f   : > { %7755 = vmatmul.mubr.msk.f32.gmra.mrb[2].mxu1 %vm839_vm1, %v9401_v46  ;;  %v3376_v46 = vld [vmem:[%s10986_s5 + $0x10] sm:$0xff] }
 0x210   : > { %7757 = vmatprep.mubr.msk.f32.mxu1 %vm839_vm1, %v9405_v47  ;;  %v3377_v47 = vld [vmem:[%s10986_s5 + $0x18] sm:$0xff] }
 0x213   : > { %7758 = vmatmul.mubr.msk.f32.gmra.mrb[4].mxu1 %vm839_vm1, %v9409_v56 }
 0x214   : > { %7760 = vmatprep.mubr.msk.f32.mxu1 %vm839_vm1, %v9413_v58 }
 0x217   : > { %7761 = vmatmul.mubr.msk.f32.gmra.mrb[6].mxu1 %vm839_vm1, %v3023_v57 }
 0x218   : > { %7767 = vmatprep.mubr.msk.f32.mxu1 %vm839_vm1, %v9424_v9 }
 0x21b   : > { %7768 = vmatmul.mubr.msk.f32.vlgmr.msra.gmra.mrb[0].mxu1 %vm839_vm1, %v9428_v10  ;;  %v8070_v10 = vpack.c.bf16 %v3377_v47, %v3376_v46  ;;  %v7039_v46 = vld [vmem:[%s10986_s5 + $0xb0] sm:$0xff]  ;;  %v7040_v47 = vld [vmem:[%s10986_s5 + $0xb8] sm:$0xff] }
 0x21c   : > { %7770 = vmatprep.mubr.msk.f32.mxu1 %vm839_vm1, %v9432_v20  ;;  %8181 = vmatpush1.bf16.msra.mxu1 %v8180_v49  ;;  %v4557_v49 = vld [vmem:[#allocation3 + $0x92] sm:$0xff] }
 0x21f   : > { %7771 = vmatmul.mubr.msk.f32.gmra.mrb[2].mxu1 %vm839_vm1, %v9436_v21 }
 0x220   : > { %7773 = vmatprep.mubr.msk.f32.mxu1 %vm839_vm1, %v9440_v22 }
 0x223   : > { %7774 = vmatmul.mubr.msk.f32.gmra.mrb[4].mxu1 %vm839_vm1, %v11009_v61 }
 0x224   : > { %7776 = vmatprep.mubr.msk.f32.mxu1 %vm839_vm1, %v11010_v62  ;;  %v3649_v62 = vld [vmem:[#allocation3 + $0x2] sm:$0xff] }
 0x227   : > { %7777 = vmatmul.mubr.msk.f32.gmra.mrb[6].mxu1 %vm839_vm1, %v3171_v63 }
 0x228   : > { %5143 = vmatprep.mubr.f32.mxu1 %v11011_v1 }
 0x2ee   : > { %v7769_v13 = vpop.f32.mrb[0].mxu1 }
 0x2ef   : > { %v3320_v14 = vadd.f32 %v7769_v13, %v6980_v12  ;;  %v3265_v16 = vpop.f32.mrb[1].mxu1  ;;  %v7026_v13 = vld [vmem:[%s10986_s5 + $0x88] sm:$0xff] }
 0x2f0   : > { %v3319_v18 = vadd.f32 %v6980_v12, %v3265_v16 }
 0x2f1   : > { %v3328_v19 = vmax.f32 %v3320_v14, 0.0 }
 0x2f2   : > { %v3327_v25 = vmax.f32 %v3319_v18, 0.0  ;;  %v7772_v26 = vpop.f32.mrb[2].mxu1 }
 0x2f3   : > { %3359 = vst.msk [vmem:[#allocation3 + $0x21] sm:$0xff] %vm3335_vm3, %v3328_v19  ;;  %v3322_v27 = vadd.f32 %v7772_v26, %v6980_v12  ;;  %v3275_v28 = vpop.f32.mrb[3].mxu1 }
 0x2f4   : > { %3358 = vst.msk [vmem:[#allocation3 + $0x11] sm:$0xff] %vm3335_vm3, %v3327_v25  ;;  %v3321_v29 = vadd.f32 %v6980_v12, %v3275_v28  ;;  %v7027_v28 = vld [vmem:[%s10986_s5 + $0x90] sm:$0xff] }
 0x2f5   : > { %v3330_v30 = vmax.f32 %v3322_v27, 0.0 }
 0x2f6   : > { %v3329_v31 = vmax.f32 %v3321_v29, 0.0  ;;  %v7775_v38 = vpop.f32.mrb[4].mxu1  ;;  %v7028_v29 = vld [vmem:[%s10986_s5 + $0x98] sm:$0xff] }
 0x2f7   : > { %3361 = vst.msk [vmem:[#allocation3 + $0x41] sm:$0xff] %vm3335_vm3, %v3330_v30  ;;  %v3324_v42 = vadd.f32 %v7775_v38, %v6980_v12  ;;  %v3285_v45 = vpop.f32.mrb[5].mxu1  ;;  %v8094_v30 = vpack.c.bf16 %v7028_v29, %v7027_v28  ;;  %v7038_v38 = vld [vmem:[%s10986_s5 + $0xa8] sm:$0xff]  ;;  %v4748_v29 = vld [vmem:[%s10988_s7 + $0x78] sm:$0xff] }
 0x2f8   : > { %3360 = vst.msk [vmem:[#allocation3 + $0x31] sm:$0xff] %vm3335_vm3, %v3329_v31  ;;  %v3323_v56 = vadd.f32 %v6980_v12, %v3285_v45  ;;  %v7037_v31 = vld [vmem:[%s10986_s5 + $0xa0] sm:$0xff]  ;;  %v4746_v28 = vld [vmem:[%s10988_s7 + $0x68] sm:$0xff] }
 0x2f9   : > { %v3332_v58 = vmax.f32 %v3324_v42, 0.0  ;;  %v8098_v42 = vpack.c.bf16 %v7038_v38, %v7037_v31  ;;  %v4745_v31 = vld [vmem:[%s10988_s7 + $0x60] sm:$0xff]  ;;  %v4747_v38 = vld [vmem:[%s10988_s7 + $0x70] sm:$0xff] }
 0x2fa   : > { %v3331_v7 = vmax.f32 %v3323_v56, 0.0  ;;  %v7778_v9 = vpop.f32.mrb[6].mxu1  ;;  %v9693_v35 = vld [vmem:[#allocation3 + $0x21] sm:$0xff]  ;;  %v8102_v56 = vpack.c.bf16 %v7040_v47, %v7039_v46  ;;  %v5075_v46 = vld [vmem:[%s10988_s7 + $0x1f8] sm:$0xff] }
 0x2fb   : > { %3363 = vst.msk [vmem:[#allocation3 + $0x61] sm:$0xff] %vm3335_vm3, %v3332_v58  ;;  %v3326_v20 = vadd.f32 %v7778_v9, %v6980_v12  ;;  %v3295_v21 = vpop.f32.mrb[7].mxu1  ;;  %v9682_v22 = vld [vmem:[#allocation3 + $0x11] sm:$0xff]  ;;  %v9745_v50 = vld [vmem:[#allocation3 + $0x20] sm:$0xff] }
 0x2fc   : > { %3362 = vst.msk [vmem:[#allocation3 + $0x51] sm:$0xff] %vm3335_vm3, %v3331_v7  ;;  %v3325_v33 = vadd.f32 %v6980_v12, %v3295_v21  ;;  %7788 = vmatmul.mubr.msk.f32.vlgmr.msra.gmra.mrb[32].mxu0 %vm3335_vm3, %v9682_v22  ;;  %v3367_v41 = vld [vmem:[#allocation3 + $0x10] sm:$0xff]  ;;  %v7025_v12 = vld [vmem:[%s10986_s5 + $0x80] sm:$0xff]  ;;  %v7050_v7 = vld [vmem:[%s10986_s5 + $0xc8] sm:$0xff] }
 0x2fd   : > { %v3334_v37 = vmax.f32 %v3326_v20, 0.0  ;;  %8069 = vmatpush3.bf16.msra.mxu0 %v8066_v11  ;;  %7790 = vmatprep.mubr.msk.f32.mxu0 %vm3335_vm3, %v9693_v35  ;;  %v3650_v11 = vld [vmem:[#allocation3 + $0x12] sm:$0xff]  ;;  %v9783_v14 = vld [vmem:[#allocation3 + $0x22] sm:$0xff]  ;;  %v8090_v16 = vpack.c.bf16 %v7026_v13, %v7025_v12 }
 0x2fe   : > { %v3333_v59 = vmax.f32 %v3325_v33, 0.0  ;;  %8071 = vmatprep.subr.bf16.mxu0 %v8070_v10  ;;  %v9703_v44 = vld [vmem:[#allocation3 + $0x41] sm:$0xff]  ;;  %v7051_v20 = vld [vmem:[%s10986_s5 + $0xd0] sm:$0xff]  ;;  %v7052_v21 = vld [vmem:[%s10986_s5 + $0xd8] sm:$0xff]  ;;  %v8114_v33 = vpack.c.bf16 %v7062_v32, %v7061_v23 }
 0x2ff   : > { %3365 = vst.msk [vmem:[#allocation3 + $0x81] sm:$0xff] %vm3335_vm3, %v3334_v37  ;;  %v9698_v6 = vld [vmem:[#allocation3 + $0x31] sm:$0xff]  ;;  %v9753_v55 = vld [vmem:[#allocation3 + $0x40] sm:$0xff] }
 0x300   : > { %3364 = vst.msk [vmem:[#allocation3 + $0x71] sm:$0xff] %vm3335_vm3, %v3333_v59  ;;  %7791 = vmatmul.mubr.msk.f32.gmra.mrb[34].mxu0 %vm3335_vm3, %v9698_v6  ;;  %v9749_v54 = vld [vmem:[#allocation3 + $0x30] sm:$0xff]  ;;  %v9791_v19 = vld [vmem:[#allocation3 + $0x42] sm:$0xff]  ;;  %v7085_v32 = vld [vmem:[%s10987_s6] ss:$0 sm:$0xff] }
 0x301   : > { %7793 = vmatprep.mubr.msk.f32.mxu0 %vm3335_vm3, %v9703_v44  ;;  %8073 = vmatpush3.bf16.msra.mxu0 %v8070_v10  ;;  %v9787_v18 = vld [vmem:[#allocation3 + $0x32] sm:$0xff]  ;;  %v7049_v58 = vld [vmem:[%s10986_s5 + $0xc0] sm:$0xff] }
 0x302   : > { %8075 = vmatprep.subr.bf16.mxu0 %v8074_v60  ;;  %v9711_v36 = vld [vmem:[#allocation3 + $0x61] sm:$0xff]  ;;  %v8106_v9 = vpack.c.bf16 %v7050_v7, %v7049_v58  ;;  %v7063_v59 = vld [vmem:[%s10986_s5 + $0xf0] sm:$0xff] }
 0x303   : > { %v9707_v34 = vld [vmem:[#allocation3 + $0x51] sm:$0xff]  ;;  %v9761_v61 = vld [vmem:[#allocation3 + $0x60] sm:$0xff] }
 0x304   : > { %7794 = vmatmul.mubr.msk.f32.gmra.mrb[36].mxu0 %vm3335_vm3, %v9707_v34  ;;  %v9757_v57 = vld [vmem:[#allocation3 + $0x50] sm:$0xff]  ;;  %v9799_v26 = vld [vmem:[#allocation3 + $0x62] sm:$0xff] }
 0x305   : > { %7796 = vmatprep.mubr.msk.f32.mxu0 %vm3335_vm3, %v9711_v36  ;;  %v9795_v25 = vld [vmem:[#allocation3 + $0x52] sm:$0xff]  ;;  %v4741_v12 = vld [vmem:[%s10988_s7 + $0x40] sm:$0xff] }
 0x306   : > { %v3806_v45 = vld [vmem:[#allocation3 + $0x80] sm:$0xff]  ;;  %v4743_v13 = vld [vmem:[%s10988_s7 + $0x50] sm:$0xff] }
 0x307   : > { %v9715_v0 = vld [vmem:[#allocation3 + $0x71] sm:$0xff]  ;;  %v3956_v10 = vld [vmem:[#allocation3 + $0x81] sm:$0xff] }
 0x308   : > { %7797 = vmatmul.mubr.msk.f32.gmra.mrb[38].mxu0 %vm3335_vm3, %v9715_v0  ;;  %v9765_v63 = vld [vmem:[#allocation3 + $0x70] sm:$0xff]  ;;  %v4106_v37 = vld [vmem:[#allocation3 + $0x82] sm:$0xff] }
 0x309   : > { %7807 = vmatprep.mubr.msk.f32.mxu0 %vm3335_vm3, %v3366_v39  ;;  %v9803_v27 = vld [vmem:[#allocation3 + $0x72] sm:$0xff] }
 0x30a   : > { %v5074_v58 = vld [vmem:[%s10988_s7 + $0x1f0] sm:$0xff] }
 0x30c   : > { %7808 = vmatmul.mubr.msk.f32.vlgmr.msra.gmra.mrb[32].mxu0 %vm3335_vm3, %v3367_v41 }
 0x30d   : > { %8077 = vmatpush3.bf16.msra.mxu0 %v8074_v60  ;;  %7810 = vmatprep.mubr.msk.f32.mxu0 %vm3335_vm3, %v9745_v50  ;;  %v7064_v60 = vld [vmem:[%s10986_s5 + $0xf8] sm:$0xff] }
 0x30e   : > { %8079 = vmatprep.subr.bf16.mxu0 %v8078_v17  ;;  %v8118_v39 = vpack.c.bf16 %v7064_v60, %v7063_v59 }
 0x310   : > { %7811 = vmatmul.mubr.msk.f32.gmra.mrb[34].mxu0 %vm3335_vm3, %v9749_v54 }
 0x311   : > { %7813 = vmatprep.mubr.msk.f32.mxu0 %vm3335_vm3, %v9753_v55  ;;  %8081 = vmatpush3.bf16.msra.mxu0 %v8078_v17  ;;  %v7075_v17 = vld [vmem:[%s10986_s5 + $0x110] sm:$0xff] }
 0x312   : > { %8083 = vmatprep.subr.bf16.mxu0 %v8082_v53  ;;  %v8126_v52 = vpack.c.bf16 %v7076_v24, %v7075_v17 }
 0x314   : > { %7814 = vmatmul.mubr.msk.f32.gmra.mrb[36].mxu0 %vm3335_vm3, %v9757_v57 }
 0x315   : > { %7816 = vmatprep.mubr.msk.f32.mxu0 %vm3335_vm3, %v9761_v61 }
 0x318   : > { %7817 = vmatmul.mubr.msk.f32.gmra.mrb[38].mxu0 %vm3335_vm3, %v9765_v63 }
 0x319   : > { %7827 = vmatprep.mubr.msk.f32.mxu0 %vm3335_vm3, %v3649_v62  ;;  %v5064_v62 = vld [vmem:[%s10988_s7 + $0x1a0] sm:$0xff] }
 0x31c   : > { %7828 = vmatmul.mubr.msk.f32.vlgmr.msra.gmra.mrb[32].mxu0 %vm3335_vm3, %v3650_v11 }
 0x31d   : > { %8085 = vmatpush3.bf16.msra.mxu0 %v8082_v53  ;;  %7830 = vmatprep.mubr.msk.f32.mxu0 %vm3335_vm3, %v9783_v14  ;;  %v4739_v53 = vld [vmem:[%s10988_s7 + $0x30] sm:$0xff] }
 0x31e   : > { %8087 = vmatprep.subr.bf16.mxu0 %v8086_v5 }
 0x320   : > { %7831 = vmatmul.mubr.msk.f32.gmra.mrb[34].mxu0 %vm3335_vm3, %v9787_v18 }
 0x321   : > { %7833 = vmatprep.mubr.msk.f32.mxu0 %vm3335_vm3, %v9791_v19  ;;  %8089 = vmatpush3.bf16.msra.mxu0 %v8086_v5  ;;  %v4744_v5 = vld [vmem:[%s10988_s7 + $0x58] sm:$0xff] }
 0x322   : > { %8091 = vmatprep.subr.bf16.mxu0 %v8090_v16 }
 0x324   : > { %7834 = vmatmul.mubr.msk.f32.gmra.mrb[36].mxu0 %vm3335_vm3, %v9795_v25 }
 0x325   : > { %7836 = vmatprep.mubr.msk.f32.mxu0 %vm3335_vm3, %v9799_v26 }
 0x328   : > { %7837 = vmatmul.mubr.msk.f32.gmra.mrb[38].mxu0 %vm3335_vm3, %v9803_v27 }
 0x329   : > { %7847 = vmatprep.mubr.msk.f32.mxu0 %vm3335_vm3, %v3367_v41  ;;  %v4736_v41 = vld [vmem:[%s10988_s7 + $0x18] sm:$0xff] }
 0x32a   : > { %v8130_v43 = vpack.c.bf16 %v4736_v41, %v4734_v40  ;;  %v4842_v40 = vld [vmem:[%s10988_s7 + $0x80] sm:$0xff]  ;;  %v4844_v41 = vld [vmem:[%s10988_s7 + $0x90] sm:$0xff] }
 0x32c   : > { %7848 = vmatmul.mubr.msk.f32.vlgmr.msra.gmra.mrb[32].mxu0 %vm3335_vm3, %v9745_v50 }
 0x32d   : > { %8093 = vmatpush3.bf16.msra.mxu0 %v8090_v16  ;;  %7850 = vmatprep.mubr.msk.f32.mxu0 %vm3335_vm3, %v9749_v54  ;;  %v5069_v16 = vld [vmem:[%s10988_s7 + $0x1c8] sm:$0xff] }
 0x32e   : > { %8095 = vmatprep.subr.bf16.mxu0 %v8094_v30 }
 0x330   : > { %7851 = vmatmul.mubr.msk.f32.gmra.mrb[34].mxu0 %vm3335_vm3, %v9753_v55 }
 0x331   : > { %7853 = vmatprep.mubr.msk.f32.mxu0 %vm3335_vm3, %v9757_v57  ;;  %8097 = vmatpush3.bf16.msra.mxu0 %v8094_v30  ;;  %v8142_v30 = vpack.c.bf16 %v4748_v29, %v4746_v28  ;;  %v5291_v29 = vld [vmem:[%s10988_s7 + $0x2a0] sm:$0xff] }
 0x332   : > { %8099 = vmatprep.subr.bf16.mxu0 %v8098_v42 }
 0x334   : > { %7854 = vmatmul.mubr.msk.f32.gmra.mrb[36].mxu0 %vm3335_vm3, %v9761_v61 }
 0x335   : > { %7856 = vmatprep.mubr.msk.f32.mxu0 %vm3335_vm3, %v9765_v63 }
 0x338   : > { %7857 = vmatmul.mubr.msk.f32.gmra.mrb[38].mxu0 %vm3335_vm3, %v3806_v45 }
 0x339   : > { %7867 = vmatprep.mubr.msk.f32.mxu0 %vm3335_vm3, %v9682_v22  ;;  %v8110_v22 = vpack.c.bf16 %v7052_v21, %v7051_v20  ;;  %v5288_v21 = vld [vmem:[%s10988_s7 + $0x288] sm:$0xff] }
 0x33c   : > { %7868 = vmatmul.mubr.msk.f32.vlgmr.msra.gmra.mrb[32].mxu0 %vm3335_vm3, %v9693_v35 }
 0x33d   : > { %8101 = vmatpush3.bf16.msra.mxu0 %v8098_v42  ;;  %7870 = vmatprep.mubr.msk.f32.mxu0 %vm3335_vm3, %v9698_v6  ;;  %v8144_v42 = vpack.c.bf16 %v4747_v38, %v4745_v31 }
 0x33e   : > { %8103 = vmatprep.subr.bf16.mxu0 %v8102_v56 }
 0x340   : > { %7871 = vmatmul.mubr.msk.f32.gmra.mrb[34].mxu0 %vm3335_vm3, %v9703_v44 }
 0x341   : > { %7873 = vmatprep.mubr.msk.f32.mxu0 %vm3335_vm3, %v9707_v34  ;;  %8105 = vmatpush3.bf16.msra.mxu0 %v8102_v56  ;;  %v5072_v56 = vld [vmem:[%s10988_s7 + $0x1e0] sm:$0xff] }
 0x342   : > { %8107 = vmatprep.subr.bf16.mxu0 %v8106_v9  ;;  %v8192_v7 = vpack.c.bf16 %v5074_v58, %v5072_v56 }
 0x344   : > { %7874 = vmatmul.mubr.msk.f32.gmra.mrb[36].mxu0 %vm3335_vm3, %v9711_v36 }
 0x345   : > { %7876 = vmatprep.mubr.msk.f32.mxu0 %vm3335_vm3, %v9715_v0 }
 0x348   : > { %7877 = vmatmul.mubr.msk.f32.gmra.mrb[38].mxu0 %vm3335_vm3, %v3956_v10 }
 0x349   : > { %7887 = vmatprep.mubr.msk.f32.mxu0 %vm3335_vm3, %v3650_v11  ;;  %v8138_v11 = vpack.c.bf16 %v4744_v5, %v4742_v4  ;;  %v4846_v5 = vld [vmem:[%s10988_s7 + $0xa0] sm:$0xff] }
 0x34c   : > { %7888 = vmatmul.mubr.msk.f32.vlgmr.msra.gmra.mrb[32].mxu0 %vm3335_vm3, %v9783_v14 }
 0x34d   : > { %8109 = vmatpush3.bf16.msra.mxu0 %v8106_v9  ;;  %7890 = vmatprep.mubr.msk.f32.mxu0 %vm3335_vm3, %v9787_v18  ;;  %v4843_v9 = vld [vmem:[%s10988_s7 + $0x88] sm:$0xff] }
 0x34e   : > { %8111 = vmatprep.subr.bf16.mxu0 %v8110_v22 }
 0x350   : > { %7891 = vmatmul.mubr.msk.f32.gmra.mrb[34].mxu0 %vm3335_vm3, %v9791_v19 }
 0x351   : > { %7893 = vmatprep.mubr.msk.f32.mxu0 %vm3335_vm3, %v9795_v25  ;;  %8113 = vmatpush3.bf16.msra.mxu0 %v8110_v22  ;;  %v5290_v22 = vld [vmem:[%s10988_s7 + $0x298] sm:$0xff] }
 0x352   : > { %8115 = vmatprep.subr.bf16.mxu0 %v8114_v33  ;;  %v8210_v23 = vpack.c.bf16 %v5290_v22, %v5288_v21 }
 0x354   : > { %7894 = vmatmul.mubr.msk.f32.gmra.mrb[36].mxu0 %vm3335_vm3, %v9799_v26 }
 0x355   : > { %7896 = vmatprep.mubr.msk.f32.mxu0 %vm3335_vm3, %v9803_v27 }
 0x358   : > { %7897 = vmatmul.mubr.msk.f32.gmra.mrb[38].mxu0 %vm3335_vm3, %v4106_v37 }
 0x359   : > { %7907 = vmatprep.mubr.msk.f32.mxu0 %vm3335_vm3, %v9745_v50  ;;  %v4737_v50 = vld [vmem:[%s10988_s7 + $0x20] sm:$0xff] }
 0x35c   : > { %7908 = vmatmul.mubr.msk.f32.vlgmr.msra.gmra.mrb[32].mxu0 %vm3335_vm3, %v9749_v54  ;;  %v8136_v54 = vpack.c.bf16 %v4739_v53, %v4737_v50 }
 0x35d   : > { %8117 = vmatpush3.bf16.msra.mxu0 %v8114_v33  ;;  %7910 = vmatprep.mubr.msk.f32.mxu0 %vm3335_vm3, %v9753_v55  ;;  %v5065_v55 = vld [vmem:[%s10988_s7 + $0x1a8] sm:$0xff] }
 0x35e   : > { %8119 = vmatprep.subr.bf16.mxu0 %v8118_v39 }
 0x360   : > { %7911 = vmatmul.mubr.msk.f32.gmra.mrb[34].mxu0 %vm3335_vm3, %v9757_v57  ;;  %v5067_v57 = vld [vmem:[%s10988_s7 + $0x1b8] sm:$0xff] }
 0x361   : > { %7913 = vmatprep.mubr.msk.f32.mxu0 %vm3335_vm3, %v9761_v61  ;;  %8121 = vmatpush3.bf16.msra.mxu0 %v8118_v39  ;;  %v8182_v61 = vpack.c.bf16 %v5067_v57, %v5065_v55  ;;  %v8148_v55 = vpack.c.bf16 %v4844_v41, %v4842_v40  ;;  %v5292_v57 = vld [vmem:[%s10988_s7 + $0x2a8] sm:$0xff]  ;;  %v4854_v41 = vld [vmem:[%s10988_s7 + $0xe0] sm:$0xff] }
 0x362   : > { %8123 = vmatprep.subr.bf16.mxu0 %v8122_v51 }
 0x363   : > { %8183 = vmatprep.subr.bf16.mxu1 %v8182_v61  ;;  %v5294_v61 = vld [vmem:[%s10988_s7 + $0x2b8] sm:$0xff] }
 0x364   : > { %7914 = vmatmul.mubr.msk.f32.gmra.mrb[36].mxu0 %vm3335_vm3, %v9765_v63  ;;  %v5066_v63 = vld [vmem:[%s10988_s7 + $0x1b0] sm:$0xff]  ;;  %v8214_v28 = vpack.c.bf16 %v5294_v61, %v5292_v57  ;;  %v4951_v61 = vld [vmem:[%s10988_s7 + $0x100] sm:$0xff] }
 0x365   : > { %7916 = vmatprep.mubr.msk.f32.mxu0 %vm3335_vm3, %v3806_v45  ;;  %v8184_v3 = vpack.c.bf16 %v5066_v63, %v5064_v62  ;;  %v5073_v45 = vld [vmem:[%s10988_s7 + $0x1e8] sm:$0xff] }
 0x366   : > { %v8190_v47 = vpack.c.bf16 %v5075_v46, %v5073_v45  ;;  %v5296_v46 = vld [vmem:[%s10988_s7 + $0x2c8] sm:$0xff] }
 0x367   : > { %8185 = vmatpush1.bf16.msra.mxu1 %v8184_v3 }
 0x368   : > { %7917 = vmatmul.mubr.msk.f32.gmra.mrb[38].mxu0 %vm3335_vm3, %v4257_v15 }
 0x369   : > { %7927 = vmatprep.mubr.msk.f32.mxu0 %vm3335_vm3, %v9693_v35  ;;  %v4407_v35 = vld [vmem:[#allocation3 + $0x91] sm:$0xff] }
 0x36c   : > { %7928 = vmatmul.mubr.msk.f32.vlgmr.msra.gmra.mrb[32].mxu0 %vm3335_vm3, %v9698_v6  ;;  %v4733_v6 = vld [vmem:[%s10988_s7] sm:$0xff] }
 0x36d   : > { %8125 = vmatpush3.bf16.msra.mxu0 %v8122_v51  ;;  %7930 = vmatprep.mubr.msk.f32.mxu0 %vm3335_vm3, %v9703_v44  ;;  %v4735_v44 = vld [vmem:[%s10988_s7 + $0x10] sm:$0xff] }
 0x36e   : > { %8127 = vmatprep.subr.bf16.mxu0 %v8126_v52 }
 0x370   : > { %7931 = vmatmul.mubr.msk.f32.gmra.mrb[34].mxu0 %vm3335_vm3, %v9707_v34  ;;  %v4738_v34 = vld [vmem:[%s10988_s7 + $0x28] sm:$0xff] }
 0x371   : > { %7933 = vmatprep.mubr.msk.f32.mxu0 %vm3335_vm3, %v9711_v36  ;;  %8129 = vmatpush3.bf16.msra.mxu0 %v8126_v52  ;;  %v4740_v36 = vld [vmem:[%s10988_s7 + $0x38] sm:$0xff] }
 0x372   : > { %8131 = vmatprep.subr.bf16.mxu0 %v8130_v43  ;;  %v8134_v48 = vpack.c.bf16 %v4740_v36, %v4738_v34 }
 0x374   : > { %7934 = vmatmul.mubr.msk.f32.gmra.mrb[36].mxu0 %vm3335_vm3, %v9715_v0  ;;  %v8132_v0 = vpack.c.bf16 %v4735_v44, %v4733_v6  ;;  %v4847_v6 = vld [vmem:[%s10988_s7 + $0xa8] sm:$0xff]  ;;  %v4849_v44 = vld [vmem:[%s10988_s7 + $0xb8] sm:$0xff] }
 0x375   : > { %7936 = vmatprep.mubr.msk.f32.mxu0 %vm3335_vm3, %v3956_v10  ;;  %v4845_v10 = vld [vmem:[%s10988_s7 + $0x98] sm:$0xff]  ;;  %v8150_v4 = vpack.c.bf16 %v4849_v44, %v4847_v6  ;;  %v4952_v44 = vld [vmem:[%s10988_s7 + $0x108] sm:$0xff] }
 0x376   : > { %v8146_v20 = vpack.c.bf16 %v4845_v10, %v4843_v9  ;;  %v4850_v10 = vld [vmem:[%s10988_s7 + $0xc0] sm:$0xff] }
 0x378   : > { %7937 = vmatmul.mubr.msk.f32.gmra.mrb[38].mxu0 %vm3335_vm3, %v4407_v35 }
 0x379   : > { %7947 = vmatprep.mubr.msk.f32.mxu0 %vm3335_vm3, %v9783_v14  ;;  %v8140_v14 = vpack.c.bf16 %v4743_v13, %v4741_v12 }
 0x37c   : > { %7948 = vmatmul.mubr.msk.f32.vlgmr.msra.gmra.mrb[32].mxu0 %vm3335_vm3, %v9787_v18  ;;  %v5071_v18 = vld [vmem:[%s10988_s7 + $0x1d8] sm:$0xff] }
 0x37d   : > { %7950 = vmatprep.mubr.msk.f32.mxu0 %vm3335_vm3, %v9791_v19  ;;  %8133 = vmatpush1.bf16.msra.mxu0 %v8132_v0  ;;  %v8186_v19 = vpack.c.bf16 %v5071_v18, %v5069_v16  ;;  %v4851_v16 = vld [vmem:[%s10988_s7 + $0xc8] sm:$0xff]  ;;  %v4853_v18 = vld [vmem:[%s10988_s7 + $0xd8] sm:$0xff] }
 0x37e   : > { %8135 = vmatprep.subr.bf16.mxu0 %v8134_v48  ;;  %v5287_v48 = vld [vmem:[%s10988_s7 + $0x280] sm:$0xff]  ;;  %v8154_v9 = vpack.c.bf16 %v4853_v18, %v4851_v16  ;;  %v5510_v16 = vld [vmem:[%s10988_s7 + $0x3a8] sm:$0xff]  ;;  %v5512_v18 = vld [vmem:[%s10988_s7 + $0x3b8] sm:$0xff] }
 0x37f   : > { %8187 = vmatprep.subr.bf16.mxu1 %v8186_v19 }
 0x380   : > { %7951 = vmatmul.mubr.msk.f32.gmra.mrb[34].mxu0 %vm3335_vm3, %v9795_v25  ;;  %v5068_v25 = vld [vmem:[%s10988_s7 + $0x1c0] sm:$0xff] }
 0x381   : > { %7953 = vmatprep.mubr.msk.f32.mxu0 %vm3335_vm3, %v9799_v26  ;;  %8137 = vmatpush1.bf16.msra.mxu0 %v8136_v54  ;;  %v5070_v26 = vld [vmem:[%s10988_s7 + $0x1d0] sm:$0xff] }
 0x382   : > { %8139 = vmatprep.subr.bf16.mxu0 %v8138_v11  ;;  %v4848_v11 = vld [vmem:[%s10988_s7 + $0xb0] sm:$0xff] }
 0x383   : > { %v8152_v45 = vpack.c.bf16 %v4848_v11, %v4846_v5  ;;  %v4958_v5 = vld [vmem:[%s10988_s7 + $0x138] sm:$0xff] }
 0x384   : > { %7954 = vmatmul.mubr.msk.f32.gmra.mrb[36].mxu0 %vm3335_vm3, %v9803_v27  ;;  %v8188_v27 = vpack.c.bf16 %v5070_v26, %v5068_v25 }
 0x385   : > { %7956 = vmatprep.mubr.msk.f32.mxu0 %vm3335_vm3, %v4106_v37  ;;  %8141 = vmatpush1.bf16.msra.mxu0 %v8140_v14 }
 0x386   : > { %8189 = vmatpush1.bf16.msra.mxu1 %v8188_v27  ;;  %8143 = vmatprep.subr.bf16.mxu0 %v8142_v30  ;;  %v5293_v30 = vld [vmem:[%s10988_s7 + $0x2b0] sm:$0xff] }
 0x387   : > { %8191 = vmatprep.subr.bf16.mxu1 %v8190_v47  ;;  %v5298_v47 = vld [vmem:[%s10988_s7 + $0x2d8] sm:$0xff] }
 0x388   : > { %7957 = vmatmul.mubr.msk.f32.gmra.mrb[38].mxu0 %vm3335_vm3, %v4557_v49  ;;  %v5289_v49 = vld [vmem:[%s10988_s7 + $0x290] sm:$0xff] }
 0x389   : > { %4816 = vmatprep.mubr.f32.mxu0 %v11011_v1  ;;  %8145 = vmatpush1.bf16.msra.mxu0 %v8144_v42  ;;  %v8212_v14 = vpack.c.bf16 %v5289_v49, %v5287_v48  ;;  %v5299_v48 = vld [vmem:[%s10988_s7 + $0x2e0] sm:$0xff]  ;;  %v5301_v49 = vld [vmem:[%s10988_s7 + $0x2f0] sm:$0xff] }
 0x38a   : > { %8193 = vmatpush1.bf16.msra.mxu1 %v8192_v7  ;;  %8147 = vmatprep.subr.bf16.mxu0 %v8146_v20  ;;  %v4852_v20 = vld [vmem:[%s10988_s7 + $0xd0] sm:$0xff] }
 0x38b   : > { %8211 = vmatprep.subr.bf16.mxu1 %v8210_v23  ;;  %v8216_v23 = vpack.c.bf16 %v5293_v30, %v5291_v29  ;;  %v4960_v29 = vld [vmem:[%s10988_s7 + $0x148] sm:$0xff]  ;;  %v4962_v30 = vld [vmem:[%s10988_s7 + $0x158] sm:$0xff] }
 0x44f   : > { %v7949_v33 = vpop.f32.mrb[32].mxu0 }
 0x450   : > { %v4708_v37 = vadd.f32 %v7949_v33, %v7085_v32  ;;  %v4653_v59 = vpop.f32.mrb[33].mxu0  ;;  %v4857_v33 = vld [vmem:[%s10988_s7 + $0xf8] sm:$0xff] }
 0x451   : > { %v4707_v60 = vadd.f32 %v7085_v32, %v4653_v59 }
 0x452   : > { %v4716_v39 = vmax.f32 %v4708_v37, 0.0 }
 0x453   : > { %v4715_v2 = vmax.f32 %v4707_v60, 0.0  ;;  %v7952_v8 = vpop.f32.mrb[34].mxu0  ;;  %v8218_v60 = vpack.c.bf16 %v5298_v47, %v5296_v46  ;;  %v5514_v47 = vld [vmem:[%s10988_s7 + $0x3c8] sm:$0xff] }
 0x454   : > { %v4729_v51 = vrot.slane %v4716_v39, 1  ;;  %v4710_v15 = vadd.f32 %v7952_v8, %v7085_v32  ;;  %v4663_v17 = vpop.f32.mrb[35].mxu0 }
 0x455   : > { %v4725_v24 = vrot.slane %v4715_v2, 1  ;;  %v4709_v52 = vadd.f32 %v7085_v32, %v4663_v17  ;;  %v5302_v17 = vld [vmem:[%s10988_s7 + $0x2f8] sm:$0xff] }
 0x456   : > { %v4731_v43 = vmax.f32 %v4716_v39, %v4729_v51  ;;  %v4718_v35 = vmax.f32 %v4710_v15, 0.0  ;;  %v5295_v39 = vld [vmem:[%s10988_s7 + $0x2c0] sm:$0xff]  ;;  %v8156_v51 = vpack.c.bf16 %v4852_v20, %v4850_v10  ;;  %v5300_v15 = vld [vmem:[%s10988_s7 + $0x2e8] sm:$0xff]  ;;  %v4961_v10 = vld [vmem:[%s10988_s7 + $0x150] sm:$0xff] }
 0x457   : > { %v4727_v34 = vmax.f32 %v4715_v2, %v4725_v24  ;;  %v4717_v36 = vmax.f32 %v4709_v52, 0.0  ;;  %v7955_v0 = vpop.f32.mrb[36].mxu0  ;;  %v5297_v2 = vld [vmem:[%s10988_s7 + $0x2d0] sm:$0xff] }
 0x458   : > { %v5174_v50 = vrot.slane %v4718_v35, 1  ;;  %v4712_v53 = vadd.f32 %v7955_v0, %v7085_v32  ;;  %v4673_v54 = vpop.f32.mrb[37].mxu0  ;;  %v8220_v6 = vpack.c.bf16 %v5297_v2, %v5295_v39  ;;  %v8222_v0 = vpack.c.bf16 %v5302_v17, %v5300_v15  ;;  %v4963_v2 = vld [vmem:[%s10988_s7 + $0x160] sm:$0xff]  ;;  %v5179_v15 = vld [vmem:[%s10988_s7 + $0x208] sm:$0xff]  ;;  %v5181_v17 = vld [vmem:[%s10988_s7 + $0x218] sm:$0xff] }
 0x459   : > { %v10070_v62 = vmax.f32 %v4727_v34, %v4731_v43  ;;  %v5170_v63 = vrot.slane %v4717_v36, 1  ;;  %v4711_v3 = vadd.f32 %v7085_v32, %v4673_v54  ;;  %v4856_v43 = vld [vmem:[%s10988_s7 + $0xf0] sm:$0xff]  ;;  %v4954_v34 = vld [vmem:[%s10988_s7 + $0x118] sm:$0xff] }
 0x45a   : > { %v5176_v12 = vmax.f32 %v4718_v35, %v5174_v50  ;;  %v4720_v13 = vmax.f32 %v4712_v53, 0.0  ;;  %v8160_v50 = vpack.c.bf16 %v4856_v43, %v4854_v41  ;;  %v5506_v53 = vld [vmem:[%s10988_s7 + $0x388] sm:$0xff]  ;;  %v5508_v54 = vld [vmem:[%s10988_s7 + $0x398] sm:$0xff]  ;;  %v8162_v57 = vpack.c.bf16 %v4954_v34, %v4952_v44  ;;  %v5519_v41 = vld [vmem:[%s10988_s7 + $0x3f0] sm:$0xff] }
 0x45b   : > { %v5076_v19 = vrot.slane %v10070_v62, 6  ;;  %v5172_v25 = vmax.f32 %v4717_v36, %v5170_v63  ;;  %v4719_v26 = vmax.f32 %v4711_v3, 0.0  ;;  %v7958_v27 = vpop.f32.mrb[38].mxu0  ;;  %7086 = vmatmul.mubr.msk.f32.vlgmr.msra.gmra.mrb[40].mxu0 %vm485_vm0, %v10070_v62  ;;  %v4953_v63 = vld [vmem:[%s10988_s7 + $0x110] sm:$0xff]  ;;  %v8224_v3 = vpack.c.bf16 %v5301_v49, %v5299_v48  ;;  %v5178_v34 = vld [vmem:[%s10988_s7 + $0x200] sm:$0xff]  ;;  %v5183_v48 = vld [vmem:[%s10988_s7 + $0x228] sm:$0xff] }
 0x45c   : > { %v5619_v31 = vrot.slane %v4720_v13, 1  ;;  %v4714_v38 = vadd.f32 %v7958_v27, %v7085_v32  ;;  %8149 = vmatpush1.bf16.msra.mxu0 %v8148_v55  ;;  %v4683_v42 = vpop.f32.mrb[39].mxu0  ;;  %4925 = vmatprep.mubr.f32.mxu0 %v11011_v1  ;;  %v8242_v11 = vpack.c.bf16 %v5508_v54, %v5506_v53  ;;  %v4957_v27 = vld [vmem:[%s10988_s7 + $0x130] sm:$0xff]  ;;  %v8194_v44 = vpack.c.bf16 %v5181_v17, %v5179_v15  ;;  %v5185_v49 = vld [vmem:[%s10988_s7 + $0x238] sm:$0xff]  ;;  %v5732_v53 = vld [vmem:[%s10988_s7 + $0x480] sm:$0xff] }
 0x45d   : > { %v10100_v56 = vmax.f32 %v5172_v25, %v5176_v12  ;;  %v5615_v58 = vrot.slane %v4719_v26, 1  ;;  %v4713_v7 = vadd.f32 %v7085_v32, %v4683_v42  ;;  %7089 = vmatmul.mubr.msk.f32.vlgmr.msra.gmra.mrb[8].mxu1 %vm485_vm0, %v5076_v19  ;;  %8151 = vmatprep.subr.bf16.mxu0 %v8150_v4  ;;  %v4855_v32 = vld [vmem:[%s10988_s7 + $0xe8] sm:$0xff]  ;;  %v5505_v12 = vld [vmem:[%s10988_s7 + $0x380] sm:$0xff]  ;;  %v4858_v19 = vrot.slane %v10070_v62, 2  ;;  %v5734_v54 = vld [vmem:[%s10988_s7 + $0x490] sm:$0xff] }
 0x45e   : > { %v5621_v21 = vmax.f32 %v4720_v13, %v5619_v31  ;;  %v4722_v22 = vmax.f32 %v4714_v38, 0.0  ;;  %8213 = vmatpush1.bf16.msra.mxu1 %v8212_v14  ;;  %5370 = vmatprep.mubr.f32.mxu1 %v11011_v1  ;;  %v8158_v40 = vpack.c.bf16 %v4857_v33, %v4855_v32  ;;  %v4956_v4 = vld [vmem:[%s10988_s7 + $0x128] sm:$0xff]  ;;  %v5507_v13 = vld [vmem:[%s10988_s7 + $0x390] sm:$0xff]  ;;  %v8164_v14 = vpack.c.bf16 %v4953_v63, %v4951_v61  ;;  %v5509_v42 = vld [vmem:[%s10988_s7 + $0x3a0] sm:$0xff] }
 0x45f   : > { %v5617_v37 = vmax.f32 %v4719_v26, %v5615_v58  ;;  %v4721_v59 = vmax.f32 %v4713_v7, 0.0  ;;  %8215 = vmatprep.subr.bf16.mxu1 %v8214_v28  ;;  %v8166_v25 = vpack.c.bf16 %v4958_v5, %v4956_v4  ;;  %v4955_v26 = vld [vmem:[%s10988_s7 + $0x120] sm:$0xff]  ;;  %v8244_v28 = vpack.c.bf16 %v5507_v13, %v5505_v12  ;;  %v5516_v58 = vld [vmem:[%s10988_s7 + $0x3d8] sm:$0xff]  ;;  %v5515_v33 = vld [vmem:[%s10988_s7 + $0x3d0] sm:$0xff] }
 0x460   : > { %v6064_v8 = vrot.slane %v4722_v22, 1  ;;  %8153 = vmatpush1.bf16.msra.mxu0 %v8152_v45  ;;  %v5303_v31 = vrot.slane %v10100_v56, 2  ;;  %v8246_v38 = vpack.c.bf16 %v5512_v18, %v5510_v16  ;;  %v5511_v45 = vld [vmem:[%s10988_s7 + $0x3b0] sm:$0xff]  ;;  %v8168_v46 = vpack.c.bf16 %v4957_v27, %v4955_v26  ;;  %v5513_v32 = vld [vmem:[%s10988_s7 + $0x3c0] sm:$0xff]  ;;  %v5737_v61 = vld [vmem:[%s10988_s7 + $0x4a8] sm:$0xff] }
 0x461   : > { %v10128_v24 = vmax.f32 %v5617_v37, %v5621_v21  ;;  %v6060_v52 = vrot.slane %v4721_v59, 1  ;;  %8155 = vmatprep.subr.bf16.mxu0 %v8154_v9  ;;  %v8170_v7 = vpack.c.bf16 %v4962_v30, %v4960_v29  ;;  %v4959_v9 = vld [vmem:[%s10988_s7 + $0x140] sm:$0xff]  ;;  %v8248_v20 = vpack.c.bf16 %v5511_v45, %v5509_v42  ;;  %v4964_v21 = vld [vmem:[%s10988_s7 + $0x168] sm:$0xff]  ;;  %v5739_v63 = vld [vmem:[%s10988_s7 + $0x4b8] sm:$0xff] }
 0x462   : > { %v6066_v35 = vmax.f32 %v4722_v22, %v6064_v8  ;;  %8217 = vmatpush1.bf16.msra.mxu1 %v8216_v23  ;;  %v4966_v22 = vld [vmem:[%s10988_s7 + $0x178] sm:$0xff]  ;;  %v8250_v23 = vpack.c.bf16 %v5516_v58, %v5514_v47  ;;  %v8172_v37 = vpack.c.bf16 %v4961_v10, %v4959_v9  ;;  %v4965_v8 = vld [vmem:[%s10988_s7 + $0x170] sm:$0xff]  ;;  %v8198_v4 = vpack.c.bf16 %v5185_v49, %v5183_v48  ;;  %v5182_v5 = vld [vmem:[%s10988_s7 + $0x220] sm:$0xff] }
 0x463   : > { %v6062_v36 = vmax.f32 %v4721_v59, %v6060_v52  ;;  %8219 = vmatprep.subr.bf16.mxu1 %v8218_v60  ;;  %v5518_v59 = vld [vmem:[%s10988_s7 + $0x3e8] sm:$0xff]  ;;  %v5520_v60 = vld [vmem:[%s10988_s7 + $0x3f8] sm:$0xff]  ;;  %v8174_v39 = vpack.c.bf16 %v4966_v22, %v4964_v21  ;;  %v8176_v43 = vpack.c.bf16 %v4965_v8, %v4963_v2  ;;  %v8276_v12 = vpack.c.bf16 %v5734_v54, %v5732_v53  ;;  %v5736_v18 = vld [vmem:[%s10988_s7 + $0x4a0] sm:$0xff] }
 0x464   : > { %8157 = vmatpush1.bf16.msra.mxu0 %v8156_v51  ;;  %v8252_v51 = vpack.c.bf16 %v5515_v33, %v5513_v32  ;;  %v8254_v52 = vpack.c.bf16 %v5520_v60, %v5518_v59  ;;  %v5187_v13 = vld [vmem:[%s10988_s7 + $0x248] sm:$0xff]  ;;  %v8278_v16 = vpack.c.bf16 %v5739_v63, %v5737_v61  ;;  %v5743_v27 = vld [vmem:[%s10988_s7 + $0x4d8] sm:$0xff]  ;;  %v5186_v29 = vld [vmem:[%s10988_s7 + $0x240] sm:$0xff]  ;;  %v5748_v54 = vrot.slane %v10128_v24, 2 }
 0x465   : > { %v10154_v55 = vmax.f32 %v6062_v36, %v6066_v35  ;;  %8159 = vmatprep.subr.bf16.mxu0 %v8158_v40  ;;  %v5517_v40 = vld [vmem:[%s10988_s7 + $0x3e0] sm:$0xff]  ;;  %v5733_v35 = vld [vmem:[%s10988_s7 + $0x488] sm:$0xff]  ;;  %v5180_v36 = vld [vmem:[%s10988_s7 + $0x210] sm:$0xff] }
 0x466   : > { %8221 = vmatpush1.bf16.msra.mxu1 %v8220_v6  ;;  %v5735_v6 = vld [vmem:[%s10988_s7 + $0x498] sm:$0xff]  ;;  %v5741_v26 = vld [vmem:[%s10988_s7 + $0x4c8] sm:$0xff]  ;;  %v5188_v30 = vld [vmem:[%s10988_s7 + $0x250] sm:$0xff] }
 0x467   : > { %8223 = vmatprep.subr.bf16.mxu1 %v8222_v0  ;;  %v8256_v0 = vpack.c.bf16 %v5519_v41, %v5517_v40  ;;  %v5193_v42 = vld [vmem:[%s10988_s7 + $0x278] sm:$0xff]  ;;  %v8282_v45 = vpack.c.bf16 %v5743_v27, %v5741_v26  ;;  %v5742_v47 = vld [vmem:[%s10988_s7 + $0x4d0] sm:$0xff]  ;;  %v8204_v58 = vpack.c.bf16 %v5188_v30, %v5186_v29  ;;  %v5954_v61 = vld [vmem:[%s10988_s7 + $0x5a0] sm:$0xff] }
 0x468   : > { %8161 = vmatpush1.bf16.msra.mxu0 %v8160_v50  ;;  %v8274_v50 = vpack.c.bf16 %v5735_v6, %v5733_v35  ;;  %v5747_v9 = vld [vmem:[%s10988_s7 + $0x4f8] sm:$0xff]  ;;  %v5192_v21 = vld [vmem:[%s10988_s7 + $0x270] sm:$0xff]  ;;  %v5963_v27 = vld [vmem:[%s10988_s7 + $0x5e8] sm:$0xff] }
 0x469   : > { %8163 = vmatprep.subr.bf16.mxu0 %v8162_v57  ;;  %v8196_v57 = vpack.c.bf16 %v5180_v36, %v5178_v34  ;;  %v5399_v32 = vld [vmem:[%s10988_s7 + $0x318] sm:$0xff]  ;;  %v5746_v59 = vld [vmem:[%s10988_s7 + $0x4f0] sm:$0xff]  ;;  %v5408_v30 = vld [vmem:[%s10988_s7 + $0x360] sm:$0xff] }
 0x46a   : > { %8225 = vmatpush1.bf16.msra.mxu1 %v8224_v3  ;;  %v4967_v3 = vrot.slane %v10070_v62, 4  ;;  %v5189_v62 = vld [vmem:[%s10988_s7 + $0x258] sm:$0xff]  ;;  %v5398_v15 = vld [vmem:[%s10988_s7 + $0x310] sm:$0xff] }
 0x46b   : > { %7087 = vmatmul.mubr.msk.f32.vlgmr.msra.gmra.mrb[42].mxu0 %vm485_vm0, %v4858_v19  ;;  %8243 = vmatprep.subr.bf16.mxu1 %v8242_v11  ;;  %v5184_v11 = vld [vmem:[%s10988_s7 + $0x230] sm:$0xff]  ;;  %v5953_v2 = vld [vmem:[%s10988_s7 + $0x598] sm:$0xff] }
 0x46c   : > { %8165 = vmatpush1.bf16.msra.mxu0 %v8164_v14  ;;  %5034 = vmatprep.mubr.f32.mxu0 %v11011_v1  ;;  %v5521_v14 = vrot.slane %v10100_v56, 6  ;;  %v5738_v19 = vld [vmem:[%s10988_s7 + $0x4b0] sm:$0xff]  ;;  %v5403_v40 = vld [vmem:[%s10988_s7 + $0x338] sm:$0xff] }
 0x46d   : > { %7091 = vmatmul.mubr.msk.f32.vlgmr.msra.gmra.mrb[10].mxu1 %vm485_vm0, %v5303_v31  ;;  %8167 = vmatprep.subr.bf16.mxu0 %v8166_v25  ;;  %v8200_v25 = vpack.c.bf16 %v5184_v11, %v5182_v5  ;;  %v8280_v31 = vpack.c.bf16 %v5738_v19, %v5736_v18  ;;  %v5952_v35 = vld [vmem:[%s10988_s7 + $0x590] sm:$0xff]  ;;  %v5957_v34 = vld [vmem:[%s10988_s7 + $0x5b8] sm:$0xff]  ;;  %v5958_v19 = vld [vmem:[%s10988_s7 + $0x5c0] sm:$0xff] }
 0x46e   : > { %8245 = vmatpush1.bf16.msra.mxu1 %v8244_v28  ;;  %5588 = vmatprep.mubr.f32.mxu1 %v11011_v1  ;;  %v8202_v28 = vpack.c.bf16 %v5189_v62, %v5187_v13  ;;  %v5402_v48 = vld [vmem:[%s10988_s7 + $0x330] sm:$0xff]  ;;  %v5407_v53 = vld [vmem:[%s10988_s7 + $0x358] sm:$0xff] }
 0x46f   : > { %8247 = vmatprep.subr.bf16.mxu1 %v8246_v38  ;;  %v5191_v38 = vld [vmem:[%s10988_s7 + $0x268] sm:$0xff]  ;;  %v5956_v63 = vld [vmem:[%s10988_s7 + $0x5b0] sm:$0xff]  ;;  %v5961_v5 = vld [vmem:[%s10988_s7 + $0x5d8] sm:$0xff] }
 0x470   : > { %8169 = vmatpush1.bf16.msra.mxu0 %v8168_v46  ;;  %v5740_v46 = vld [vmem:[%s10988_s7 + $0x4c0] sm:$0xff]  ;;  %v8206_v10 = vpack.c.bf16 %v5193_v42, %v5191_v38  ;;  %v5406_v13 = vld [vmem:[%s10988_s7 + $0x350] sm:$0xff]  ;;  %v8312_v62 = vpack.c.bf16 %v5956_v63, %v5954_v61  ;;  %v5624_v42 = vld [vmem:[%s10988_s7 + $0x408] sm:$0xff] }
 0x471   : > { %8171 = vmatprep.subr.bf16.mxu0 %v8170_v7  ;;  %v5745_v7 = vld [vmem:[%s10988_s7 + $0x4e8] sm:$0xff]  ;;  %v8284_v22 = vpack.c.bf16 %v5742_v47, %v5740_v46  ;;  %v5962_v47 = vld [vmem:[%s10988_s7 + $0x5e0] sm:$0xff] }
 0x472   : > { %8249 = vmatpush1.bf16.msra.mxu1 %v8248_v20  ;;  %v5190_v20 = vld [vmem:[%s10988_s7 + $0x260] sm:$0xff]  ;;  %v8286_v33 = vpack.c.bf16 %v5747_v9, %v5745_v7  ;;  %v6178_v9 = vld [vmem:[%s10988_s7 + $0x688] sm:$0xff] }
 0x473   : > { %8251 = vmatprep.subr.bf16.mxu1 %v8250_v23  ;;  %v5397_v23 = vld [vmem:[%s10988_s7 + $0x308] sm:$0xff]  ;;  %v8208_v60 = vpack.c.bf16 %v5192_v21, %v5190_v20  ;;  %v5623_v21 = vld [vmem:[%s10988_s7 + $0x400] sm:$0xff] }
 0x474   : > { %8173 = vmatpush1.bf16.msra.mxu0 %v8172_v37  ;;  %v5744_v37 = vld [vmem:[%s10988_s7 + $0x4e0] sm:$0xff]  ;;  %v8226_v8 = vpack.c.bf16 %v5399_v32, %v5397_v23  ;;  %v5628_v32 = vld [vmem:[%s10988_s7 + $0x428] sm:$0xff] }
 0x475   : > { %8175 = vmatprep.subr.bf16.mxu0 %v8174_v39  ;;  %v5951_v39 = vld [vmem:[%s10988_s7 + $0x588] sm:$0xff]  ;;  %v8288_v17 = vpack.c.bf16 %v5746_v59, %v5744_v37  ;;  %v6177_v59 = vld [vmem:[%s10988_s7 + $0x680] sm:$0xff] }
 0x476   : > { %8253 = vmatpush1.bf16.msra.mxu1 %v8252_v51  ;;  %v5396_v51 = vld [vmem:[%s10988_s7 + $0x300] sm:$0xff]  ;;  %v8306_v41 = vpack.c.bf16 %v5953_v2, %v5951_v39  ;;  %v6182_v2 = vld [vmem:[%s10988_s7 + $0x6a8] sm:$0xff] }
 0x477   : > { %8255 = vmatprep.subr.bf16.mxu1 %v8254_v52  ;;  %v5401_v52 = vld [vmem:[%s10988_s7 + $0x328] sm:$0xff]  ;;  %v8228_v6 = vpack.c.bf16 %v5398_v15, %v5396_v51  ;;  %v5412_v51 = vrot.slane %v10100_v56, 4  ;;  %v6185_v63 = vld [vmem:[%s10988_s7 + $0x6c0] sm:$0xff] }
 0x478   : > { %8177 = vmatpush1.bf16.msra.mxu0 %v8176_v43  ;;  %v5950_v43 = vld [vmem:[%s10988_s7 + $0x580] sm:$0xff]  ;;  %v8230_v36 = vpack.c.bf16 %v5403_v40, %v5401_v52  ;;  %v5629_v52 = vld [vmem:[%s10988_s7 + $0x430] sm:$0xff] }
 0x479   : > { %8195 = vmatprep.subr.bf16.mxu0 %v8194_v44  ;;  %v5955_v44 = vld [vmem:[%s10988_s7 + $0x5a8] sm:$0xff]  ;;  %v8308_v49 = vpack.c.bf16 %v5952_v35, %v5950_v43  ;;  %v5966_v43 = vrot.slane %v10128_v24, 6 }
 0x47a   : > { %8257 = vmatpush1.bf16.msra.mxu1 %v8256_v0  ;;  %v5400_v0 = vld [vmem:[%s10988_s7 + $0x320] sm:$0xff] }
 0x47b   : > { %7088 = vmatmul.mubr.msk.f32.vlgmr.msra.gmra.mrb[44].mxu0 %vm485_vm0, %v4967_v3  ;;  %8275 = vmatprep.subr.bf16.mxu1 %v8274_v50  ;;  %v5405_v50 = vld [vmem:[%s10988_s7 + $0x348] sm:$0xff]  ;;  %v8232_v3 = vpack.c.bf16 %v5402_v48, %v5400_v0  ;;  %v6188_v0 = vld [vmem:[%s10988_s7 + $0x6d8] sm:$0xff] }
 0x47c   : > { %8197 = vmatpush1.bf16.msra.mxu0 %v8196_v57  ;;  %5261 = vmatprep.mubr.f32.mxu0 %v11011_v1  ;;  %v8310_v57 = vpack.c.bf16 %v5957_v34, %v5955_v44  ;;  %v8234_v11 = vpack.c.bf16 %v5407_v53, %v5405_v50  ;;  %v6183_v44 = vld [vmem:[%s10988_s7 + $0x6b0] sm:$0xff] }
 0x47d   : > { %7093 = vmatmul.mubr.msk.f32.vlgmr.msra.gmra.mrb[12].mxu1 %vm485_vm0, %v5521_v14  ;;  %8199 = vmatprep.subr.bf16.mxu0 %v8198_v4  ;;  %v5959_v4 = vld [vmem:[%s10988_s7 + $0x5c8] sm:$0xff]  ;;  %v5633_v50 = vld [vmem:[%s10988_s7 + $0x450] sm:$0xff] }
 0x47e   : > { %8277 = vmatpush1.bf16.msra.mxu1 %v8276_v12  ;;  %5815 = vmatprep.mubr.f32.mxu1 %v11011_v1  ;;  %v5404_v12 = vld [vmem:[%s10988_s7 + $0x340] sm:$0xff]  ;;  %v5409_v14 = vld [vmem:[%s10988_s7 + $0x368] sm:$0xff]  ;;  %v8314_v18 = vpack.c.bf16 %v5961_v5, %v5959_v4 }
 0x47f   : > { %8279 = vmatprep.subr.bf16.mxu1 %v8278_v16  ;;  %v5411_v16 = vld [vmem:[%s10988_s7 + $0x378] sm:$0xff]  ;;  %v8236_v26 = vpack.c.bf16 %v5406_v13, %v5404_v12  ;;  %v6190_v5 = vld [vmem:[%s10988_s7 + $0x6e8] sm:$0xff]  ;;  %v5635_v13 = vld [vmem:[%s10988_s7 + $0x460] sm:$0xff] }
 0x480   : > { %8201 = vmatpush1.bf16.msra.mxu0 %v8200_v25  ;;  %v5960_v25 = vld [vmem:[%s10988_s7 + $0x5d0] sm:$0xff]  ;;  %v8238_v29 = vpack.c.bf16 %v5411_v16, %v5409_v14  ;;  %v5842_v16 = vld [vmem:[%s10988_s7 + $0x508] sm:$0xff] }
 0x481   : > { %8203 = vmatprep.subr.bf16.mxu0 %v8202_v28  ;;  %v5965_v28 = vld [vmem:[%s10988_s7 + $0x5f8] sm:$0xff]  ;;  %v8316_v38 = vpack.c.bf16 %v5960_v25, %v5958_v19  ;;  %v6189_v25 = vld [vmem:[%s10988_s7 + $0x6e0] sm:$0xff] }
 0x482   : > { %8281 = vmatpush1.bf16.msra.mxu1 %v8280_v31  ;;  %v5410_v31 = vld [vmem:[%s10988_s7 + $0x370] sm:$0xff]  ;;  %v8318_v46 = vpack.c.bf16 %v5965_v28, %v5963_v27  ;;  %v6396_v28 = vld [vmem:[%s10988_s7 + $0x788] sm:$0xff] }
 0x483   : > { %8283 = vmatprep.subr.bf16.mxu1 %v8282_v45  ;;  %v5626_v45 = vld [vmem:[%s10988_s7 + $0x418] sm:$0xff]  ;;  %v8240_v7 = vpack.c.bf16 %v5410_v31, %v5408_v30  ;;  %v5841_v31 = vld [vmem:[%s10988_s7 + $0x500] sm:$0xff] }
 0x484   : > { %8205 = vmatpush1.bf16.msra.mxu0 %v8204_v58  ;;  %v5964_v58 = vld [vmem:[%s10988_s7 + $0x5f0] sm:$0xff]  ;;  %v8258_v20 = vpack.c.bf16 %v5626_v45, %v5624_v42  ;;  %v5846_v45 = vld [vmem:[%s10988_s7 + $0x528] sm:$0xff] }
 0x485   : > { %8207 = vmatprep.subr.bf16.mxu0 %v8206_v10  ;;  %v6180_v10 = vld [vmem:[%s10988_s7 + $0x698] sm:$0xff]  ;;  %v8320_v23 = vpack.c.bf16 %v5964_v58, %v5962_v47  ;;  %v6395_v58 = vld [vmem:[%s10988_s7 + $0x780] sm:$0xff] }
 0x486   : > { %8285 = vmatpush1.bf16.msra.mxu1 %v8284_v22  ;;  %v5625_v22 = vld [vmem:[%s10988_s7 + $0x410] sm:$0xff]  ;;  %v8338_v37 = vpack.c.bf16 %v6180_v10, %v6178_v9  ;;  %v6400_v10 = vld [vmem:[%s10988_s7 + $0x7a8] sm:$0xff] }
 0x487   : > { %8287 = vmatprep.subr.bf16.mxu1 %v8286_v33  ;;  %v5630_v33 = vld [vmem:[%s10988_s7 + $0x438] sm:$0xff]  ;;  %v8260_v39 = vpack.c.bf16 %v5625_v22, %v5623_v21  ;;  %v5845_v22 = vld [vmem:[%s10988_s7 + $0x520] sm:$0xff] }
 0x488   : > { %8209 = vmatpush1.bf16.msra.mxu0 %v8208_v60  ;;  %v6179_v60 = vld [vmem:[%s10988_s7 + $0x690] sm:$0xff]  ;;  %v8262_v15 = vpack.c.bf16 %v5630_v33, %v5628_v32  ;;  %v5850_v33 = vld [vmem:[%s10988_s7 + $0x548] sm:$0xff] }
 0x489   : > { %8227 = vmatprep.subr.bf16.mxu0 %v8226_v8  ;;  %v6184_v8 = vld [vmem:[%s10988_s7 + $0x6b8] sm:$0xff]  ;;  %v8340_v40 = vpack.c.bf16 %v6179_v60, %v6177_v59  ;;  %v6193_v59 = vrot.slane %v10154_v55, 2 }
 0x48a   : > { %8289 = vmatpush1.bf16.msra.mxu1 %v8288_v17  ;;  %v5627_v17 = vld [vmem:[%s10988_s7 + $0x420] sm:$0xff]  ;;  %v8342_v35 = vpack.c.bf16 %v6184_v8, %v6182_v2  ;;  %v6401_v2 = vld [vmem:[%s10988_s7 + $0x7b0] sm:$0xff] }
 0x48b   : > { %7090 = vmatmul.mubr.msk.f32.vlgmr.msra.gmra.mrb[46].mxu0 %vm485_vm0, %v10100_v56  ;;  %8307 = vmatprep.subr.bf16.mxu1 %v8306_v41  ;;  %v5632_v41 = vld [vmem:[%s10988_s7 + $0x448] sm:$0xff]  ;;  %v5634_v56 = vld [vmem:[%s10988_s7 + $0x458] sm:$0xff]  ;;  %v8264_v34 = vpack.c.bf16 %v5629_v52, %v5627_v17  ;;  %v5849_v52 = vld [vmem:[%s10988_s7 + $0x540] sm:$0xff] }
 0x48c   : > { %8229 = vmatpush1.bf16.msra.mxu0 %v8228_v6  ;;  %5479 = vmatprep.mubr.f32.mxu0 %v11011_v1  ;;  %v6181_v6 = vld [vmem:[%s10988_s7 + $0x6a0] sm:$0xff]  ;;  %v8266_v48 = vpack.c.bf16 %v5634_v56, %v5632_v41  ;;  %v5854_v56 = vld [vmem:[%s10988_s7 + $0x568] sm:$0xff] }
 0x48d   : > { %7095 = vmatmul.mubr.msk.f32.vlgmr.msra.gmra.mrb[14].mxu1 %vm485_vm0, %v5748_v54  ;;  %8231 = vmatprep.subr.bf16.mxu0 %v8230_v36  ;;  %v6186_v36 = vld [vmem:[%s10988_s7 + $0x6c8] sm:$0xff]  ;;  %v8344_v53 = vpack.c.bf16 %v6183_v44, %v6181_v6  ;;  %v6403_v6 = vld [vmem:[%s10988_s7 + $0x7c0] sm:$0xff]  ;;  %v6405_v44 = vld [vmem:[%s10988_s7 + $0x7d0] sm:$0xff] }
 0x48e   : > { %8309 = vmatpush1.bf16.msra.mxu1 %v8308_v49  ;;  %6033 = vmatprep.mubr.f32.mxu1 %v11011_v1  ;;  %v5631_v49 = vld [vmem:[%s10988_s7 + $0x440] sm:$0xff]  ;;  %v5636_v54 = vld [vmem:[%s10988_s7 + $0x468] sm:$0xff]  ;;  %v8346_v61 = vpack.c.bf16 %v6188_v0, %v6186_v36  ;;  %v6410_v0 = vld [vmem:[%s10988_s7 + $0x7f8] sm:$0xff] }
 0x48f   : > { %8311 = vmatprep.subr.bf16.mxu1 %v8310_v57  ;;  %v5638_v57 = vld [vmem:[%s10988_s7 + $0x478] sm:$0xff]  ;;  %v8268_v4 = vpack.c.bf16 %v5633_v50, %v5631_v49  ;;  %v6408_v36 = vld [vmem:[%s10988_s7 + $0x7e8] sm:$0xff]  ;;  %v5853_v49 = vld [vmem:[%s10988_s7 + $0x560] sm:$0xff] }
 0x490   : > { %8233 = vmatpush1.bf16.msra.mxu0 %v8232_v3  ;;  %v6187_v3 = vld [vmem:[%s10988_s7 + $0x6d0] sm:$0xff]  ;;  %v8270_v12 = vpack.c.bf16 %v5638_v57, %v5636_v54  ;;  %v6069_v54 = vld [vmem:[%s10988_s7 + $0x608] sm:$0xff]  ;;  %v6071_v57 = vld [vmem:[%s10988_s7 + $0x618] sm:$0xff] }
 0x491   : > { %8235 = vmatprep.subr.bf16.mxu0 %v8234_v11  ;;  %v6192_v11 = vld [vmem:[%s10988_s7 + $0x6f8] sm:$0xff]  ;;  %v8348_v14 = vpack.c.bf16 %v6187_v3, %v6185_v63  ;;  %v5855_v50 = vld [vmem:[%s10988_s7 + $0x570] sm:$0xff]  ;;  %v6407_v63 = vld [vmem:[%s10988_s7 + $0x7e0] sm:$0xff] }
 0x492   : > { %8313 = vmatpush1.bf16.msra.mxu1 %v8312_v62  ;;  %v5637_v62 = vld [vmem:[%s10988_s7 + $0x470] sm:$0xff]  ;;  %v8350_v19 = vpack.c.bf16 %v6192_v11, %v6190_v5  ;;  %v8322_v5 = vpack.c.bf16 %v6071_v57, %v6069_v54  ;;  %v6068_v11 = vld [vmem:[%s10988_s7 + $0x600] sm:$0xff]  ;;  %v6524_v54 = vld [vmem:[%s10990_s9 + $0x98] sm:$0xff] }
 0x493   : > { %8315 = vmatprep.subr.bf16.mxu1 %v8314_v18  ;;  %v5844_v18 = vld [vmem:[%s10988_s7 + $0x518] sm:$0xff]  ;;  %v8272_v27 = vpack.c.bf16 %v5637_v62, %v5635_v13  ;;  %v6409_v3 = vld [vmem:[%s10988_s7 + $0x7f0] sm:$0xff]  ;;  %v6073_v62 = vld [vmem:[%s10988_s7 + $0x628] sm:$0xff] }
 0x494   : > { %8237 = vmatpush1.bf16.msra.mxu0 %v8236_v26  ;;  %v6191_v26 = vld [vmem:[%s10988_s7 + $0x6f0] sm:$0xff]  ;;  %v8290_v30 = vpack.c.bf16 %v5844_v18, %v5842_v16  ;;  %v8384_v13 = vpack.c.bf16 %v6409_v3, %v6407_v63  ;;  %v5857_v18 = vrot.slane %v10128_v24, 4  ;;  %v6508_v63 = vld [vmem:[%s10990_s9 + $0x18] sm:$0xff] }
 0x495   : > { %8239 = vmatprep.subr.bf16.mxu0 %v8238_v29  ;;  %v6398_v29 = vld [vmem:[%s10988_s7 + $0x798] sm:$0xff]  ;;  %v8352_v42 = vpack.c.bf16 %v6191_v26, %v6189_v25  ;;  %v6072_v25 = vld [vmem:[%s10988_s7 + $0x620] sm:$0xff]  ;;  %v6074_v26 = vld [vmem:[%s10988_s7 + $0x630] sm:$0xff] }
 0x496   : > { %8317 = vmatpush1.bf16.msra.mxu1 %v8316_v38  ;;  %v5843_v38 = vld [vmem:[%s10988_s7 + $0x510] sm:$0xff]  ;;  %v8370_v47 = vpack.c.bf16 %v6398_v29, %v6396_v28  ;;  %v6079_v28 = vld [vmem:[%s10988_s7 + $0x658] sm:$0xff]  ;;  %v8328_v29 = vpack.c.bf16 %v6074_v26, %v6072_v25 }
 0x497   : > { %8319 = vmatprep.subr.bf16.mxu1 %v8318_v46  ;;  %v5848_v46 = vld [vmem:[%s10988_s7 + $0x538] sm:$0xff]  ;;  %v8292_v9 = vpack.c.bf16 %v5843_v38, %v5841_v31  ;;  %v6076_v31 = vld [vmem:[%s10988_s7 + $0x640] sm:$0xff]  ;;  %v6078_v38 = vld [vmem:[%s10988_s7 + $0x650] sm:$0xff] }
 0x498   : > { %8241 = vmatpush1.bf16.msra.mxu0 %v8240_v7  ;;  %v6397_v7 = vld [vmem:[%s10988_s7 + $0x790] sm:$0xff]  ;;  %v8294_v21 = vpack.c.bf16 %v5848_v46, %v5846_v45  ;;  %v6083_v45 = vld [vmem:[%s10988_s7 + $0x678] sm:$0xff]  ;;  %v8332_v46 = vpack.c.bf16 %v6078_v38, %v6076_v31 }
 0x499   : > { %8259 = vmatprep.subr.bf16.mxu0 %v8258_v20  ;;  %v6402_v20 = vld [vmem:[%s10988_s7 + $0x7b8] sm:$0xff]  ;;  %v8372_v32 = vpack.c.bf16 %v6397_v7, %v6395_v58  ;;  %v6080_v58 = vld [vmem:[%s10988_s7 + $0x660] sm:$0xff]  ;;  %v6082_v7 = vld [vmem:[%s10988_s7 + $0x670] sm:$0xff] }
 0x49a   : > { %8321 = vmatpush1.bf16.msra.mxu1 %v8320_v23  ;;  %v5847_v23 = vld [vmem:[%s10988_s7 + $0x530] sm:$0xff]  ;;  %v8374_v60 = vpack.c.bf16 %v6402_v20, %v6400_v10  ;;  %v6289_v10 = vld [vmem:[%s10988_s7 + $0x718] sm:$0xff]  ;;  %v8336_v20 = vpack.c.bf16 %v6082_v7, %v6080_v58  ;;  %v4829_v58 = vlaneseq }
 0x49b   : > { %7092 = vmatmul.mubr.msk.f32.vlgmr.msra.gmra.mrb[48].mxu0 %vm485_vm0, %v5412_v51  ;;  %8339 = vmatprep.subr.bf16.mxu1 %v8338_v37  ;;  %v5852_v37 = vld [vmem:[%s10988_s7 + $0x558] sm:$0xff]  ;;  %v8296_v8 = vpack.c.bf16 %v5847_v23, %v5845_v22  ;;  %v6404_v51 = vld [vmem:[%s10988_s7 + $0x7c8] sm:$0xff]  ;;  %v6286_v22 = vld [vmem:[%s10988_s7 + $0x700] sm:$0xff] }
 0x49c   : > { %8261 = vmatpush1.bf16.msra.mxu0 %v8260_v39  ;;  %5706 = vmatprep.mubr.f32.mxu0 %v11011_v1  ;;  %v6399_v39 = vld [vmem:[%s10988_s7 + $0x7a0] sm:$0xff]  ;;  %v8298_v17 = vpack.c.bf16 %v5852_v37, %v5850_v33  ;;  %v6288_v23 = vld [vmem:[%s10988_s7 + $0x710] sm:$0xff]  ;;  %v6293_v33 = vld [vmem:[%s10988_s7 + $0x738] sm:$0xff] }
 0x49d   : > { %7097 = vmatmul.mubr.msk.f32.vlgmr.msra.gmra.mrb[16].mxu1 %vm485_vm0, %v5966_v43  ;;  %8263 = vmatprep.subr.bf16.mxu0 %v8262_v15  ;;  %v6406_v15 = vld [vmem:[%s10988_s7 + $0x7d8] sm:$0xff]  ;;  %v8376_v41 = vpack.c.bf16 %v6401_v2, %v6399_v39  ;;  %v8356_v37 = vpack.c.bf16 %v6288_v23, %v6286_v22  ;;  %v6292_v39 = vld [vmem:[%s10988_s7 + $0x730] sm:$0xff]  ;;  %v6295_v2 = vld [vmem:[%s10988_s7 + $0x748] sm:$0xff] }
 0x49e   : > { %8341 = vmatpush1.bf16.msra.mxu1 %v8340_v40  ;;  %6260 = vmatprep.mubr.f32.mxu1 %v11011_v1  ;;  %v5851_v40 = vld [vmem:[%s10988_s7 + $0x550] sm:$0xff]  ;;  %v5856_v43 = vld [vmem:[%s10988_s7 + $0x578] sm:$0xff] }
 0x49f   : > { %8343 = vmatprep.subr.bf16.mxu1 %v8342_v35  ;;  %v8378_v35 = vpack.c.bf16 %v6406_v15, %v6404_v51  ;;  %v6512_v25 = vld [vmem:[%s10990_s9 + $0x38] sm:$0xff]  ;;  %v6515_v22 = vld [vmem:[%s10990_s9 + $0x50] sm:$0xff] }
 0x4a0   : > { %8265 = vmatpush1.bf16.msra.mxu0 %v8264_v34  ;;  %v8300_v34 = vpack.c.bf16 %v5851_v40, %v5849_v52  ;;  %v6296_v52 = vld [vmem:[%s10988_s7 + $0x750] sm:$0xff]  ;;  %v6299_v40 = vld [vmem:[%s10988_s7 + $0x768] sm:$0xff]  ;;  %v6516_v23 = vld [vmem:[%s10990_s9 + $0x58] sm:$0xff] }
 0x4a1   : > { %8267 = vmatprep.subr.bf16.mxu0 %v8266_v48  ;;  %v8302_v48 = vpack.c.bf16 %v5856_v43, %v5854_v56 }
 0x4a2   : > { %8345 = vmatpush1.bf16.msra.mxu1 %v8344_v53  ;;  %v8380_v53 = vpack.c.bf16 %v6405_v44, %v6403_v6  ;;  %v6300_v6 = vld [vmem:[%s10988_s7 + $0x770] sm:$0xff] }
 0x4a3   : > { %8347 = vmatprep.subr.bf16.mxu1 %v8346_v61  ;;  %v8382_v61 = vpack.c.bf16 %v6410_v0, %v6408_v36  ;;  %v6521_v36 = vld [vmem:[%s10990_s9 + $0x80] sm:$0xff]  ;;  %v6522_v0 = vld [vmem:[%s10990_s9 + $0x88] sm:$0xff] }
 0x4a4   : > { %8269 = vmatpush1.bf16.msra.mxu0 %v8268_v4  ;;  %v8304_v4 = vpack.c.bf16 %v5855_v50, %v5853_v49  ;;  %v6505_v49 = vld [vmem:[%s10990_s9] sm:$0xff]  ;;  %v6506_v50 = vld [vmem:[%s10990_s9 + $0x8] sm:$0xff] }
 0x4a5   : > { %8271 = vmatprep.subr.bf16.mxu0 %v8270_v12  ;;  %v6070_v12 = vld [vmem:[%s10988_s7 + $0x610] sm:$0xff] }
 0x4a6   : > { %8349 = vmatpush1.bf16.msra.mxu1 %v8348_v14  ;;  %v6075_v14 = vld [vmem:[%s10988_s7 + $0x638] sm:$0xff]  ;;  %v8324_v16 = vpack.c.bf16 %v6070_v12, %v6068_v11  ;;  %v6509_v12 = vld [vmem:[%s10990_s9 + $0x20] sm:$0xff] }
 0x4a7   : > { %8351 = vmatprep.subr.bf16.mxu1 %v8350_v19  ;;  %v8326_v19 = vpack.c.bf16 %v6075_v14, %v6073_v62  ;;  %v6527_v14 = vld [vmem:[%s10990_s9 + $0xb0] sm:$0xff] }
 0x4a8   : > { %8273 = vmatpush1.bf16.msra.mxu0 %v8272_v27  ;;  %v6077_v27 = vld [vmem:[%s10988_s7 + $0x648] sm:$0xff] }
 0x4a9   : > { %8291 = vmatprep.subr.bf16.mxu0 %v8290_v30  ;;  %v8330_v30 = vpack.c.bf16 %v6079_v28, %v6077_v27  ;;  %v6529_v27 = vld [vmem:[%s10990_s9 + $0xc0] sm:$0xff]  ;;  %v6530_v28 = vld [vmem:[%s10990_s9 + $0xc8] sm:$0xff] }
 0x4aa   : > { %8353 = vmatpush1.bf16.msra.mxu1 %v8352_v42  ;;  %v6081_v42 = vld [vmem:[%s10988_s7 + $0x668] sm:$0xff] }
 0x4ab   : > { %7094 = vmatmul.mubr.msk.f32.vlgmr.msra.gmra.mrb[50].mxu0 %vm485_vm0, %v10128_v24  ;;  %8371 = vmatprep.subr.bf16.mxu1 %v8370_v47  ;;  %v6411_v24 = vrot.slane %v10154_v55, 6  ;;  %v8334_v47 = vpack.c.bf16 %v6083_v45, %v6081_v42 }
 0x4ac   : > { %8293 = vmatpush1.bf16.msra.mxu0 %v8292_v9  ;;  %5924 = vmatprep.mubr.f32.mxu0 %v11011_v1  ;;  %v6287_v9 = vld [vmem:[%s10988_s7 + $0x708] sm:$0xff] }
 0x4ad   : > { %7099 = vmatmul.mubr.msk.f32.vlgmr.msra.gmra.mrb[18].mxu1 %vm485_vm0, %v6193_v59  ;;  %8295 = vmatprep.subr.bf16.mxu0 %v8294_v21  ;;  %v8354_v21 = vpack.c.bf16 %v6289_v10, %v6287_v9  ;;  %v6531_v9 = vld [vmem:[%s10990_s9 + $0xd0] sm:$0xff]  ;;  %v6532_v10 = vld [vmem:[%s10990_s9 + $0xd8] sm:$0xff] }
 0x4ae   : > { %8373 = vmatpush1.bf16.msra.mxu1 %v8372_v32  ;;  %6478 = vmatprep.mubr.f32.mxu1 %v11011_v1  ;;  %v6291_v32 = vld [vmem:[%s10988_s7 + $0x728] sm:$0xff] }
 0x4af   : > { %8375 = vmatprep.subr.bf16.mxu1 %v8374_v60  ;;  %v8358_v59 = vpack.c.bf16 %v6293_v33, %v6291_v32  ;;  %v6290_v60 = vld [vmem:[%s10988_s7 + $0x720] sm:$0xff]  ;;  %v8408_v33 = vpack.c.bf16 %v6516_v23, %v6515_v22 }
 0x4b0   : > { %8297 = vmatpush1.bf16.msra.mxu0 %v8296_v8  ;;  %v6297_v8 = vld [vmem:[%s10988_s7 + $0x758] sm:$0xff]  ;;  %v8360_v51 = vpack.c.bf16 %v6292_v39, %v6290_v60  ;;  %v6533_v60 = vld [vmem:[%s10990_s9 + $0xe0] sm:$0xff]  ;;  %v6534_v39 = vld [vmem:[%s10990_s9 + $0xe8] sm:$0xff] }
 0x4b1   : > { %8299 = vmatprep.subr.bf16.mxu0 %v8298_v17  ;;  %v8362_v15 = vpack.c.bf16 %v6297_v8, %v6295_v2  ;;  %v6294_v17 = vld [vmem:[%s10988_s7 + $0x740] sm:$0xff]  ;;  %v8410_v2 = vpack.c.bf16 %v6534_v39, %v6533_v60 }
 0x4b2   : > { %8377 = vmatpush1.bf16.msra.mxu1 %v8376_v41  ;;  %v6301_v41 = vld [vmem:[%s10988_s7 + $0x778] sm:$0xff]  ;;  %v8364_v56 = vpack.c.bf16 %v6296_v52, %v6294_v17  ;;  %v6517_v8 = vld [vmem:[%s10990_s9 + $0x60] sm:$0xff]  ;;  %v6535_v17 = vld [vmem:[%s10990_s9 + $0xf0] sm:$0xff] }
 0x4b3   : > { %8379 = vmatprep.subr.bf16.mxu1 %v8378_v35  ;;  %v8366_v43 = vpack.c.bf16 %v6301_v41, %v6299_v40  ;;  %v6298_v35 = vld [vmem:[%s10988_s7 + $0x760] sm:$0xff]  ;;  %v6536_v52 = vld [vmem:[%s10990_s9 + $0xf8] sm:$0xff]  ;;  %v6519_v40 = vld [vmem:[%s10990_s9 + $0x70] sm:$0xff] }
 0x4b4   : > { %8301 = vmatpush1.bf16.msra.mxu0 %v8300_v34  ;;  %v8368_v44 = vpack.c.bf16 %v6300_v6, %v6298_v35  ;;  %v6302_v34 = vrot.slane %v10154_v55, 4  ;;  %v8414_v41 = vpack.c.bf16 %v6536_v52, %v6535_v17 }
 0x4b5   : > { %8303 = vmatprep.subr.bf16.mxu0 %v8302_v48  ;;  %v8386_v48 = vpack.c.bf16 %v6522_v0, %v6521_v36  ;;  %v6620_v36 = vld [vmem:[%s10992_s11] sm:$0xff]  ;;  %v6621_v0 = vld [vmem:[%s10992_s11 + $0x8] sm:$0xff] }
 0x4b6   : > { %8381 = vmatpush1.bf16.msra.mxu1 %v8380_v53  ;;  %v6523_v53 = vld [vmem:[%s10990_s9 + $0x90] sm:$0xff] }
 0x4b7   : > { %8383 = vmatprep.subr.bf16.mxu1 %v8382_v61  ;;  %v8390_v57 = vpack.c.bf16 %v6524_v54, %v6523_v53  ;;  %v6507_v61 = vld [vmem:[%s10990_s9 + $0x10] sm:$0xff]  ;;  %v8727_v53 = vmov 0.0|0.0   ;;  %v8419_v54 = vpack.c.bf16 %v6621_v0, %v6620_v36 }
 0x4b8   : > { %8305 = vmatpush1.bf16.msra.mxu0 %v8304_v4  ;;  %v8392_v3 = vpack.c.bf16 %v6508_v63, %v6507_v61  ;;  %v6525_v4 = vld [vmem:[%s10990_s9 + $0xa0] sm:$0xff] }
 0x4b9   : > { %8323 = vmatprep.subr.bf16.mxu0 %v8322_v5  ;;  %v6526_v5 = vld [vmem:[%s10990_s9 + $0xa8] sm:$0xff]  ;;  %v4723_v61 = vld [vmem:[%s10989_s8] sm:$0x3] }
 0x4ba   : > { %8385 = vmatpush1.bf16.msra.mxu1 %v8384_v13  ;;  %v8394_v11 = vpack.c.bf16 %v6526_v5, %v6525_v4  ;;  %v6510_v13 = vld [vmem:[%s10990_s9 + $0x28] sm:$0xff] }
 0x4bb   : > { %7096 = vmatmul.mubr.msk.f32.vlgmr.msra.gmra.mrb[52].mxu0 %vm485_vm0, %v5857_v18  ;;  %v8396_v62 = vpack.c.bf16 %v6510_v13, %v6509_v12  ;;  %v6511_v18 = vld [vmem:[%s10990_s9 + $0x30] sm:$0xff]  ;;  %8418 = vmatprep.subr.bf16.mxu1 %v8727_v53 }
 0x4bc   : > { %8325 = vmatpush1.bf16.msra.mxu0 %v8324_v16  ;;  %6151 = vmatprep.mubr.f32.mxu0 %v11011_v1  ;;  %v6528_v16 = vld [vmem:[%s10990_s9 + $0xb8] sm:$0xff]  ;;  %v8400_v26 = vpack.c.bf16 %v6512_v25, %v6511_v18 }
 0x4bd   : > { %7101 = vmatmul.mubr.msk.f32.vlgmr.msra.gmra.mrb[20].mxu1 %vm485_vm0, %v6411_v24  ;;  %8327 = vmatprep.subr.bf16.mxu0 %v8326_v19  ;;  %v8398_v19 = vpack.c.bf16 %v6528_v16, %v6527_v14  ;;  %v8402_v24 = vpack.c.bf16 %v6530_v28, %v6529_v27 }
 0x4be   : > { %8420 = vmatpush3.bf16.msra.mxu1 %v8419_v54  ;;  %7975 = vmatprep.mubr.msk.f32.mxu1 %vm8728_vm5, %v11011_v1 }
 0x4bf   : > { %8421 = vmatprep.subr.bf16.mxu1 %v8727_v53 }
 0x4c0   : > { %8329 = vmatpush1.bf16.msra.mxu0 %v8328_v29  ;;  %v6513_v29 = vld [vmem:[%s10990_s9 + $0x40] sm:$0xff] }
 0x4c1   : > { %8331 = vmatprep.subr.bf16.mxu0 %v8330_v30  ;;  %v6514_v30 = vld [vmem:[%s10990_s9 + $0x48] sm:$0xff] }
 0x4c2   : > { %v8404_v38 = vpack.c.bf16 %v6514_v30, %v6513_v29 }
 0x4c4   : > { %8333 = vmatpush1.bf16.msra.mxu0 %v8332_v46  ;;  %v8726_v46 = vmov 1966171168  }
 0x4c5   : > { %8335 = vmatprep.subr.bf16.mxu0 %v8334_v47  ;;  %v4827_v47 = vunpack.c.l.s4 %v8726_v46 }
 0x4c8   : > { %8337 = vmatpush1.bf16.msra.mxu0 %v8336_v20 }
 0x4c9   : > { %8355 = vmatprep.subr.bf16.mxu0 %v8354_v21  ;;  %v8406_v21 = vpack.c.bf16 %v6532_v10, %v6531_v9 }
 0x4cb   : > { %7098 = vmatmul.mubr.msk.f32.vlgmr.msra.gmra.mrb[54].mxu0 %vm485_vm0, %v10154_v55  ;;  %v8388_v55 = vpack.c.bf16 %v6506_v50, %v6505_v49 }
 0x4cc   : > { %8357 = vmatpush1.bf16.msra.mxu0 %v8356_v37  ;;  %6369 = vmatprep.mubr.f32.mxu0 %v11011_v1  ;;  %v4828_v37 = vunpack.c.0.s8 %v4827_v47 }
 0x4cd   : > { %8359 = vmatprep.subr.bf16.mxu0 %v8358_v59  ;;  %v10832_v59 = vshrl.u32 %v4829_v58, 7 }
 0x4d0   : > { %8361 = vmatpush1.bf16.msra.mxu0 %v8360_v51  ;;  %v6518_v51 = vld [vmem:[%s10990_s9 + $0x68] sm:$0xff] }
 0x4d1   : > { %8363 = vmatprep.subr.bf16.mxu0 %v8362_v15  ;;  %v8412_v15 = vpack.c.bf16 %v6518_v51, %v6517_v8 }
 0x4d4   : > { %8365 = vmatpush1.bf16.msra.mxu0 %v8364_v56  ;;  %v6520_v56 = vld [vmem:[%s10990_s9 + $0x78] sm:$0xff] }
 0x4d5   : > { %8367 = vmatprep.subr.bf16.mxu0 %v8366_v43  ;;  %v10859_v43 = vsub.s32 %v4828_v37, %v10832_v59  ;;  %v8416_v35 = vpack.c.bf16 %v6520_v56, %v6519_v40 }
 0x4d8   : > { %8369 = vmatpush1.bf16.msra.mxu0 %v8368_v44 }
 0x4d9   : > { %8387 = vmatprep.subr.bf16.mxu0 %v8386_v48  ;;  %v6622_v48 = vld [vmem:[%s10992_s11 + $0x10] sm:$0xff] }
 0x4db   : > { %7100 = vmatmul.mubr.msk.f32.vlgmr.msra.gmra.mrb[56].mxu0 %vm485_vm0, %v6302_v34 }
 0x4dc   : > { %8389 = vmatpush3.bf16.msra.mxu0 %v8388_v55 }
 0x4dd   : > { %8391 = vmatprep.subr.bf16.mxu0 %v8390_v57  ;;  %v6623_v57 = vld [vmem:[%s10992_s11 + $0x18] sm:$0xff] }
 0x4de   : > { %v8422_v5 = vpack.c.bf16 %v6623_v57, %v6622_v48 }
 0x4e0   : > { %8393 = vmatpush3.bf16.msra.mxu0 %v8392_v3  ;;  %8423 = vmatpush3.bf16.msra.mxu1 %v8422_v5 }
 0x4e1   : > { %8395 = vmatprep.subr.bf16.mxu0 %v8394_v11  ;;  %8424 = vmatprep.subr.bf16.mxu1 %v8727_v53 }
 0x4e4   : > { %8397 = vmatpush3.bf16.msra.mxu0 %v8396_v62 }
 0x4e5   : > { %8399 = vmatprep.subr.bf16.mxu0 %v8398_v19 }
 0x4e8   : > { %8401 = vmatpush3.bf16.msra.mxu0 %v8400_v26 }
 0x4e9   : > { %8403 = vmatprep.subr.bf16.mxu0 %v8402_v24 }
 0x4ec   : > { %8405 = vmatpush3.bf16.msra.mxu0 %v8404_v38 }
 0x4ed   : > { %8407 = vmatprep.subr.bf16.mxu0 %v8406_v21 }
 0x4f0   : > { %8409 = vmatpush3.bf16.msra.mxu0 %v8408_v33 }
 0x4f1   : > { %8411 = vmatprep.subr.bf16.mxu0 %v8410_v2 }
 0x4f4   : > { %8413 = vmatpush3.bf16.msra.mxu0 %v8412_v15 }
 0x4f5   : > { %8415 = vmatprep.subr.bf16.mxu0 %v8414_v41 }
 0x4f8   : > { %8417 = vmatpush3.bf16.msra.mxu0 %v8416_v35 }
 0x52e   : > { %v4818_v31 = vpop.f32.mrb[40].mxu0 }
 0x52f   : > { %v4820_v42 = vpop.f32.mrb[41].mxu0 }
 0x530   : > { %v4825_v45 = vcombine.low %v4818_v31, %v4820_v42  ;;  %v5145_v7 = vpop.f32.mrb[8].mxu1 }
 0x531   : > { %v5147_v20 = vpop.f32.mrb[9].mxu1 }
 0x532   : > { %v5152_v32 = vcombine.low %v5145_v7, %v5147_v20  ;;  %v4832_v6 = vrot.slane %v4825_v45, %v10859_v43 }
 0x534   : > { %v4839_v49 = vrot.slane %v4832_v6, %v10859_v43  ;;  %v5159_v25 = vrot.slane %v5152_v32, %v10859_v43 }
 0x536   : > { %v4841_v11 = vadd.f32 %v4839_v49, %v4723_v61  ;;  %v5166_v24 = vrot.slane %v5159_v25, %v10859_v43 }
 0x53e   : > { %v4927_v44 = vpop.f32.mrb[42].mxu0 }
 0x53f   : > { %v4929_v34 = vpop.f32.mrb[43].mxu0 }
 0x540   : > { %v4934_v50 = vcombine.low %v4927_v44, %v4929_v34  ;;  %v5372_v55 = vpop.f32.mrb[10].mxu1 }
 0x541   : > { %v5374_v63 = vpop.f32.mrb[11].mxu1 }
 0x542   : > { %v4941_v3 = vrot.slane %v4934_v50, %v10859_v43  ;;  %v5379_v4 = vcombine.low %v5372_v55, %v5374_v63 }
 0x544   : > { %v4948_v12 = vrot.slane %v4941_v3, %v10859_v43  ;;  %v5386_v47 = vrot.slane %v5379_v4, %v10859_v43 }
 0x546   : > { %v4950_v13 = vadd.f32 %v4948_v12, %v4841_v11  ;;  %v5393_v10 = vrot.slane %v5386_v47, %v10859_v43 }
 0x54e   : > { %v5036_v62 = vpop.f32.mrb[44].mxu0 }
 0x54f   : > { %v5038_v14 = vpop.f32.mrb[45].mxu0 }
 0x550   : > { %v5043_v16 = vcombine.low %v5036_v62, %v5038_v14  ;;  %v5590_v18 = vpop.f32.mrb[12].mxu1 }
 0x551   : > { %v5592_v19 = vpop.f32.mrb[13].mxu1 }
 0x552   : > { %v5050_v26 = vrot.slane %v5043_v16, %v10859_v43  ;;  %v5597_v27 = vcombine.low %v5590_v18, %v5592_v19 }
 0x554   : > { %v5057_v28 = vrot.slane %v5050_v26, %v10859_v43  ;;  %v5604_v60 = vrot.slane %v5597_v27, %v10859_v43 }
 0x556   : > { %v5059_v29 = vadd.f32 %v5057_v28, %v4950_v13  ;;  %v5611_v51 = vrot.slane %v5604_v60, %v10859_v43 }
 0x558   : > { %v5168_v30 = vadd.f32 %v5166_v24, %v5059_v29 }
 0x55e   : > { %v5263_v31 = vpop.f32.mrb[46].mxu0 }
 0x55f   : > { %v5265_v38 = vpop.f32.mrb[47].mxu0 }
 0x560   : > { %v5270_v42 = vcombine.low %v5263_v31, %v5265_v38  ;;  %v5817_v45 = vpop.f32.mrb[14].mxu1 }
 0x561   : > { %v5819_v46 = vpop.f32.mrb[15].mxu1 }
 0x562   : > { %v5277_v58 = vrot.slane %v5270_v42, %v10859_v43  ;;  %v5824_v7 = vcombine.low %v5817_v45, %v5819_v46 }
 0x564   : > { %v5284_v9 = vrot.slane %v5277_v58, %v10859_v43  ;;  %v5831_v6 = vrot.slane %v5824_v7, %v10859_v43  ;;  %v6545_v58 = vsub.s32 1, %v10832_v59  ;;  %v6541_v7 = vsub.s32 0, %v10832_v59  ;;  %v6626_v59 = vld [vmem:[%s10992_s11 + $0x30] sm:$0xff] }
 0x566   : > { %v5286_v20 = vadd.f32 %v5284_v9, %v5168_v30  ;;  %v5838_v0 = vrot.slane %v5831_v6, %v10859_v43 }
 0x568   : > { %v5395_v21 = vadd.f32 %v5393_v10, %v5286_v20 }
 0x56e   : > { %v5481_v22 = vpop.f32.mrb[48].mxu0 }
 0x56f   : > { %v5483_v23 = vpop.f32.mrb[49].mxu0 }
 0x570   : > { %v5488_v32 = vcombine.low %v5481_v22, %v5483_v23  ;;  %v6035_v33 = vpop.f32.mrb[16].mxu1  ;;  %v6625_v22 = vld [vmem:[%s10992_s11 + $0x28] sm:$0xff]  ;;  %v6627_v23 = vld [vmem:[%s10992_s11 + $0x38] sm:$0xff] }
 0x571   : > { %v6037_v37 = vpop.f32.mrb[17].mxu1 }
 0x572   : > { %v5495_v39 = vrot.slane %v5488_v32, %v10859_v43  ;;  %v6042_v2 = vcombine.low %v6035_v33, %v6037_v37  ;;  %v8428_v32 = vpack.c.bf16 %v6627_v23, %v6626_v59  ;;  %v6537_v37 = vld [vmem:[%s10991_s10] sm:$0x1] }
 0x574   : > { %v5502_v8 = vrot.slane %v5495_v39, %v10859_v43  ;;  %v6049_v63 = vrot.slane %v6042_v2, %v10859_v43 }
 0x576   : > { %v5504_v15 = vadd.f32 %v5502_v8, %v5395_v21  ;;  %v6056_v11 = vrot.slane %v6049_v63, %v10859_v43  ;;  %v6624_v21 = vld [vmem:[%s10992_s11 + $0x20] sm:$0xff] }
 0x577   : > { %v6628_v8 = vld [vmem:[%s10993_s12] sm:$0x1] }
 0x578   : > { %v5613_v17 = vadd.f32 %v5611_v51, %v5504_v15 }
 0x57e   : > { %v5708_v52 = vpop.f32.mrb[50].mxu0 }
 0x57f   : > { %v5710_v40 = vpop.f32.mrb[51].mxu0 }
 0x580   : > { %v5715_v41 = vcombine.low %v5708_v52, %v5710_v40  ;;  %v6262_v56 = vpop.f32.mrb[18].mxu1 }
 0x581   : > { %v6264_v35 = vpop.f32.mrb[19].mxu1 }
 0x582   : > { %v5722_v44 = vrot.slane %v5715_v41, %v10859_v43  ;;  %v6269_v34 = vcombine.low %v6262_v56, %v6264_v35 }
 0x584   : > { %v5729_v36 = vrot.slane %v5722_v44, %v10859_v43  ;;  %v6276_v18 = vrot.slane %v6269_v34, %v10859_v43 }
 0x586   : > { %v5731_v48 = vadd.f32 %v5729_v36, %v5613_v17  ;;  %v6283_v26 = vrot.slane %v6276_v18, %v10859_v43 }
 0x588   : > { %v5840_v49 = vadd.f32 %v5838_v0, %v5731_v48 }
 0x58e   : > { %v5926_v50 = vpop.f32.mrb[52].mxu0 }
 0x58f   : > { %v5928_v55 = vpop.f32.mrb[53].mxu0 }
 0x590   : > { %v5933_v54 = vcombine.low %v5926_v50, %v5928_v55  ;;  %v6480_v57 = vpop.f32.mrb[20].mxu1 }
 0x591   : > { %v6482_v61 = vpop.f32.mrb[21].mxu1 }
 0x592   : > { %v5940_v3 = vrot.slane %v5933_v54, %v10859_v43  ;;  %v6487_v4 = vcombine.low %v6480_v57, %v6482_v61 }
 0x594   : > { %v5947_v5 = vrot.slane %v5940_v3, %v10859_v43  ;;  %v6494_v31 = vrot.slane %v6487_v4, %v10859_v43 }
 0x596   : > { %v5949_v12 = vadd.f32 %v5947_v5, %v5840_v49  ;;  %v6501_v45 = vrot.slane %v6494_v31, %v10859_v43 }
 0x598   : > { %v6058_v13 = vadd.f32 %v6056_v11, %v5949_v12 }
 0x59e   : > { %v6153_v62 = vpop.f32.mrb[54].mxu0 }
 0x59f   : > { %v6155_v14 = vpop.f32.mrb[55].mxu0 }
 0x5a0   : > { %v6160_v16 = vcombine.low %v6153_v62, %v6155_v14 }
 0x5a2   : > { %v6167_v19 = vrot.slane %v6160_v16, %v10859_v43 }
 0x5a4   : > { %v6174_v25 = vrot.slane %v6167_v19, %v10859_v43 }
 0x5a6   : > { %v6176_v27 = vadd.f32 %v6174_v25, %v6058_v13 }
 0x5a8   : > { %v6285_v28 = vadd.f32 %v6283_v26, %v6176_v27 }
 0x5ae   : > { %v6371_v24 = vpop.f32.mrb[56].mxu0 }
 0x5af   : > { %v6373_v29 = vpop.f32.mrb[57].mxu0 }
 0x5b0   : > { %v6378_v30 = vcombine.low %v6371_v24, %v6373_v29 }
 0x5b2   : > { %v6385_v38 = vrot.slane %v6378_v30, %v10859_v43 }
 0x5b4   : > { %v6392_v42 = vrot.slane %v6385_v38, %v10859_v43  ;;  %v8425_v43 = vpack.c.bf16 %v6625_v22, %v6624_v21 }
 0x5b6   : > { %v6394_v46 = vadd.f32 %v6392_v42, %v6285_v28  ;;  %8426 = vmatpush3.bf16.msra.mxu1 %v8425_v43 }
 0x5b7   : > { %8427 = vmatprep.subr.bf16.mxu1 %v8727_v53 }
 0x5b8   : > { %v6503_v47 = vadd.f32 %v6501_v45, %v6394_v46 }
 0x5ba   : > { %v6504_v9 = vmax.f32 %v6503_v47, 0.0  ;;  %8429 = vmatpush3.bf16.msra.mxu1 %v8428_v32 }
 0x5bc   : > { %v6546_v10 = vrot.slane %v6504_v9, %v6545_v58  ;;  %v6542_v20 = vrot.slane %v6504_v9, %v6541_v7 }
 0x5be   : > { %6613 = vmatprep.mubr.f32.mxu0 %v6546_v10 }
 0x5bf   : > { %6614 = vmatmul.mubr.f32.vlgmr.msra.gmra.mrb[58].mxu0 %v6542_v20 }
 0x692   : > { %v7447_v33 = vpop.f32.mrb[58].mxu0 }
 0x693   : > { %v7448_v60 = vpop.f32.mrb[59].mxu0 }
 0x694   : > { %v7449_v53 = vadd.f32 %v7448_v60, %v7447_v33 }
 0x696   : > { %v6616_v39 = vadd.f32 %v7449_v53, %v6537_v37 }
 0x698   : > { %v6619_v2 = vmax.f32 %v6616_v39, 0.0 }
 0x69a   : > { %7976 = vmatmul.mubr.msk.f32.vlgmr.msra.gmra.mrb[22].mxu1 %vm485_vm0, %v6619_v2 }
 0x76d   : > { %v6698_v51 = vpop.f32.mrb[22].mxu1 }
 0x76e   : > { %v6699_v1 = vadd.f32 %v6698_v51, %v6628_v8  ;;  %v7977_v15 = vpop.f32.mrb[23].mxu1 }
 0x770   : > { %v6703_v17 = vsel %vm6702_vm6, %v6699_v1, -inf }
 0x771   : > { %6704 = vmax.xlane.f32.xlu0 %v6703_v17 }
 0x7fe   : > { %v6705_v52 = vpop.xlane.xlu0 %6704 }
 0x7ff   : > { %v6706_v40 = vsub.f32 %v6699_v1, %v6705_v52 }
 0x801   : > { %v6707_v41 = vmul.f32 1.442695, %v6706_v40 }
 0x803   : > { %8657 = vpow2.f32 %v6707_v41 }
 0x80d   : > { %v8658_v56 = vpop.eup %8657 }
 0x80e   : > { %v6709_v35 = vsel %vm6702_vm6, %v8658_v56, 0.0 }
 0x80f   : > { %6710 = vadd.xlane.f32.xlu0 %v6709_v35 }
 0x89c   : > { %v6711_v6 = vpop.xlane.xlu0 %6710 }
 0x89d   : > { %8659 = vrcp.f32 %v6711_v6 }
 0x8a7   : > { %v8660_v44 = vpop.eup %8659 }
 0x8a8   : > { %v6713_v34 = vmul.f32 %v8660_v44, %v8658_v56 }
 0x8aa   : > { %6714 = vst [vmem:[%s432_s24] sm:$0x1] %v6713_v34 }
 0x8ab   : > { %8674 = shalt.err (!%p8671_p3)
}
 0x8ac   : > { %s8675_s22 = scalar_lea.hbm %s10939_s27, 16  ;;  %s8679_s15 = scalar_lea.hbm %s10994_s13, 32 }
 0x8ad   : > { %p8676_p4 = scmp.ne.s32.totalorder %s10939_s27, %s8675_s22  ;;  %p8680_p9 = scmp.lt.u32.totalorder %s10939_s27, %s10994_s13 }
 0x8ae   : > { %p8681_p10 = scmp.lt.u32.totalorder %s8679_s15, %s8675_s22  ;;  %p8683_p12 = scmp.lt.u32.totalorder %s8675_s22, %s10939_s27 }
 0x8af   : > { %p8677_p7 = pnand %p8676_p4, %p8838_p5 }
 0x8b0   : > { %p8682_p11 = por %p8681_p10, %p8680_p9 }
 0x8b1   : > { %p8678_p8 = pneg %p8677_p7 }
 0x8b2   : > { %p8684_p13 = por %p8683_p12, %p8682_p11 }
 0x8b4   : > { %p8685_p0 = pnand %p8684_p13, %p8678_p8 }
 0x8b6   : > { %8688 = shalt.err (!%p8685_p0)
}
 0x8b7   : > { %8614 = dma.vmem_to_hbm [thread:$0]  (%p8838_p5), %s10941_s30, 16, %s10939_s27, %s6716_s17  }
 0x8b8 PF: > { %p8620_p1 = scmp.ge.s32.totalorder %s8723_s28, 2  ;;  %s6740_s14 = sand.u32 1, %s8711_s25  }
 0x8b9   : > { %s6741_s20 = scalar_lea.sflag [#allocation5], %s6740_s14 }
 0x8ba   : > { %p8617_p2 = pnand %p8620_p1, %p8842_p6 }
 0x8bc   : > { %8706 = dma.done.wait (!%p8617_p2), %s6741_s20, 16  }
 0x8bd   : > { %8708 = vsyncadd (!%p8617_p2), %s6741_s20, 4294967280  ;;  %s11012_s28 = sld [smem:[#allocation8_spill]]  ;;  %s11013_s21 = sld [smem:[#allocation7_spill]] }
 0x8be   : > { %s11014_s27 = sld [smem:[#allocation9_spill]]  ;;  %s11015_s25 = smov %s8715_s26 }
 0x8c3   : > { %p23_p3 = scmp.ge.s32.totalorder %s11012_s28, 4   ;;  %s11016_s26 = smov %s11013_s21 }
 0x8c5   :  { %25 = sbr.rel (!%p23_p3) target bundleno = 3 (0x3), region = 140 }
 0x8cc   :  { %6745 = vsyncpa [#allocation5], 1 }
 0x8cd   :  { %6747 = vsyncpa [#allocation5 + $0x1], 1 }

</bundles_post_ra>
